<compile_context>
chip_gen: v6e
topology: v6e:2x2x1
jax: 0.10.0
libtpu: 0.0.40
codegen_flags: <defaults>
</compile_context>

<pallas_src>
import functools

import jax
import jax.numpy as jnp
from jax.experimental import pallas as pl
from jax.experimental.pallas import tpu as pltpu


def _round_up(n, m):
    return ((n + m - 1) // m) * m


# ----------------------------------------------------------------------------
# GRU cell with pre-folded biases.
#   xg already contains x@W_ih^T + b_ih(all gates) + b_hh(r,z gates).
#   bhn is the n-gate hidden bias, already broadcast to (B, H_pad).
#   h is f32; the recurrent matmul runs on the MXU in bf16 with f32 accumulate.
# ----------------------------------------------------------------------------
def _gru_cell(xg, h, whh_bf16, bhn, hp):
    hg = jnp.dot(h.astype(jnp.bfloat16), whh_bf16,
                 preferred_element_type=jnp.float32)
    r = jax.nn.sigmoid(xg[:, :hp] + hg[:, :hp])
    z = jax.nn.sigmoid(xg[:, hp:2 * hp] + hg[:, hp:2 * hp])
    n = jnp.tanh(xg[:, 2 * hp:] + r * (hg[:, 2 * hp:] + bhn))
    return (1.0 - z) * n + z * h


# ----------------------------------------------------------------------------
# Layer 0: fused (input projection + bidirectional recurrence).
#   grid = (nb,) sequential over time chunks; both directions advance together.
#   Inputs / outputs are 2D (S_pad*B_pad, D), time-major — a chunk is a
#   contiguous, lane-dense row block.
# ----------------------------------------------------------------------------
def _bigru_l0_kernel(xf_ref, xb_ref, wif_ref, wib_ref, whf_ref, whb_ref,
                     bpf_ref, bpb_ref, bnf_ref, bnb_ref,
                     outf_ref, outb_ref, hf_ref, hb_ref,
                     *, t_chunk, b_pad, h_pad, seq_len, masked):
    c = pl.program_id(0)
    nb = pl.num_programs(0)

    @pl.when(c == 0)
    def _():
        hf_ref[...] = jnp.zeros_like(hf_ref)
        hb_ref[...] = jnp.zeros_like(hb_ref)

    # Bulk per-chunk input projection (bf16 MXU, f32 accumulate). Biases are
    # pre-folded (b_ih + r/z parts of b_hh) into bp_*.
    xgf = jnp.dot(xf_ref[...].astype(jnp.bfloat16), wif_ref[...],
                  preferred_element_type=jnp.float32) + bpf_ref[...]
    xgb = jnp.dot(xb_ref[...].astype(jnp.bfloat16), wib_ref[...],
                  preferred_element_type=jnp.float32) + bpb_ref[...]

    whf = whf_ref[...]
    whb = whb_ref[...]
    bnf = jnp.broadcast_to(bnf_ref[...], (b_pad, h_pad))   # hoisted broadcasts
    bnb = jnp.broadcast_to(bnb_ref[...], (b_pad, h_pad))

    h_f = hf_ref[...]
    h_b = hb_ref[...]
    for i in range(t_chunk):            # static unrolled chunk loop
        j = t_chunk - 1 - i             # backward dir walks the chunk in reverse
        hf_new = _gru_cell(xgf[i * b_pad:(i + 1) * b_pad], h_f, whf, bnf, h_pad)
        hb_new = _gru_cell(xgb[j * b_pad:(j + 1) * b_pad], h_b, whb, bnb, h_pad)
        if masked:                      # static flag; only traced when S padded
            h_f = jnp.where(c * t_chunk + i < seq_len, hf_new, h_f)
            h_b = jnp.where((nb - 1 - c) * t_chunk + j < seq_len, hb_new, h_b)
        else:
            h_f, h_b = hf_new, hb_new
        outf_ref[i * b_pad:(i + 1) * b_pad, :] = h_f.astype(outf_ref.dtype)
        outb_ref[j * b_pad:(j + 1) * b_pad, :] = h_b.astype(outb_ref.dtype)
    hf_ref[...] = h_f
    hb_ref[...] = h_b


def _bigru_layer0(x2, lp, *, t_chunk, b_pad, h_pad, seq_len, masked):
    rows, e = x2.shape
    g3 = 3 * h_pad
    blk = t_chunk * b_pad
    nb = rows // blk
    kernel = functools.partial(_bigru_l0_kernel, t_chunk=t_chunk, b_pad=b_pad,
                               h_pad=h_pad, seq_len=seq_len, masked=masked)
    const = lambda shape: pl.BlockSpec(shape, lambda c: (0, 0))
    return pl.pallas_call(
        kernel,
        out_shape=(jax.ShapeDtypeStruct((rows, h_pad), jnp.bfloat16),
                   jax.ShapeDtypeStruct((rows, h_pad), jnp.bfloat16)),
        grid=(nb,),
        in_specs=[
            pl.BlockSpec((blk, e), lambda c: (c, 0)),            # x, fwd order
            pl.BlockSpec((blk, e), lambda c: (nb - 1 - c, 0)),   # x, reversed
            const((e, g3)), const((e, g3)),                      # W_ih f / b
            const((h_pad, g3)), const((h_pad, g3)),              # W_hh f / b
            const((1, g3)), const((1, g3)),                      # folded biases
            const((1, h_pad)), const((1, h_pad)),                # b_hn f / b
        ],
        out_specs=(
            pl.BlockSpec((blk, h_pad), lambda c: (c, 0)),
            pl.BlockSpec((blk, h_pad), lambda c: (nb - 1 - c, 0)),
        ),
        scratch_shapes=[pltpu.VMEM((b_pad, h_pad), jnp.float32)] * 2,
        compiler_params=pltpu.CompilerParams(
            dimension_semantics=("arbitrary",)),
    )(x2, x2, lp["wih_f"], lp["wih_b"], lp["whh_f"], lp["whh_b"],
      lp["bp_f"], lp["bp_b"], lp["bn_f"], lp["bn_b"])


# ----------------------------------------------------------------------------
# Layer 1: fused (input projection from both direction outputs + bidirectional
# recurrence + mean-over-time + classifier).
# ----------------------------------------------------------------------------
def _bigru_l1_kernel(yff_ref, ybf_ref, yfr_ref, ybr_ref,
                     waf_ref, wbf_ref, wab_ref, wbb_ref,
                     whf_ref, whb_ref, bpf_ref, bpb_ref, bnf_ref, bnb_ref,
                     cwf_ref, cwb_ref, cb_ref,
                     logit_ref, hf_ref, hb_ref, accf_ref, accb_ref,
                     *, t_chunk, b_pad, h_pad, seq_len, masked):
    c = pl.program_id(0)
    nb = pl.num_programs(0)

    @pl.when(c == 0)
    def _():
        hf_ref[...] = jnp.zeros_like(hf_ref)
        hb_ref[...] = jnp.zeros_like(hb_ref)
        accf_ref[...] = jnp.zeros_like(accf_ref)
        accb_ref[...] = jnp.zeros_like(accb_ref)

    # Per-chunk projection directly from the two layer-0 direction outputs
    # (bf16 in HBM already) — no concat / flip copies, no HBM gate tensor.
    xgf = (jnp.dot(yff_ref[...], waf_ref[...], preferred_element_type=jnp.float32)
           + jnp.dot(ybf_ref[...], wbf_ref[...], preferred_element_type=jnp.float32)
           + bpf_ref[...])
    xgb = (jnp.dot(yfr_ref[...], wab_ref[...], preferred_element_type=jnp.float32)
           + jnp.dot(ybr_ref[...], wbb_ref[...], preferred_element_type=jnp.float32)
           + bpb_ref[...])

    whf = whf_ref[...]
    whb = whb_ref[...]
    bnf = jnp.broadcast_to(bnf_ref[...], (b_pad, h_pad))
    bnb = jnp.broadcast_to(bnb_ref[...], (b_pad, h_pad))

    h_f = hf_ref[...]
    h_b = hb_ref[...]
    acc_f = accf_ref[...]
    acc_b = accb_ref[...]
    for i in range(t_chunk):
        j = t_chunk - 1 - i
        hf_new = _gru_cell(xgf[i * b_pad:(i + 1) * b_pad], h_f, whf, bnf, h_pad)
        hb_new = _gru_cell(xgb[j * b_pad:(j + 1) * b_pad], h_b, whb, bnb, h_pad)
        if masked:
            vf = c * t_chunk + i < seq_len
            vb = (nb - 1 - c) * t_chunk + j < seq_len
            h_f = jnp.where(vf, hf_new, h_f)
            h_b = jnp.where(vb, hb_new, h_b)
            acc_f = jnp.where(vf, acc_f + h_f, acc_f)
            acc_b = jnp.where(vb, acc_b + h_b, acc_b)
        else:
            h_f, h_b = hf_new, hb_new
            acc_f = acc_f + h_f
            acc_b = acc_b + h_b
    hf_ref[...] = h_f
    hb_ref[...] = h_b
    accf_ref[...] = acc_f
    accb_ref[...] = acc_b

    # Fused mean-over-time + classifier epilogue: layer-2 sequence output and
    # the means never touch HBM; no separate classifier launch.
    @pl.when(c == nb - 1)
    def _():
        inv_s = 1.0 / float(seq_len)
        mean_f = accf_ref[...] * inv_s
        mean_b = accb_ref[...] * inv_s
        logit_ref[...] = (
            jnp.dot(mean_f, cwf_ref[...], preferred_element_type=jnp.float32)
            + jnp.dot(mean_b, cwb_ref[...], preferred_element_type=jnp.float32)
            + cb_ref[...])


def _bigru_layer1(out_f, out_b, lp, cls, *, t_chunk, b_pad, h_pad,
                  seq_len, masked):
    rows = out_f.shape[0]
    g3 = 3 * h_pad
    v_pad = cls["wf"].shape[1]
    blk = t_chunk * b_pad
    nb = rows // blk
    kernel = functools.partial(_bigru_l1_kernel, t_chunk=t_chunk, b_pad=b_pad,
                               h_pad=h_pad, seq_len=seq_len, masked=masked)
    const = lambda shape: pl.BlockSpec(shape, lambda c: (0, 0))
    fwd_spec = pl.BlockSpec((blk, h_pad), lambda c: (c, 0))
    rev_spec = pl.BlockSpec((blk, h_pad), lambda c: (nb - 1 - c, 0))
    return pl.pallas_call(
        kernel,
        out_shape=jax.ShapeDtypeStruct((b_pad, v_pad), jnp.float32),
        grid=(nb,),
        in_specs=[
            fwd_spec, fwd_spec, rev_spec, rev_spec,       # out_f/out_b, fwd+rev
            const((h_pad, g3)), const((h_pad, g3)),       # W_ih fwd dir (f|b half)
            const((h_pad, g3)), const((h_pad, g3)),       # W_ih bwd dir (f|b half)
            const((h_pad, g3)), const((h_pad, g3)),       # W_hh f / b
            const((1, g3)), const((1, g3)),               # folded biases
            const((1, h_pad)), const((1, h_pad)),         # b_hn f / b
            const((h_pad, v_pad)), const((h_pad, v_pad)), const((1, v_pad)),
        ],
        out_specs=pl.BlockSpec((b_pad, v_pad), lambda c: (0, 0)),
        scratch_shapes=[pltpu.VMEM((b_pad, h_pad), jnp.float32)] * 4,
        compiler_params=pltpu.CompilerParams(
            dimension_semantics=("arbitrary",)),
    )(out_f, out_b, out_f, out_b,
      lp["wa_f"], lp["wb_f"], lp["wa_b"], lp["wb_b"],
      lp["whh_f"], lp["whh_b"], lp["bp_f"], lp["bp_b"],
      lp["bn_f"], lp["bn_b"], cls["wf"], cls["wb"], cls["b"])


# ----------------------------------------------------------------------------
# Parameter preparation: transpose, per-gate lane padding (H -> H_pad), bias
# folding, bf16 weight storage. Padded entries are zero so pad lanes stay 0.
# ----------------------------------------------------------------------------
def prepare_params(params, embedding_size, hidden_size, vocab_size):
    H = hidden_size
    Hp = _round_up(H, 128)
    V = vocab_size
    Vp = _round_up(V, 128)
    E = embedding_size
    kp = {"h": H, "h_pad": Hp, "v": V, "v_pad": Vp, "e": E}

    def gate_w(w, d_pad, dtype=jnp.bfloat16):
        # w: (3H, d) PyTorch layout -> (d_pad, 3*Hp), transposed, per-gate padded
        d = w.shape[1]
        wt = w.T.astype(jnp.float32)
        out = jnp.zeros((d_pad, 3 * Hp), jnp.float32)
        for g in range(3):
            out = out.at[:d, g * Hp:g * Hp + H].set(wt[:, g * H:(g + 1) * H])
        return out.astype(dtype)

    def proj_bias(b_ih, b_hh):
        # b_ih (all gates) + b_hh (r,z gates only); n-gate b_hh stays separate
        out = jnp.zeros((3 * Hp,), jnp.float32)
        for g in range(3):
            v = b_ih[g * H:(g + 1) * H]
            if g < 2:
                v = v + b_hh[g * H:(g + 1) * H]
            out = out.at[g * Hp:g * Hp + H].set(v)
        return out.reshape(1, 3 * Hp)

    def n_bias(b_hh):
        return jnp.zeros((1, Hp), jnp.float32).at[0, :H].set(b_hh[2 * H:])

    f0, b0 = params["gru"][0]["fwd"], params["gru"][0]["bwd"]
    kp["l0"] = {
        "wih_f": gate_w(f0["w_ih"], E), "wih_b": gate_w(b0["w_ih"], E),
        "whh_f": gate_w(f0["w_hh"], Hp), "whh_b": gate_w(b0["w_hh"], Hp),
        "bp_f": proj_bias(f0["b_ih"], f0["b_hh"]),
        "bp_b": proj_bias(b0["b_ih"], b0["b_hh"]),
        "bn_f": n_bias(f0["b_hh"]), "bn_b": n_bias(b0["b_hh"]),
    }

    # Layer 1: input is [out_f | out_b]; split W_ih by which half it consumes.
    f1, b1 = params["gru"][1]["fwd"], params["gru"][1]["bwd"]
    kp["l1"] = {
        "wa_f": gate_w(f1["w_ih"][:, :H], Hp), "wb_f": gate_w(f1["w_ih"][:, H:], Hp),
        "wa_b": gate_w(b1["w_ih"][:, :H], Hp), "wb_b": gate_w(b1["w_ih"][:, H:], Hp),
        "whh_f": gate_w(f1["w_hh"], Hp), "whh_b": gate_w(b1["w_hh"], Hp),
        "bp_f": proj_bias(f1["b_ih"], f1["b_hh"]),
        "bp_b": proj_bias(b1["b_ih"], b1["b_hh"]),
        "bn_f": n_bias(f1["b_hh"]), "bn_b": n_bias(b1["b_hh"]),
    }

    # Classifier: (V, 2H) split into forward/backward halves; kept f32 (tiny).
    w_t = params["cls"]["w"].T.astype(jnp.float32)   # (2H, V)
    kp["cls"] = {
        "wf": jnp.zeros((Hp, Vp), jnp.float32).at[:H, :V].set(w_t[:H]),
        "wb": jnp.zeros((Hp, Vp), jnp.float32).at[:H, :V].set(w_t[H:]),
        "b": jnp.zeros((1, Vp), jnp.float32).at[0, :V].set(params["cls"]["b"]),
    }
    return kp


# ----------------------------------------------------------------------------
# Full model forward.
# ----------------------------------------------------------------------------
def gru_diff_forward(x, kp):
    """x: (S, B, E) float32 -> logits (B, vocab)."""
    S, B, E = x.shape
    Hp, V = kp["h_pad"], kp["v"]
    B_pad = _round_up(B, 8)

    # Balanced cdiv time chunking: nb chunks of size t_chunk, S padded by
    # < nb timesteps (masked in-kernel). Avoids the t_chunk=1 cliff for
    # prime / awkward S.
    T_MAX = 32   # TODO(synk): sweep per generation (64-128 fits v5e/v6e's
                 # 128 MiB VMEM; keep smaller on v7x's 64 MiB at large H).
    nb = -(-S // T_MAX)
    t_chunk = -(-S // nb)
    S_pad = nb * t_chunk
    masked = S_pad != S

    xp = x
    if S_pad != S or B_pad != B:
        xp = jnp.pad(x, ((0, S_pad - S), (0, B_pad - B), (0, 0)))
    x2 = xp.reshape(S_pad * B_pad, E)   # time-major 2D, lane-dense chunks

    # Layer 0: fused projection + bidirectional recurrence (bf16 outputs).
    out_f, out_b = _bigru_layer0(x2, kp["l0"], t_chunk=t_chunk, b_pad=B_pad,
                                 h_pad=Hp, seq_len=S, masked=masked)

    # TODO(synk): inter-layer dropout (p=0.1) is training-mode only; eval
    # forward implemented here (dropout disabled).

    # Layer 1: fused projection + recurrence + mean-over-time + classifier.
    logits = _bigru_layer1(out_f, out_b, kp["l1"], kp["cls"],
                           t_chunk=t_chunk, b_pad=B_pad, h_pad=Hp,
                           seq_len=S, masked=masked)
    return logits[:B, :V]


# ----------------------------------------------------------------------------
# Deterministic parameter init (PyTorch-style uniform(-1/sqrt(H), 1/sqrt(H))),
# kept in raw PyTorch layout; prepare_params() builds the padded kernel layout.
# ----------------------------------------------------------------------------
def init_params(key, embedding_size, hidden_size, vocab_size):
    H = hidden_size
    k_gru = 1.0 / jnp.sqrt(jnp.float32(H))
    params = {"gru": {}, "cls": {}}
    for layer in (0, 1):
        d_in = embedding_size if layer == 0 else 2 * H
        params["gru"][layer] = {}
        for direction in ("fwd", "bwd"):
            key, k1, k2, k3, k4 = jax.random.split(key, 5)
            params["gru"][layer][direction] = {
                "w_ih": jax.random.uniform(k1, (3 * H, d_in), jnp.float32,
                                           -k_gru, k_gru),
                "w_hh": jax.random.uniform(k2, (3 * H, H), jnp.float32,
                                           -k_gru, k_gru),
                "b_ih": jax.random.uniform(k3, (3 * H,), jnp.float32,
                                           -k_gru, k_gru),
                "b_hh": jax.random.uniform(k4, (3 * H,), jnp.float32,
                                           -k_gru, k_gru),
            }
    k_cls = 1.0 / jnp.sqrt(jnp.float32(2 * H))
    key, k1, k2 = jax.random.split(key, 3)
    params["cls"] = {
        "w": jax.random.uniform(k1, (vocab_size, 2 * H), jnp.float32,
                                -k_cls, k_cls),
        "b": jax.random.uniform(k2, (vocab_size,), jnp.float32, -k_cls, k_cls),
    }
    return params


# ----------------------------------------------------------------------------
# Pure-JAX f32 reference (from the raw, unpadded params) for correctness.
# ----------------------------------------------------------------------------
def _gru_direction_ref(x, p):
    H = p["w_hh"].shape[1]
    wih_t, whh_t = p["w_ih"].T, p["w_hh"].T
    bih, bhh = p["b_ih"], p["b_hh"]

    def step(h, xt):
        xg = xt @ wih_t + bih
        hg = h @ whh_t + bhh
        r = jax.nn.sigmoid(xg[:, :H] + hg[:, :H])
        z = jax.nn.sigmoid(xg[:, H:2 * H] + hg[:, H:2 * H])
        n = jnp.tanh(xg[:, 2 * H:] + r * hg[:, 2 * H:])
        h_new = (1.0 - z) * n + z * h
        return h_new, h_new

    h0 = jnp.zeros((x.shape[1], H), jnp.float32)
    _, out = jax.lax.scan(step, h0, x)
    return out


def gru_diff_forward_ref(x, params):
    layer_in = x
    for layer in (0, 1):
        out_f = _gru_direction_ref(layer_in, params["gru"][layer]["fwd"])
        out_b = jnp.flip(
            _gru_direction_ref(jnp.flip(layer_in, axis=0),
                               params["gru"][layer]["bwd"]), axis=0)
        layer_in = jnp.concatenate([out_f, out_b], axis=-1)
    m = jnp.mean(layer_in, axis=0)
    return m @ params["cls"]["w"].T + params["cls"]["b"]


if __name__ == "__main__":
    embedding_size, hidden_size, vocab_size = 16, 32, 64
    seq_len, batch = 8, 4

    key = jax.random.PRNGKey(0)
    key, xkey = jax.random.split(key)
    x = jax.random.normal(xkey, (seq_len, batch, embedding_size), jnp.float32)
    params = init_params(key, embedding_size, hidden_size, vocab_size)
    kparams = prepare_params(params, embedding_size, hidden_size, vocab_size)

    out = jax.block_until_ready(gru_diff_forward(x, kparams))
    ref = jax.block_until_ready(gru_diff_forward_ref(x, params))

    assert out.shape == (batch, vocab_size), out.shape
    # bf16 MXU matmuls (f32 accumulate) -> looser tolerance than pure-f32 ref.
    assert jnp.allclose(out, ref, atol=3e-2, rtol=3e-2), float(
        jnp.max(jnp.abs(out - ref)))
    print("KERNEL_OK")
</pallas_src>

<mosaic_0001>
module attributes {stable_mosaic.version = 11 : i64} {
  func.func @_bigru_l0_kernel(%arg0: i32, %arg1: memref<64x16xf32, #tpu.memory_space<vmem>>, %arg2: memref<64x16xf32, #tpu.memory_space<vmem>>, %arg3: memref<16x384xbf16, #tpu.memory_space<vmem>>, %arg4: memref<16x384xbf16, #tpu.memory_space<vmem>>, %arg5: memref<128x384xbf16, #tpu.memory_space<vmem>>, %arg6: memref<128x384xbf16, #tpu.memory_space<vmem>>, %arg7: memref<1x384xf32, #tpu.memory_space<vmem>>, %arg8: memref<1x384xf32, #tpu.memory_space<vmem>>, %arg9: memref<1x128xf32, #tpu.memory_space<vmem>>, %arg10: memref<1x128xf32, #tpu.memory_space<vmem>>, %arg11: memref<64x128xbf16, #tpu.memory_space<vmem>>, %arg12: memref<64x128xbf16, #tpu.memory_space<vmem>>, %arg13: memref<8x128xf32, #tpu.memory_space<vmem>>, %arg14: memref<8x128xf32, #tpu.memory_space<vmem>>) attributes {dimension_semantics = [#tpu.dimension_semantics<arbitrary>], iteration_bounds = array<i64: 1>, scalar_prefetch = 0 : i64, scratch_operands = 2 : i64, tpu.core_type = #tpu.core_type<tc>, window_params = [{transform_indices = @transform_0, window_bounds = array<i64: 64, 16>}, {transform_indices = @transform_1, window_bounds = array<i64: 64, 16>}, {pipeline_mode = #tpu.pipeline_mode<synchronous>, transform_indices = @transform_2, window_bounds = array<i64: 16, 384>}, {pipeline_mode = #tpu.pipeline_mode<synchronous>, transform_indices = @transform_3, window_bounds = array<i64: 16, 384>}, {pipeline_mode = #tpu.pipeline_mode<synchronous>, transform_indices = @transform_4, window_bounds = array<i64: 128, 384>}, {pipeline_mode = #tpu.pipeline_mode<synchronous>, transform_indices = @transform_5, window_bounds = array<i64: 128, 384>}, {pipeline_mode = #tpu.pipeline_mode<synchronous>, transform_indices = @transform_6, window_bounds = array<i64: 1, 384>}, {pipeline_mode = #tpu.pipeline_mode<synchronous>, transform_indices = @transform_7, window_bounds = array<i64: 1, 384>}, {pipeline_mode = #tpu.pipeline_mode<synchronous>, transform_indices = @transform_8, window_bounds = array<i64: 1, 128>}, {pipeline_mode = #tpu.pipeline_mode<synchronous>, transform_indices = @transform_9, window_bounds = array<i64: 1, 128>}, {transform_indices = @transform_10, window_bounds = array<i64: 64, 128>}, {transform_indices = @transform_11, window_bounds = array<i64: 64, 128>}]} {
    %c0_i32 = arith.constant 0 : i32
    %0 = arith.cmpi eq, %arg0, %c0_i32 : i32
    %1 = arith.extui %0 : i1 to i32
    %c0_i32_0 = arith.constant 0 : i32
    %2 = arith.cmpi ne, %1, %c0_i32_0 : i32
    scf.if %2 {
      %cst_118 = arith.constant 0.000000e+00 : f32
      %541 = vector.broadcast %cst_118 : f32 to vector<8x128xf32>
      %c0_119 = arith.constant 0 : index
      %c0_120 = arith.constant 0 : index
      %542 = vector.load %arg13[%c0_119, %c0_120] : memref<8x128xf32, #tpu.memory_space<vmem>>, vector<8x128xf32>
      tpu.vector_store %arg13[%c0_119, %c0_120], %541 {strides = array<i32>} : memref<8x128xf32, #tpu.memory_space<vmem>>, vector<8x128xf32>,
      %cst_121 = arith.constant 0.000000e+00 : f32
      %543 = vector.broadcast %cst_121 : f32 to vector<8x128xf32>
      %c0_122 = arith.constant 0 : index
      %c0_123 = arith.constant 0 : index
      %544 = vector.load %arg14[%c0_122, %c0_123] : memref<8x128xf32, #tpu.memory_space<vmem>>, vector<8x128xf32>
      tpu.vector_store %arg14[%c0_122, %c0_123], %543 {strides = array<i32>} : memref<8x128xf32, #tpu.memory_space<vmem>>, vector<8x128xf32>,
    } else {
    }
    %c0 = arith.constant 0 : index
    %c0_1 = arith.constant 0 : index
    %3 = vector.load %arg1[%c0, %c0_1] : memref<64x16xf32, #tpu.memory_space<vmem>>, vector<64x16xf32>
    %4 = arith.truncf %3 : vector<64x16xf32> to vector<64x16xbf16>
    %c0_2 = arith.constant 0 : index
    %c0_3 = arith.constant 0 : index
    %5 = vector.load %arg3[%c0_2, %c0_3] : memref<16x384xbf16, #tpu.memory_space<vmem>>, vector<16x384xbf16>
    %cst = arith.constant dense<0.000000e+00> : vector<64x384xf32>
    %6 = tpu.matmul %4, %5, %cst {dimension_numbers = #tpu.dot_dimension_numbers<[1], [0], [0], [1], [0, 0, 1, 1], [], []>} : vector<64x16xbf16>, vector<16x384xbf16>, vector<64x384xf32> -> vector<64x384xf32>
    %c0_4 = arith.constant 0 : index
    %c0_5 = arith.constant 0 : index
    %7 = vector.load %arg7[%c0_4, %c0_5] : memref<1x384xf32, #tpu.memory_space<vmem>>, vector<1x384xf32>
    %8 = vector.broadcast %7 : vector<1x384xf32> to vector<64x384xf32>
    %9 = arith.addf %6, %8 : vector<64x384xf32>
    %c0_6 = arith.constant 0 : index
    %c0_7 = arith.constant 0 : index
    %10 = vector.load %arg2[%c0_6, %c0_7] : memref<64x16xf32, #tpu.memory_space<vmem>>, vector<64x16xf32>
    %11 = arith.truncf %10 : vector<64x16xf32> to vector<64x16xbf16>
    %c0_8 = arith.constant 0 : index
    %c0_9 = arith.constant 0 : index
    %12 = vector.load %arg4[%c0_8, %c0_9] : memref<16x384xbf16, #tpu.memory_space<vmem>>, vector<16x384xbf16>
    %cst_10 = arith.constant dense<0.000000e+00> : vector<64x384xf32>
    %13 = tpu.matmul %11, %12, %cst_10 {dimension_numbers = #tpu.dot_dimension_numbers<[1], [0], [0], [1], [0, 0, 1, 1], [], []>} : vector<64x16xbf16>, vector<16x384xbf16>, vector<64x384xf32> -> vector<64x384xf32>
    %c0_11 = arith.constant 0 : index
    %c0_12 = arith.constant 0 : index
    %14 = vector.load %arg8[%c0_11, %c0_12] : memref<1x384xf32, #tpu.memory_space<vmem>>, vector<1x384xf32>
    %15 = vector.broadcast %14 : vector<1x384xf32> to vector<64x384xf32>
    %16 = arith.addf %13, %15 : vector<64x384xf32>
    %c0_13 = arith.constant 0 : index
    %c0_14 = arith.constant 0 : index
    %17 = vector.load %arg5[%c0_13, %c0_14] : memref<128x384xbf16, #tpu.memory_space<vmem>>, vector<128x384xbf16>
    %c0_15 = arith.constant 0 : index
    %c0_16 = arith.constant 0 : index
    %18 = vector.load %arg6[%c0_15, %c0_16] : memref<128x384xbf16, #tpu.memory_space<vmem>>, vector<128x384xbf16>
    %c0_17 = arith.constant 0 : index
    %c0_18 = arith.constant 0 : index
    %19 = vector.load %arg9[%c0_17, %c0_18] : memref<1x128xf32, #tpu.memory_space<vmem>>, vector<1x128xf32>
    %20 = vector.shape_cast %19 : vector<1x128xf32> to vector<1x128xf32>
    %21 = vector.broadcast %20 : vector<1x128xf32> to vector<8x128xf32>
    %c0_19 = arith.constant 0 : index
    %c0_20 = arith.constant 0 : index
    %22 = vector.load %arg10[%c0_19, %c0_20] : memref<1x128xf32, #tpu.memory_space<vmem>>, vector<1x128xf32>
    %23 = vector.shape_cast %22 : vector<1x128xf32> to vector<1x128xf32>
    %24 = vector.broadcast %23 : vector<1x128xf32> to vector<8x128xf32>
    %c0_21 = arith.constant 0 : index
    %c0_22 = arith.constant 0 : index
    %25 = vector.load %arg13[%c0_21, %c0_22] : memref<8x128xf32, #tpu.memory_space<vmem>>, vector<8x128xf32>
    %c0_23 = arith.constant 0 : index
    %c0_24 = arith.constant 0 : index
    %26 = vector.load %arg14[%c0_23, %c0_24] : memref<8x128xf32, #tpu.memory_space<vmem>>, vector<8x128xf32>
    %27 = vector.extract_strided_slice %9 {offsets = [0, 0], sizes = [8, 384], strides = [1, 1]} : vector<64x384xf32> to vector<8x384xf32>
    %28 = arith.truncf %25 : vector<8x128xf32> to vector<8x128xbf16>
    %cst_25 = arith.constant dense<0.000000e+00> : vector<8x384xf32>
    %29 = tpu.matmul %28, %17, %cst_25 {dimension_numbers = #tpu.dot_dimension_numbers<[1], [0], [0], [1], [0, 0, 1, 1], [], []>} : vector<8x128xbf16>, vector<128x384xbf16>, vector<8x384xf32> -> vector<8x384xf32>
    %30 = vector.extract_strided_slice %27 {offsets = [0, 0], sizes = [8, 128], strides = [1, 1]} : vector<8x384xf32> to vector<8x128xf32>
    %31 = vector.extract_strided_slice %29 {offsets = [0, 0], sizes = [8, 128], strides = [1, 1]} : vector<8x384xf32> to vector<8x128xf32>
    %32 = arith.addf %30, %31 : vector<8x128xf32>
    %33 = arith.negf %32 : vector<8x128xf32>
    %34 = math.exp %33 : vector<8x128xf32>
    %cst_26 = arith.constant 1.000000e+00 : f32
    %35 = vector.broadcast %cst_26 : f32 to vector<8x128xf32>
    %36 = arith.addf %35, %34 : vector<8x128xf32>
    %37 = arith.divf %35, %36 : vector<8x128xf32>
    %38 = vector.extract_strided_slice %27 {offsets = [0, 128], sizes = [8, 128], strides = [1, 1]} : vector<8x384xf32> to vector<8x128xf32>
    %39 = vector.extract_strided_slice %29 {offsets = [0, 128], sizes = [8, 128], strides = [1, 1]} : vector<8x384xf32> to vector<8x128xf32>
    %40 = arith.addf %38, %39 : vector<8x128xf32>
    %41 = arith.negf %40 : vector<8x128xf32>
    %42 = math.exp %41 : vector<8x128xf32>
    %cst_27 = arith.constant 1.000000e+00 : f32
    %43 = vector.broadcast %cst_27 : f32 to vector<8x128xf32>
    %44 = arith.addf %43, %42 : vector<8x128xf32>
    %45 = arith.divf %43, %44 : vector<8x128xf32>
    %46 = vector.extract_strided_slice %27 {offsets = [0, 256], sizes = [8, 128], strides = [1, 1]} : vector<8x384xf32> to vector<8x128xf32>
    %47 = vector.extract_strided_slice %29 {offsets = [0, 256], sizes = [8, 128], strides = [1, 1]} : vector<8x384xf32> to vector<8x128xf32>
    %48 = arith.addf %47, %21 : vector<8x128xf32>
    %49 = arith.mulf %37, %48 : vector<8x128xf32>
    %50 = arith.addf %46, %49 : vector<8x128xf32>
    %51 = math.tanh %50 : vector<8x128xf32>
    %cst_28 = arith.constant 1.000000e+00 : f32
    %52 = vector.broadcast %cst_28 : f32 to vector<8x128xf32>
    %53 = arith.subf %52, %45 : vector<8x128xf32>
    %54 = arith.mulf %53, %51 : vector<8x128xf32>
    %55 = arith.mulf %45, %25 : vector<8x128xf32>
    %56 = arith.addf %54, %55 : vector<8x128xf32>
    %57 = vector.extract_strided_slice %16 {offsets = [56, 0], sizes = [8, 384], strides = [1, 1]} : vector<64x384xf32> to vector<8x384xf32>
    %58 = arith.truncf %26 : vector<8x128xf32> to vector<8x128xbf16>
    %cst_29 = arith.constant dense<0.000000e+00> : vector<8x384xf32>
    %59 = tpu.matmul %58, %18, %cst_29 {dimension_numbers = #tpu.dot_dimension_numbers<[1], [0], [0], [1], [0, 0, 1, 1], [], []>} : vector<8x128xbf16>, vector<128x384xbf16>, vector<8x384xf32> -> vector<8x384xf32>
    %60 = vector.extract_strided_slice %57 {offsets = [0, 0], sizes = [8, 128], strides = [1, 1]} : vector<8x384xf32> to vector<8x128xf32>
    %61 = vector.extract_strided_slice %59 {offsets = [0, 0], sizes = [8, 128], strides = [1, 1]} : vector<8x384xf32> to vector<8x128xf32>
    %62 = arith.addf %60, %61 : vector<8x128xf32>
    %63 = arith.negf %62 : vector<8x128xf32>
    %64 = math.exp %63 : vector<8x128xf32>
    %cst_30 = arith.constant 1.000000e+00 : f32
    %65 = vector.broadcast %cst_30 : f32 to vector<8x128xf32>
    %66 = arith.addf %65, %64 : vector<8x128xf32>
    %67 = arith.divf %65, %66 : vector<8x128xf32>
    %68 = vector.extract_strided_slice %57 {offsets = [0, 128], sizes = [8, 128], strides = [1, 1]} : vector<8x384xf32> to vector<8x128xf32>
    %69 = vector.extract_strided_slice %59 {offsets = [0, 128], sizes = [8, 128], strides = [1, 1]} : vector<8x384xf32> to vector<8x128xf32>
    %70 = arith.addf %68, %69 : vector<8x128xf32>
    %71 = arith.negf %70 : vector<8x128xf32>
    %72 = math.exp %71 : vector<8x128xf32>
    %cst_31 = arith.constant 1.000000e+00 : f32
    %73 = vector.broadcast %cst_31 : f32 to vector<8x128xf32>
    %74 = arith.addf %73, %72 : vector<8x128xf32>
    %75 = arith.divf %73, %74 : vector<8x128xf32>
    %76 = vector.extract_strided_slice %57 {offsets = [0, 256], sizes = [8, 128], strides = [1, 1]} : vector<8x384xf32> to vector<8x128xf32>
    %77 = vector.extract_strided_slice %59 {offsets = [0, 256], sizes = [8, 128], strides = [1, 1]} : vector<8x384xf32> to vector<8x128xf32>
    %78 = arith.addf %77, %24 : vector<8x128xf32>
    %79 = arith.mulf %67, %78 : vector<8x128xf32>
    %80 = arith.addf %76, %79 : vector<8x128xf32>
    %81 = math.tanh %80 : vector<8x128xf32>
    %cst_32 = arith.constant 1.000000e+00 : f32
    %82 = vector.broadcast %cst_32 : f32 to vector<8x128xf32>
    %83 = arith.subf %82, %75 : vector<8x128xf32>
    %84 = arith.mulf %83, %81 : vector<8x128xf32>
    %85 = arith.mulf %75, %26 : vector<8x128xf32>
    %86 = arith.addf %84, %85 : vector<8x128xf32>
    %87 = arith.truncf %56 : vector<8x128xf32> to vector<8x128xbf16>
    %c0_33 = arith.constant 0 : index
    %c0_34 = arith.constant 0 : index
    %88 = vector.load %arg11[%c0_33, %c0_34] : memref<64x128xbf16, #tpu.memory_space<vmem>>, vector<8x128xbf16>
    tpu.vector_store %arg11[%c0_33, %c0_34], %87 {strides = array<i32>} : memref<64x128xbf16, #tpu.memory_space<vmem>>, vector<8x128xbf16>,
    %89 = arith.truncf %86 : vector<8x128xf32> to vector<8x128xbf16>
    %c56 = arith.constant 56 : index
    %c0_35 = arith.constant 0 : index
    %90 = vector.load %arg12[%c56, %c0_35] : memref<64x128xbf16, #tpu.memory_space<vmem>>, vector<8x128xbf16>
    tpu.vector_store %arg12[%c56, %c0_35], %89 {strides = array<i32>} : memref<64x128xbf16, #tpu.memory_space<vmem>>, vector<8x128xbf16>,
    %91 = vector.extract_strided_slice %9 {offsets = [8, 0], sizes = [8, 384], strides = [1, 1]} : vector<64x384xf32> to vector<8x384xf32>
    %92 = arith.truncf %56 : vector<8x128xf32> to vector<8x128xbf16>
    %cst_36 = arith.constant dense<0.000000e+00> : vector<8x384xf32>
    %93 = tpu.matmul %92, %17, %cst_36 {dimension_numbers = #tpu.dot_dimension_numbers<[1], [0], [0], [1], [0, 0, 1, 1], [], []>} : vector<8x128xbf16>, vector<128x384xbf16>, vector<8x384xf32> -> vector<8x384xf32>
    %94 = vector.extract_strided_slice %91 {offsets = [0, 0], sizes = [8, 128], strides = [1, 1]} : vector<8x384xf32> to vector<8x128xf32>
    %95 = vector.extract_strided_slice %93 {offsets = [0, 0], sizes = [8, 128], strides = [1, 1]} : vector<8x384xf32> to vector<8x128xf32>
    %96 = arith.addf %94, %95 : vector<8x128xf32>
    %97 = arith.negf %96 : vector<8x128xf32>
    %98 = math.exp %97 : vector<8x128xf32>
    %cst_37 = arith.constant 1.000000e+00 : f32
    %99 = vector.broadcast %cst_37 : f32 to vector<8x128xf32>
    %100 = arith.addf %99, %98 : vector<8x128xf32>
    %101 = arith.divf %99, %100 : vector<8x128xf32>
    %102 = vector.extract_strided_slice %91 {offsets = [0, 128], sizes = [8, 128], strides = [1, 1]} : vector<8x384xf32> to vector<8x128xf32>
    %103 = vector.extract_strided_slice %93 {offsets = [0, 128], sizes = [8, 128], strides = [1, 1]} : vector<8x384xf32> to vector<8x128xf32>
    %104 = arith.addf %102, %103 : vector<8x128xf32>
    %105 = arith.negf %104 : vector<8x128xf32>
    %106 = math.exp %105 : vector<8x128xf32>
    %cst_38 = arith.constant 1.000000e+00 : f32
    %107 = vector.broadcast %cst_38 : f32 to vector<8x128xf32>
    %108 = arith.addf %107, %106 : vector<8x128xf32>
    %109 = arith.divf %107, %108 : vector<8x128xf32>
    %110 = vector.extract_strided_slice %91 {offsets = [0, 256], sizes = [8, 128], strides = [1, 1]} : vector<8x384xf32> to vector<8x128xf32>
    %111 = vector.extract_strided_slice %93 {offsets = [0, 256], sizes = [8, 128], strides = [1, 1]} : vector<8x384xf32> to vector<8x128xf32>
    %112 = arith.addf %111, %21 : vector<8x128xf32>
    %113 = arith.mulf %101, %112 : vector<8x128xf32>
    %114 = arith.addf %110, %113 : vector<8x128xf32>
    %115 = math.tanh %114 : vector<8x128xf32>
    %cst_39 = arith.constant 1.000000e+00 : f32
    %116 = vector.broadcast %cst_39 : f32 to vector<8x128xf32>
    %117 = arith.subf %116, %109 : vector<8x128xf32>
    %118 = arith.mulf %117, %115 : vector<8x128xf32>
    %119 = arith.mulf %109, %56 : vector<8x128xf32>
    %120 = arith.addf %118, %119 : vector<8x128xf32>
    %121 = vector.extract_strided_slice %16 {offsets = [48, 0], sizes = [8, 384], strides = [1, 1]} : vector<64x384xf32> to vector<8x384xf32>
    %122 = arith.truncf %86 : vector<8x128xf32> to vector<8x128xbf16>
    %cst_40 = arith.constant dense<0.000000e+00> : vector<8x384xf32>
    %123 = tpu.matmul %122, %18, %cst_40 {dimension_numbers = #tpu.dot_dimension_numbers<[1], [0], [0], [1], [0, 0, 1, 1], [], []>} : vector<8x128xbf16>, vector<128x384xbf16>, vector<8x384xf32> -> vector<8x384xf32>
    %124 = vector.extract_strided_slice %121 {offsets = [0, 0], sizes = [8, 128], strides = [1, 1]} : vector<8x384xf32> to vector<8x128xf32>
    %125 = vector.extract_strided_slice %123 {offsets = [0, 0], sizes = [8, 128], strides = [1, 1]} : vector<8x384xf32> to vector<8x128xf32>
    %126 = arith.addf %124, %125 : vector<8x128xf32>
    %127 = arith.negf %126 : vector<8x128xf32>
    %128 = math.exp %127 : vector<8x128xf32>
    %cst_41 = arith.constant 1.000000e+00 : f32
    %129 = vector.broadcast %cst_41 : f32 to vector<8x128xf32>
    %130 = arith.addf %129, %128 : vector<8x128xf32>
    %131 = arith.divf %129, %130 : vector<8x128xf32>
    %132 = vector.extract_strided_slice %121 {offsets = [0, 128], sizes = [8, 128], strides = [1, 1]} : vector<8x384xf32> to vector<8x128xf32>
    %133 = vector.extract_strided_slice %123 {offsets = [0, 128], sizes = [8, 128], strides = [1, 1]} : vector<8x384xf32> to vector<8x128xf32>
    %134 = arith.addf %132, %133 : vector<8x128xf32>
    %135 = arith.negf %134 : vector<8x128xf32>
    %136 = math.exp %135 : vector<8x128xf32>
    %cst_42 = arith.constant 1.000000e+00 : f32
    %137 = vector.broadcast %cst_42 : f32 to vector<8x128xf32>
    %138 = arith.addf %137, %136 : vector<8x128xf32>
    %139 = arith.divf %137, %138 : vector<8x128xf32>
    %140 = vector.extract_strided_slice %121 {offsets = [0, 256], sizes = [8, 128], strides = [1, 1]} : vector<8x384xf32> to vector<8x128xf32>
    %141 = vector.extract_strided_slice %123 {offsets = [0, 256], sizes = [8, 128], strides = [1, 1]} : vector<8x384xf32> to vector<8x128xf32>
    %142 = arith.addf %141, %24 : vector<8x128xf32>
    %143 = arith.mulf %131, %142 : vector<8x128xf32>
    %144 = arith.addf %140, %143 : vector<8x128xf32>
    %145 = math.tanh %144 : vector<8x128xf32>
    %cst_43 = arith.constant 1.000000e+00 : f32
    %146 = vector.broadcast %cst_43 : f32 to vector<8x128xf32>
    %147 = arith.subf %146, %139 : vector<8x128xf32>
    %148 = arith.mulf %147, %145 : vector<8x128xf32>
    %149 = arith.mulf %139, %86 : vector<8x128xf32>
    %150 = arith.addf %148, %149 : vector<8x128xf32>
    %151 = arith.truncf %120 : vector<8x128xf32> to vector<8x128xbf16>
    %c8 = arith.constant 8 : index
    %c0_44 = arith.constant 0 : index
    %152 = vector.load %arg11[%c8, %c0_44] : memref<64x128xbf16, #tpu.memory_space<vmem>>, vector<8x128xbf16>
    tpu.vector_store %arg11[%c8, %c0_44], %151 {strides = array<i32>} : memref<64x128xbf16, #tpu.memory_space<vmem>>, vector<8x128xbf16>,
    %153 = arith.truncf %150 : vector<8x128xf32> to vector<8x128xbf16>
    %c48 = arith.constant 48 : index
    %c0_45 = arith.constant 0 : index
    %154 = vector.load %arg12[%c48, %c0_45] : memref<64x128xbf16, #tpu.memory_space<vmem>>, vector<8x128xbf16>
    tpu.vector_store %arg12[%c48, %c0_45], %153 {strides = array<i32>} : memref<64x128xbf16, #tpu.memory_space<vmem>>, vector<8x128xbf16>,
    %155 = vector.extract_strided_slice %9 {offsets = [16, 0], sizes = [8, 384], strides = [1, 1]} : vector<64x384xf32> to vector<8x384xf32>
    %156 = arith.truncf %120 : vector<8x128xf32> to vector<8x128xbf16>
    %cst_46 = arith.constant dense<0.000000e+00> : vector<8x384xf32>
    %157 = tpu.matmul %156, %17, %cst_46 {dimension_numbers = #tpu.dot_dimension_numbers<[1], [0], [0], [1], [0, 0, 1, 1], [], []>} : vector<8x128xbf16>, vector<128x384xbf16>, vector<8x384xf32> -> vector<8x384xf32>
    %158 = vector.extract_strided_slice %155 {offsets = [0, 0], sizes = [8, 128], strides = [1, 1]} : vector<8x384xf32> to vector<8x128xf32>
    %159 = vector.extract_strided_slice %157 {offsets = [0, 0], sizes = [8, 128], strides = [1, 1]} : vector<8x384xf32> to vector<8x128xf32>
    %160 = arith.addf %158, %159 : vector<8x128xf32>
    %161 = arith.negf %160 : vector<8x128xf32>
    %162 = math.exp %161 : vector<8x128xf32>
    %cst_47 = arith.constant 1.000000e+00 : f32
    %163 = vector.broadcast %cst_47 : f32 to vector<8x128xf32>
    %164 = arith.addf %163, %162 : vector<8x128xf32>
    %165 = arith.divf %163, %164 : vector<8x128xf32>
    %166 = vector.extract_strided_slice %155 {offsets = [0, 128], sizes = [8, 128], strides = [1, 1]} : vector<8x384xf32> to vector<8x128xf32>
    %167 = vector.extract_strided_slice %157 {offsets = [0, 128], sizes = [8, 128], strides = [1, 1]} : vector<8x384xf32> to vector<8x128xf32>
    %168 = arith.addf %166, %167 : vector<8x128xf32>
    %169 = arith.negf %168 : vector<8x128xf32>
    %170 = math.exp %169 : vector<8x128xf32>
    %cst_48 = arith.constant 1.000000e+00 : f32
    %171 = vector.broadcast %cst_48 : f32 to vector<8x128xf32>
    %172 = arith.addf %171, %170 : vector<8x128xf32>
    %173 = arith.divf %171, %172 : vector<8x128xf32>
    %174 = vector.extract_strided_slice %155 {offsets = [0, 256], sizes = [8, 128], strides = [1, 1]} : vector<8x384xf32> to vector<8x128xf32>
    %175 = vector.extract_strided_slice %157 {offsets = [0, 256], sizes = [8, 128], strides = [1, 1]} : vector<8x384xf32> to vector<8x128xf32>
    %176 = arith.addf %175, %21 : vector<8x128xf32>
    %177 = arith.mulf %165, %176 : vector<8x128xf32>
    %178 = arith.addf %174, %177 : vector<8x128xf32>
    %179 = math.tanh %178 : vector<8x128xf32>
    %cst_49 = arith.constant 1.000000e+00 : f32
    %180 = vector.broadcast %cst_49 : f32 to vector<8x128xf32>
    %181 = arith.subf %180, %173 : vector<8x128xf32>
    %182 = arith.mulf %181, %179 : vector<8x128xf32>
    %183 = arith.mulf %173, %120 : vector<8x128xf32>
    %184 = arith.addf %182, %183 : vector<8x128xf32>
    %185 = vector.extract_strided_slice %16 {offsets = [40, 0], sizes = [8, 384], strides = [1, 1]} : vector<64x384xf32> to vector<8x384xf32>
    %186 = arith.truncf %150 : vector<8x128xf32> to vector<8x128xbf16>
    %cst_50 = arith.constant dense<0.000000e+00> : vector<8x384xf32>
    %187 = tpu.matmul %186, %18, %cst_50 {dimension_numbers = #tpu.dot_dimension_numbers<[1], [0], [0], [1], [0, 0, 1, 1], [], []>} : vector<8x128xbf16>, vector<128x384xbf16>, vector<8x384xf32> -> vector<8x384xf32>
    %188 = vector.extract_strided_slice %185 {offsets = [0, 0], sizes = [8, 128], strides = [1, 1]} : vector<8x384xf32> to vector<8x128xf32>
    %189 = vector.extract_strided_slice %187 {offsets = [0, 0], sizes = [8, 128], strides = [1, 1]} : vector<8x384xf32> to vector<8x128xf32>
    %190 = arith.addf %188, %189 : vector<8x128xf32>
    %191 = arith.negf %190 : vector<8x128xf32>
    %192 = math.exp %191 : vector<8x128xf32>
    %cst_51 = arith.constant 1.000000e+00 : f32
    %193 = vector.broadcast %cst_51 : f32 to vector<8x128xf32>
    %194 = arith.addf %193, %192 : vector<8x128xf32>
    %195 = arith.divf %193, %194 : vector<8x128xf32>
    %196 = vector.extract_strided_slice %185 {offsets = [0, 128], sizes = [8, 128], strides = [1, 1]} : vector<8x384xf32> to vector<8x128xf32>
    %197 = vector.extract_strided_slice %187 {offsets = [0, 128], sizes = [8, 128], strides = [1, 1]} : vector<8x384xf32> to vector<8x128xf32>
    %198 = arith.addf %196, %197 : vector<8x128xf32>
    %199 = arith.negf %198 : vector<8x128xf32>
    %200 = math.exp %199 : vector<8x128xf32>
    %cst_52 = arith.constant 1.000000e+00 : f32
    %201 = vector.broadcast %cst_52 : f32 to vector<8x128xf32>
    %202 = arith.addf %201, %200 : vector<8x128xf32>
    %203 = arith.divf %201, %202 : vector<8x128xf32>
    %204 = vector.extract_strided_slice %185 {offsets = [0, 256], sizes = [8, 128], strides = [1, 1]} : vector<8x384xf32> to vector<8x128xf32>
    %205 = vector.extract_strided_slice %187 {offsets = [0, 256], sizes = [8, 128], strides = [1, 1]} : vector<8x384xf32> to vector<8x128xf32>
    %206 = arith.addf %205, %24 : vector<8x128xf32>
    %207 = arith.mulf %195, %206 : vector<8x128xf32>
    %208 = arith.addf %204, %207 : vector<8x128xf32>
    %209 = math.tanh %208 : vector<8x128xf32>
    %cst_53 = arith.constant 1.000000e+00 : f32
    %210 = vector.broadcast %cst_53 : f32 to vector<8x128xf32>
    %211 = arith.subf %210, %203 : vector<8x128xf32>
    %212 = arith.mulf %211, %209 : vector<8x128xf32>
    %213 = arith.mulf %203, %150 : vector<8x128xf32>
    %214 = arith.addf %212, %213 : vector<8x128xf32>
    %215 = arith.truncf %184 : vector<8x128xf32> to vector<8x128xbf16>
    %c16 = arith.constant 16 : index
    %c0_54 = arith.constant 0 : index
    %216 = vector.load %arg11[%c16, %c0_54] : memref<64x128xbf16, #tpu.memory_space<vmem>>, vector<8x128xbf16>
    tpu.vector_store %arg11[%c16, %c0_54], %215 {strides = array<i32>} : memref<64x128xbf16, #tpu.memory_space<vmem>>, vector<8x128xbf16>,
    %217 = arith.truncf %214 : vector<8x128xf32> to vector<8x128xbf16>
    %c40 = arith.constant 40 : index
    %c0_55 = arith.constant 0 : index
    %218 = vector.load %arg12[%c40, %c0_55] : memref<64x128xbf16, #tpu.memory_space<vmem>>, vector<8x128xbf16>
    tpu.vector_store %arg12[%c40, %c0_55], %217 {strides = array<i32>} : memref<64x128xbf16, #tpu.memory_space<vmem>>, vector<8x128xbf16>,
    %219 = vector.extract_strided_slice %9 {offsets = [24, 0], sizes = [8, 384], strides = [1, 1]} : vector<64x384xf32> to vector<8x384xf32>
    %220 = arith.truncf %184 : vector<8x128xf32> to vector<8x128xbf16>
    %cst_56 = arith.constant dense<0.000000e+00> : vector<8x384xf32>
    %221 = tpu.matmul %220, %17, %cst_56 {dimension_numbers = #tpu.dot_dimension_numbers<[1], [0], [0], [1], [0, 0, 1, 1], [], []>} : vector<8x128xbf16>, vector<128x384xbf16>, vector<8x384xf32> -> vector<8x384xf32>
    %222 = vector.extract_strided_slice %219 {offsets = [0, 0], sizes = [8, 128], strides = [1, 1]} : vector<8x384xf32> to vector<8x128xf32>
    %223 = vector.extract_strided_slice %221 {offsets = [0, 0], sizes = [8, 128], strides = [1, 1]} : vector<8x384xf32> to vector<8x128xf32>
    %224 = arith.addf %222, %223 : vector<8x128xf32>
    %225 = arith.negf %224 : vector<8x128xf32>
    %226 = math.exp %225 : vector<8x128xf32>
    %cst_57 = arith.constant 1.000000e+00 : f32
    %227 = vector.broadcast %cst_57 : f32 to vector<8x128xf32>
    %228 = arith.addf %227, %226 : vector<8x128xf32>
    %229 = arith.divf %227, %228 : vector<8x128xf32>
    %230 = vector.extract_strided_slice %219 {offsets = [0, 128], sizes = [8, 128], strides = [1, 1]} : vector<8x384xf32> to vector<8x128xf32>
    %231 = vector.extract_strided_slice %221 {offsets = [0, 128], sizes = [8, 128], strides = [1, 1]} : vector<8x384xf32> to vector<8x128xf32>
    %232 = arith.addf %230, %231 : vector<8x128xf32>
    %233 = arith.negf %232 : vector<8x128xf32>
    %234 = math.exp %233 : vector<8x128xf32>
    %cst_58 = arith.constant 1.000000e+00 : f32
    %235 = vector.broadcast %cst_58 : f32 to vector<8x128xf32>
    %236 = arith.addf %235, %234 : vector<8x128xf32>
    %237 = arith.divf %235, %236 : vector<8x128xf32>
    %238 = vector.extract_strided_slice %219 {offsets = [0, 256], sizes = [8, 128], strides = [1, 1]} : vector<8x384xf32> to vector<8x128xf32>
    %239 = vector.extract_strided_slice %221 {offsets = [0, 256], sizes = [8, 128], strides = [1, 1]} : vector<8x384xf32> to vector<8x128xf32>
    %240 = arith.addf %239, %21 : vector<8x128xf32>
    %241 = arith.mulf %229, %240 : vector<8x128xf32>
    %242 = arith.addf %238, %241 : vector<8x128xf32>
    %243 = math.tanh %242 : vector<8x128xf32>
    %cst_59 = arith.constant 1.000000e+00 : f32
    %244 = vector.broadcast %cst_59 : f32 to vector<8x128xf32>
    %245 = arith.subf %244, %237 : vector<8x128xf32>
    %246 = arith.mulf %245, %243 : vector<8x128xf32>
    %247 = arith.mulf %237, %184 : vector<8x128xf32>
    %248 = arith.addf %246, %247 : vector<8x128xf32>
    %249 = vector.extract_strided_slice %16 {offsets = [32, 0], sizes = [8, 384], strides = [1, 1]} : vector<64x384xf32> to vector<8x384xf32>
    %250 = arith.truncf %214 : vector<8x128xf32> to vector<8x128xbf16>
    %cst_60 = arith.constant dense<0.000000e+00> : vector<8x384xf32>
    %251 = tpu.matmul %250, %18, %cst_60 {dimension_numbers = #tpu.dot_dimension_numbers<[1], [0], [0], [1], [0, 0, 1, 1], [], []>} : vector<8x128xbf16>, vector<128x384xbf16>, vector<8x384xf32> -> vector<8x384xf32>
    %252 = vector.extract_strided_slice %249 {offsets = [0, 0], sizes = [8, 128], strides = [1, 1]} : vector<8x384xf32> to vector<8x128xf32>
    %253 = vector.extract_strided_slice %251 {offsets = [0, 0], sizes = [8, 128], strides = [1, 1]} : vector<8x384xf32> to vector<8x128xf32>
    %254 = arith.addf %252, %253 : vector<8x128xf32>
    %255 = arith.negf %254 : vector<8x128xf32>
    %256 = math.exp %255 : vector<8x128xf32>
    %cst_61 = arith.constant 1.000000e+00 : f32
    %257 = vector.broadcast %cst_61 : f32 to vector<8x128xf32>
    %258 = arith.addf %257, %256 : vector<8x128xf32>
    %259 = arith.divf %257, %258 : vector<8x128xf32>
    %260 = vector.extract_strided_slice %249 {offsets = [0, 128], sizes = [8, 128], strides = [1, 1]} : vector<8x384xf32> to vector<8x128xf32>
    %261 = vector.extract_strided_slice %251 {offsets = [0, 128], sizes = [8, 128], strides = [1, 1]} : vector<8x384xf32> to vector<8x128xf32>
    %262 = arith.addf %260, %261 : vector<8x128xf32>
    %263 = arith.negf %262 : vector<8x128xf32>
    %264 = math.exp %263 : vector<8x128xf32>
    %cst_62 = arith.constant 1.000000e+00 : f32
    %265 = vector.broadcast %cst_62 : f32 to vector<8x128xf32>
    %266 = arith.addf %265, %264 : vector<8x128xf32>
    %267 = arith.divf %265, %266 : vector<8x128xf32>
    %268 = vector.extract_strided_slice %249 {offsets = [0, 256], sizes = [8, 128], strides = [1, 1]} : vector<8x384xf32> to vector<8x128xf32>
    %269 = vector.extract_strided_slice %251 {offsets = [0, 256], sizes = [8, 128], strides = [1, 1]} : vector<8x384xf32> to vector<8x128xf32>
    %270 = arith.addf %269, %24 : vector<8x128xf32>
    %271 = arith.mulf %259, %270 : vector<8x128xf32>
    %272 = arith.addf %268, %271 : vector<8x128xf32>
    %273 = math.tanh %272 : vector<8x128xf32>
    %cst_63 = arith.constant 1.000000e+00 : f32
    %274 = vector.broadcast %cst_63 : f32 to vector<8x128xf32>
    %275 = arith.subf %274, %267 : vector<8x128xf32>
    %276 = arith.mulf %275, %273 : vector<8x128xf32>
    %277 = arith.mulf %267, %214 : vector<8x128xf32>
    %278 = arith.addf %276, %277 : vector<8x128xf32>
    %279 = arith.truncf %248 : vector<8x128xf32> to vector<8x128xbf16>
    %c24 = arith.constant 24 : index
    %c0_64 = arith.constant 0 : index
    %280 = vector.load %arg11[%c24, %c0_64] : memref<64x128xbf16, #tpu.memory_space<vmem>>, vector<8x128xbf16>
    tpu.vector_store %arg11[%c24, %c0_64], %279 {strides = array<i32>} : memref<64x128xbf16, #tpu.memory_space<vmem>>, vector<8x128xbf16>,
    %281 = arith.truncf %278 : vector<8x128xf32> to vector<8x128xbf16>
    %c32 = arith.constant 32 : index
    %c0_65 = arith.constant 0 : index
    %282 = vector.load %arg12[%c32, %c0_65] : memref<64x128xbf16, #tpu.memory_space<vmem>>, vector<8x128xbf16>
    tpu.vector_store %arg12[%c32, %c0_65], %281 {strides = array<i32>} : memref<64x128xbf16, #tpu.memory_space<vmem>>, vector<8x128xbf16>,
    %283 = vector.extract_strided_slice %9 {offsets = [32, 0], sizes = [8, 384], strides = [1, 1]} : vector<64x384xf32> to vector<8x384xf32>
    %284 = arith.truncf %248 : vector<8x128xf32> to vector<8x128xbf16>
    %cst_66 = arith.constant dense<0.000000e+00> : vector<8x384xf32>
    %285 = tpu.matmul %284, %17, %cst_66 {dimension_numbers = #tpu.dot_dimension_numbers<[1], [0], [0], [1], [0, 0, 1, 1], [], []>} : vector<8x128xbf16>, vector<128x384xbf16>, vector<8x384xf32> -> vector<8x384xf32>
    %286 = vector.extract_strided_slice %283 {offsets = [0, 0], sizes = [8, 128], strides = [1, 1]} : vector<8x384xf32> to vector<8x128xf32>
    %287 = vector.extract_strided_slice %285 {offsets = [0, 0], sizes = [8, 128], strides = [1, 1]} : vector<8x384xf32> to vector<8x128xf32>
    %288 = arith.addf %286, %287 : vector<8x128xf32>
    %289 = arith.negf %288 : vector<8x128xf32>
    %290 = math.exp %289 : vector<8x128xf32>
    %cst_67 = arith.constant 1.000000e+00 : f32
    %291 = vector.broadcast %cst_67 : f32 to vector<8x128xf32>
    %292 = arith.addf %291, %290 : vector<8x128xf32>
    %293 = arith.divf %291, %292 : vector<8x128xf32>
    %294 = vector.extract_strided_slice %283 {offsets = [0, 128], sizes = [8, 128], strides = [1, 1]} : vector<8x384xf32> to vector<8x128xf32>
    %295 = vector.extract_strided_slice %285 {offsets = [0, 128], sizes = [8, 128], strides = [1, 1]} : vector<8x384xf32> to vector<8x128xf32>
    %296 = arith.addf %294, %295 : vector<8x128xf32>
    %297 = arith.negf %296 : vector<8x128xf32>
    %298 = math.exp %297 : vector<8x128xf32>
    %cst_68 = arith.constant 1.000000e+00 : f32
    %299 = vector.broadcast %cst_68 : f32 to vector<8x128xf32>
    %300 = arith.addf %299, %298 : vector<8x128xf32>
    %301 = arith.divf %299, %300 : vector<8x128xf32>
    %302 = vector.extract_strided_slice %283 {offsets = [0, 256], sizes = [8, 128], strides = [1, 1]} : vector<8x384xf32> to vector<8x128xf32>
    %303 = vector.extract_strided_slice %285 {offsets = [0, 256], sizes = [8, 128], strides = [1, 1]} : vector<8x384xf32> to vector<8x128xf32>
    %304 = arith.addf %303, %21 : vector<8x128xf32>
    %305 = arith.mulf %293, %304 : vector<8x128xf32>
    %306 = arith.addf %302, %305 : vector<8x128xf32>
    %307 = math.tanh %306 : vector<8x128xf32>
    %cst_69 = arith.constant 1.000000e+00 : f32
    %308 = vector.broadcast %cst_69 : f32 to vector<8x128xf32>
    %309 = arith.subf %308, %301 : vector<8x128xf32>
    %310 = arith.mulf %309, %307 : vector<8x128xf32>
    %311 = arith.mulf %301, %248 : vector<8x128xf32>
    %312 = arith.addf %310, %311 : vector<8x128xf32>
    %313 = vector.extract_strided_slice %16 {offsets = [24, 0], sizes = [8, 384], strides = [1, 1]} : vector<64x384xf32> to vector<8x384xf32>
    %314 = arith.truncf %278 : vector<8x128xf32> to vector<8x128xbf16>
    %cst_70 = arith.constant dense<0.000000e+00> : vector<8x384xf32>
    %315 = tpu.matmul %314, %18, %cst_70 {dimension_numbers = #tpu.dot_dimension_numbers<[1], [0], [0], [1], [0, 0, 1, 1], [], []>} : vector<8x128xbf16>, vector<128x384xbf16>, vector<8x384xf32> -> vector<8x384xf32>
    %316 = vector.extract_strided_slice %313 {offsets = [0, 0], sizes = [8, 128], strides = [1, 1]} : vector<8x384xf32> to vector<8x128xf32>
    %317 = vector.extract_strided_slice %315 {offsets = [0, 0], sizes = [8, 128], strides = [1, 1]} : vector<8x384xf32> to vector<8x128xf32>
    %318 = arith.addf %316, %317 : vector<8x128xf32>
    %319 = arith.negf %318 : vector<8x128xf32>
    %320 = math.exp %319 : vector<8x128xf32>
    %cst_71 = arith.constant 1.000000e+00 : f32
    %321 = vector.broadcast %cst_71 : f32 to vector<8x128xf32>
    %322 = arith.addf %321, %320 : vector<8x128xf32>
    %323 = arith.divf %321, %322 : vector<8x128xf32>
    %324 = vector.extract_strided_slice %313 {offsets = [0, 128], sizes = [8, 128], strides = [1, 1]} : vector<8x384xf32> to vector<8x128xf32>
    %325 = vector.extract_strided_slice %315 {offsets = [0, 128], sizes = [8, 128], strides = [1, 1]} : vector<8x384xf32> to vector<8x128xf32>
    %326 = arith.addf %324, %325 : vector<8x128xf32>
    %327 = arith.negf %326 : vector<8x128xf32>
    %328 = math.exp %327 : vector<8x128xf32>
    %cst_72 = arith.constant 1.000000e+00 : f32
    %329 = vector.broadcast %cst_72 : f32 to vector<8x128xf32>
    %330 = arith.addf %329, %328 : vector<8x128xf32>
    %331 = arith.divf %329, %330 : vector<8x128xf32>
    %332 = vector.extract_strided_slice %313 {offsets = [0, 256], sizes = [8, 128], strides = [1, 1]} : vector<8x384xf32> to vector<8x128xf32>
    %333 = vector.extract_strided_slice %315 {offsets = [0, 256], sizes = [8, 128], strides = [1, 1]} : vector<8x384xf32> to vector<8x128xf32>
    %334 = arith.addf %333, %24 : vector<8x128xf32>
    %335 = arith.mulf %323, %334 : vector<8x128xf32>
    %336 = arith.addf %332, %335 : vector<8x128xf32>
    %337 = math.tanh %336 : vector<8x128xf32>
    %cst_73 = arith.constant 1.000000e+00 : f32
    %338 = vector.broadcast %cst_73 : f32 to vector<8x128xf32>
    %339 = arith.subf %338, %331 : vector<8x128xf32>
    %340 = arith.mulf %339, %337 : vector<8x128xf32>
    %341 = arith.mulf %331, %278 : vector<8x128xf32>
    %342 = arith.addf %340, %341 : vector<8x128xf32>
    %343 = arith.truncf %312 : vector<8x128xf32> to vector<8x128xbf16>
    %c32_74 = arith.constant 32 : index
    %c0_75 = arith.constant 0 : index
    %344 = vector.load %arg11[%c32_74, %c0_75] : memref<64x128xbf16, #tpu.memory_space<vmem>>, vector<8x128xbf16>
    tpu.vector_store %arg11[%c32_74, %c0_75], %343 {strides = array<i32>} : memref<64x128xbf16, #tpu.memory_space<vmem>>, vector<8x128xbf16>,
    %345 = arith.truncf %342 : vector<8x128xf32> to vector<8x128xbf16>
    %c24_76 = arith.constant 24 : index
    %c0_77 = arith.constant 0 : index
    %346 = vector.load %arg12[%c24_76, %c0_77] : memref<64x128xbf16, #tpu.memory_space<vmem>>, vector<8x128xbf16>
    tpu.vector_store %arg12[%c24_76, %c0_77], %345 {strides = array<i32>} : memref<64x128xbf16, #tpu.memory_space<vmem>>, vector<8x128xbf16>,
    %347 = vector.extract_strided_slice %9 {offsets = [40, 0], sizes = [8, 384], strides = [1, 1]} : vector<64x384xf32> to vector<8x384xf32>
    %348 = arith.truncf %312 : vector<8x128xf32> to vector<8x128xbf16>
    %cst_78 = arith.constant dense<0.000000e+00> : vector<8x384xf32>
    %349 = tpu.matmul %348, %17, %cst_78 {dimension_numbers = #tpu.dot_dimension_numbers<[1], [0], [0], [1], [0, 0, 1, 1], [], []>} : vector<8x128xbf16>, vector<128x384xbf16>, vector<8x384xf32> -> vector<8x384xf32>
    %350 = vector.extract_strided_slice %347 {offsets = [0, 0], sizes = [8, 128], strides = [1, 1]} : vector<8x384xf32> to vector<8x128xf32>
    %351 = vector.extract_strided_slice %349 {offsets = [0, 0], sizes = [8, 128], strides = [1, 1]} : vector<8x384xf32> to vector<8x128xf32>
    %352 = arith.addf %350, %351 : vector<8x128xf32>
    %353 = arith.negf %352 : vector<8x128xf32>
    %354 = math.exp %353 : vector<8x128xf32>
    %cst_79 = arith.constant 1.000000e+00 : f32
    %355 = vector.broadcast %cst_79 : f32 to vector<8x128xf32>
    %356 = arith.addf %355, %354 : vector<8x128xf32>
    %357 = arith.divf %355, %356 : vector<8x128xf32>
    %358 = vector.extract_strided_slice %347 {offsets = [0, 128], sizes = [8, 128], strides = [1, 1]} : vector<8x384xf32> to vector<8x128xf32>
    %359 = vector.extract_strided_slice %349 {offsets = [0, 128], sizes = [8, 128], strides = [1, 1]} : vector<8x384xf32> to vector<8x128xf32>
    %360 = arith.addf %358, %359 : vector<8x128xf32>
    %361 = arith.negf %360 : vector<8x128xf32>
    %362 = math.exp %361 : vector<8x128xf32>
    %cst_80 = arith.constant 1.000000e+00 : f32
    %363 = vector.broadcast %cst_80 : f32 to vector<8x128xf32>
    %364 = arith.addf %363, %362 : vector<8x128xf32>
    %365 = arith.divf %363, %364 : vector<8x128xf32>
    %366 = vector.extract_strided_slice %347 {offsets = [0, 256], sizes = [8, 128], strides = [1, 1]} : vector<8x384xf32> to vector<8x128xf32>
    %367 = vector.extract_strided_slice %349 {offsets = [0, 256], sizes = [8, 128], strides = [1, 1]} : vector<8x384xf32> to vector<8x128xf32>
    %368 = arith.addf %367, %21 : vector<8x128xf32>
    %369 = arith.mulf %357, %368 : vector<8x128xf32>
    %370 = arith.addf %366, %369 : vector<8x128xf32>
    %371 = math.tanh %370 : vector<8x128xf32>
    %cst_81 = arith.constant 1.000000e+00 : f32
    %372 = vector.broadcast %cst_81 : f32 to vector<8x128xf32>
    %373 = arith.subf %372, %365 : vector<8x128xf32>
    %374 = arith.mulf %373, %371 : vector<8x128xf32>
    %375 = arith.mulf %365, %312 : vector<8x128xf32>
    %376 = arith.addf %374, %375 : vector<8x128xf32>
    %377 = vector.extract_strided_slice %16 {offsets = [16, 0], sizes = [8, 384], strides = [1, 1]} : vector<64x384xf32> to vector<8x384xf32>
    %378 = arith.truncf %342 : vector<8x128xf32> to vector<8x128xbf16>
    %cst_82 = arith.constant dense<0.000000e+00> : vector<8x384xf32>
    %379 = tpu.matmul %378, %18, %cst_82 {dimension_numbers = #tpu.dot_dimension_numbers<[1], [0], [0], [1], [0, 0, 1, 1], [], []>} : vector<8x128xbf16>, vector<128x384xbf16>, vector<8x384xf32> -> vector<8x384xf32>
    %380 = vector.extract_strided_slice %377 {offsets = [0, 0], sizes = [8, 128], strides = [1, 1]} : vector<8x384xf32> to vector<8x128xf32>
    %381 = vector.extract_strided_slice %379 {offsets = [0, 0], sizes = [8, 128], strides = [1, 1]} : vector<8x384xf32> to vector<8x128xf32>
    %382 = arith.addf %380, %381 : vector<8x128xf32>
    %383 = arith.negf %382 : vector<8x128xf32>
    %384 = math.exp %383 : vector<8x128xf32>
    %cst_83 = arith.constant 1.000000e+00 : f32
    %385 = vector.broadcast %cst_83 : f32 to vector<8x128xf32>
    %386 = arith.addf %385, %384 : vector<8x128xf32>
    %387 = arith.divf %385, %386 : vector<8x128xf32>
    %388 = vector.extract_strided_slice %377 {offsets = [0, 128], sizes = [8, 128], strides = [1, 1]} : vector<8x384xf32> to vector<8x128xf32>
    %389 = vector.extract_strided_slice %379 {offsets = [0, 128], sizes = [8, 128], strides = [1, 1]} : vector<8x384xf32> to vector<8x128xf32>
    %390 = arith.addf %388, %389 : vector<8x128xf32>
    %391 = arith.negf %390 : vector<8x128xf32>
    %392 = math.exp %391 : vector<8x128xf32>
    %cst_84 = arith.constant 1.000000e+00 : f32
    %393 = vector.broadcast %cst_84 : f32 to vector<8x128xf32>
    %394 = arith.addf %393, %392 : vector<8x128xf32>
    %395 = arith.divf %393, %394 : vector<8x128xf32>
    %396 = vector.extract_strided_slice %377 {offsets = [0, 256], sizes = [8, 128], strides = [1, 1]} : vector<8x384xf32> to vector<8x128xf32>
    %397 = vector.extract_strided_slice %379 {offsets = [0, 256], sizes = [8, 128], strides = [1, 1]} : vector<8x384xf32> to vector<8x128xf32>
    %398 = arith.addf %397, %24 : vector<8x128xf32>
    %399 = arith.mulf %387, %398 : vector<8x128xf32>
    %400 = arith.addf %396, %399 : vector<8x128xf32>
    %401 = math.tanh %400 : vector<8x128xf32>
    %cst_85 = arith.constant 1.000000e+00 : f32
    %402 = vector.broadcast %cst_85 : f32 to vector<8x128xf32>
    %403 = arith.subf %402, %395 : vector<8x128xf32>
    %404 = arith.mulf %403, %401 : vector<8x128xf32>
    %405 = arith.mulf %395, %342 : vector<8x128xf32>
    %406 = arith.addf %404, %405 : vector<8x128xf32>
    %407 = arith.truncf %376 : vector<8x128xf32> to vector<8x128xbf16>
    %c40_86 = arith.constant 40 : index
    %c0_87 = arith.constant 0 : index
    %408 = vector.load %arg11[%c40_86, %c0_87] : memref<64x128xbf16, #tpu.memory_space<vmem>>, vector<8x128xbf16>
    tpu.vector_store %arg11[%c40_86, %c0_87], %407 {strides = array<i32>} : memref<64x128xbf16, #tpu.memory_space<vmem>>, vector<8x128xbf16>,
    %409 = arith.truncf %406 : vector<8x128xf32> to vector<8x128xbf16>
    %c16_88 = arith.constant 16 : index
    %c0_89 = arith.constant 0 : index
    %410 = vector.load %arg12[%c16_88, %c0_89] : memref<64x128xbf16, #tpu.memory_space<vmem>>, vector<8x128xbf16>
    tpu.vector_store %arg12[%c16_88, %c0_89], %409 {strides = array<i32>} : memref<64x128xbf16, #tpu.memory_space<vmem>>, vector<8x128xbf16>,
    %411 = vector.extract_strided_slice %9 {offsets = [48, 0], sizes = [8, 384], strides = [1, 1]} : vector<64x384xf32> to vector<8x384xf32>
    %412 = arith.truncf %376 : vector<8x128xf32> to vector<8x128xbf16>
    %cst_90 = arith.constant dense<0.000000e+00> : vector<8x384xf32>
    %413 = tpu.matmul %412, %17, %cst_90 {dimension_numbers = #tpu.dot_dimension_numbers<[1], [0], [0], [1], [0, 0, 1, 1], [], []>} : vector<8x128xbf16>, vector<128x384xbf16>, vector<8x384xf32> -> vector<8x384xf32>
    %414 = vector.extract_strided_slice %411 {offsets = [0, 0], sizes = [8, 128], strides = [1, 1]} : vector<8x384xf32> to vector<8x128xf32>
    %415 = vector.extract_strided_slice %413 {offsets = [0, 0], sizes = [8, 128], strides = [1, 1]} : vector<8x384xf32> to vector<8x128xf32>
    %416 = arith.addf %414, %415 : vector<8x128xf32>
    %417 = arith.negf %416 : vector<8x128xf32>
    %418 = math.exp %417 : vector<8x128xf32>
    %cst_91 = arith.constant 1.000000e+00 : f32
    %419 = vector.broadcast %cst_91 : f32 to vector<8x128xf32>
    %420 = arith.addf %419, %418 : vector<8x128xf32>
    %421 = arith.divf %419, %420 : vector<8x128xf32>
    %422 = vector.extract_strided_slice %411 {offsets = [0, 128], sizes = [8, 128], strides = [1, 1]} : vector<8x384xf32> to vector<8x128xf32>
    %423 = vector.extract_strided_slice %413 {offsets = [0, 128], sizes = [8, 128], strides = [1, 1]} : vector<8x384xf32> to vector<8x128xf32>
    %424 = arith.addf %422, %423 : vector<8x128xf32>
    %425 = arith.negf %424 : vector<8x128xf32>
    %426 = math.exp %425 : vector<8x128xf32>
    %cst_92 = arith.constant 1.000000e+00 : f32
    %427 = vector.broadcast %cst_92 : f32 to vector<8x128xf32>
    %428 = arith.addf %427, %426 : vector<8x128xf32>
    %429 = arith.divf %427, %428 : vector<8x128xf32>
    %430 = vector.extract_strided_slice %411 {offsets = [0, 256], sizes = [8, 128], strides = [1, 1]} : vector<8x384xf32> to vector<8x128xf32>
    %431 = vector.extract_strided_slice %413 {offsets = [0, 256], sizes = [8, 128], strides = [1, 1]} : vector<8x384xf32> to vector<8x128xf32>
    %432 = arith.addf %431, %21 : vector<8x128xf32>
    %433 = arith.mulf %421, %432 : vector<8x128xf32>
    %434 = arith.addf %430, %433 : vector<8x128xf32>
    %435 = math.tanh %434 : vector<8x128xf32>
    %cst_93 = arith.constant 1.000000e+00 : f32
    %436 = vector.broadcast %cst_93 : f32 to vector<8x128xf32>
    %437 = arith.subf %436, %429 : vector<8x128xf32>
    %438 = arith.mulf %437, %435 : vector<8x128xf32>
    %439 = arith.mulf %429, %376 : vector<8x128xf32>
    %440 = arith.addf %438, %439 : vector<8x128xf32>
    %441 = vector.extract_strided_slice %16 {offsets = [8, 0], sizes = [8, 384], strides = [1, 1]} : vector<64x384xf32> to vector<8x384xf32>
    %442 = arith.truncf %406 : vector<8x128xf32> to vector<8x128xbf16>
    %cst_94 = arith.constant dense<0.000000e+00> : vector<8x384xf32>
    %443 = tpu.matmul %442, %18, %cst_94 {dimension_numbers = #tpu.dot_dimension_numbers<[1], [0], [0], [1], [0, 0, 1, 1], [], []>} : vector<8x128xbf16>, vector<128x384xbf16>, vector<8x384xf32> -> vector<8x384xf32>
    %444 = vector.extract_strided_slice %441 {offsets = [0, 0], sizes = [8, 128], strides = [1, 1]} : vector<8x384xf32> to vector<8x128xf32>
    %445 = vector.extract_strided_slice %443 {offsets = [0, 0], sizes = [8, 128], strides = [1, 1]} : vector<8x384xf32> to vector<8x128xf32>
    %446 = arith.addf %444, %445 : vector<8x128xf32>
    %447 = arith.negf %446 : vector<8x128xf32>
    %448 = math.exp %447 : vector<8x128xf32>
    %cst_95 = arith.constant 1.000000e+00 : f32
    %449 = vector.broadcast %cst_95 : f32 to vector<8x128xf32>
    %450 = arith.addf %449, %448 : vector<8x128xf32>
    %451 = arith.divf %449, %450 : vector<8x128xf32>
    %452 = vector.extract_strided_slice %441 {offsets = [0, 128], sizes = [8, 128], strides = [1, 1]} : vector<8x384xf32> to vector<8x128xf32>
    %453 = vector.extract_strided_slice %443 {offsets = [0, 128], sizes = [8, 128], strides = [1, 1]} : vector<8x384xf32> to vector<8x128xf32>
    %454 = arith.addf %452, %453 : vector<8x128xf32>
    %455 = arith.negf %454 : vector<8x128xf32>
    %456 = math.exp %455 : vector<8x128xf32>
    %cst_96 = arith.constant 1.000000e+00 : f32
    %457 = vector.broadcast %cst_96 : f32 to vector<8x128xf32>
    %458 = arith.addf %457, %456 : vector<8x128xf32>
    %459 = arith.divf %457, %458 : vector<8x128xf32>
    %460 = vector.extract_strided_slice %441 {offsets = [0, 256], sizes = [8, 128], strides = [1, 1]} : vector<8x384xf32> to vector<8x128xf32>
    %461 = vector.extract_strided_slice %443 {offsets = [0, 256], sizes = [8, 128], strides = [1, 1]} : vector<8x384xf32> to vector<8x128xf32>
    %462 = arith.addf %461, %24 : vector<8x128xf32>
    %463 = arith.mulf %451, %462 : vector<8x128xf32>
    %464 = arith.addf %460, %463 : vector<8x128xf32>
    %465 = math.tanh %464 : vector<8x128xf32>
    %cst_97 = arith.constant 1.000000e+00 : f32
    %466 = vector.broadcast %cst_97 : f32 to vector<8x128xf32>
    %467 = arith.subf %466, %459 : vector<8x128xf32>
    %468 = arith.mulf %467, %465 : vector<8x128xf32>
    %469 = arith.mulf %459, %406 : vector<8x128xf32>
    %470 = arith.addf %468, %469 : vector<8x128xf32>
    %471 = arith.truncf %440 : vector<8x128xf32> to vector<8x128xbf16>
    %c48_98 = arith.constant 48 : index
    %c0_99 = arith.constant 0 : index
    %472 = vector.load %arg11[%c48_98, %c0_99] : memref<64x128xbf16, #tpu.memory_space<vmem>>, vector<8x128xbf16>
    tpu.vector_store %arg11[%c48_98, %c0_99], %471 {strides = array<i32>} : memref<64x128xbf16, #tpu.memory_space<vmem>>, vector<8x128xbf16>,
    %473 = arith.truncf %470 : vector<8x128xf32> to vector<8x128xbf16>
    %c8_100 = arith.constant 8 : index
    %c0_101 = arith.constant 0 : index
    %474 = vector.load %arg12[%c8_100, %c0_101] : memref<64x128xbf16, #tpu.memory_space<vmem>>, vector<8x128xbf16>
    tpu.vector_store %arg12[%c8_100, %c0_101], %473 {strides = array<i32>} : memref<64x128xbf16, #tpu.memory_space<vmem>>, vector<8x128xbf16>,
    %475 = vector.extract_strided_slice %9 {offsets = [56, 0], sizes = [8, 384], strides = [1, 1]} : vector<64x384xf32> to vector<8x384xf32>
    %476 = arith.truncf %440 : vector<8x128xf32> to vector<8x128xbf16>
    %cst_102 = arith.constant dense<0.000000e+00> : vector<8x384xf32>
    %477 = tpu.matmul %476, %17, %cst_102 {dimension_numbers = #tpu.dot_dimension_numbers<[1], [0], [0], [1], [0, 0, 1, 1], [], []>} : vector<8x128xbf16>, vector<128x384xbf16>, vector<8x384xf32> -> vector<8x384xf32>
    %478 = vector.extract_strided_slice %475 {offsets = [0, 0], sizes = [8, 128], strides = [1, 1]} : vector<8x384xf32> to vector<8x128xf32>
    %479 = vector.extract_strided_slice %477 {offsets = [0, 0], sizes = [8, 128], strides = [1, 1]} : vector<8x384xf32> to vector<8x128xf32>
    %480 = arith.addf %478, %479 : vector<8x128xf32>
    %481 = arith.negf %480 : vector<8x128xf32>
    %482 = math.exp %481 : vector<8x128xf32>
    %cst_103 = arith.constant 1.000000e+00 : f32
    %483 = vector.broadcast %cst_103 : f32 to vector<8x128xf32>
    %484 = arith.addf %483, %482 : vector<8x128xf32>
    %485 = arith.divf %483, %484 : vector<8x128xf32>
    %486 = vector.extract_strided_slice %475 {offsets = [0, 128], sizes = [8, 128], strides = [1, 1]} : vector<8x384xf32> to vector<8x128xf32>
    %487 = vector.extract_strided_slice %477 {offsets = [0, 128], sizes = [8, 128], strides = [1, 1]} : vector<8x384xf32> to vector<8x128xf32>
    %488 = arith.addf %486, %487 : vector<8x128xf32>
    %489 = arith.negf %488 : vector<8x128xf32>
    %490 = math.exp %489 : vector<8x128xf32>
    %cst_104 = arith.constant 1.000000e+00 : f32
    %491 = vector.broadcast %cst_104 : f32 to vector<8x128xf32>
    %492 = arith.addf %491, %490 : vector<8x128xf32>
    %493 = arith.divf %491, %492 : vector<8x128xf32>
    %494 = vector.extract_strided_slice %475 {offsets = [0, 256], sizes = [8, 128], strides = [1, 1]} : vector<8x384xf32> to vector<8x128xf32>
    %495 = vector.extract_strided_slice %477 {offsets = [0, 256], sizes = [8, 128], strides = [1, 1]} : vector<8x384xf32> to vector<8x128xf32>
    %496 = arith.addf %495, %21 : vector<8x128xf32>
    %497 = arith.mulf %485, %496 : vector<8x128xf32>
    %498 = arith.addf %494, %497 : vector<8x128xf32>
    %499 = math.tanh %498 : vector<8x128xf32>
    %cst_105 = arith.constant 1.000000e+00 : f32
    %500 = vector.broadcast %cst_105 : f32 to vector<8x128xf32>
    %501 = arith.subf %500, %493 : vector<8x128xf32>
    %502 = arith.mulf %501, %499 : vector<8x128xf32>
    %503 = arith.mulf %493, %440 : vector<8x128xf32>
    %504 = arith.addf %502, %503 : vector<8x128xf32>
    %505 = vector.extract_strided_slice %16 {offsets = [0, 0], sizes = [8, 384], strides = [1, 1]} : vector<64x384xf32> to vector<8x384xf32>
    %506 = arith.truncf %470 : vector<8x128xf32> to vector<8x128xbf16>
    %cst_106 = arith.constant dense<0.000000e+00> : vector<8x384xf32>
    %507 = tpu.matmul %506, %18, %cst_106 {dimension_numbers = #tpu.dot_dimension_numbers<[1], [0], [0], [1], [0, 0, 1, 1], [], []>} : vector<8x128xbf16>, vector<128x384xbf16>, vector<8x384xf32> -> vector<8x384xf32>
    %508 = vector.extract_strided_slice %505 {offsets = [0, 0], sizes = [8, 128], strides = [1, 1]} : vector<8x384xf32> to vector<8x128xf32>
    %509 = vector.extract_strided_slice %507 {offsets = [0, 0], sizes = [8, 128], strides = [1, 1]} : vector<8x384xf32> to vector<8x128xf32>
    %510 = arith.addf %508, %509 : vector<8x128xf32>
    %511 = arith.negf %510 : vector<8x128xf32>
    %512 = math.exp %511 : vector<8x128xf32>
    %cst_107 = arith.constant 1.000000e+00 : f32
    %513 = vector.broadcast %cst_107 : f32 to vector<8x128xf32>
    %514 = arith.addf %513, %512 : vector<8x128xf32>
    %515 = arith.divf %513, %514 : vector<8x128xf32>
    %516 = vector.extract_strided_slice %505 {offsets = [0, 128], sizes = [8, 128], strides = [1, 1]} : vector<8x384xf32> to vector<8x128xf32>
    %517 = vector.extract_strided_slice %507 {offsets = [0, 128], sizes = [8, 128], strides = [1, 1]} : vector<8x384xf32> to vector<8x128xf32>
    %518 = arith.addf %516, %517 : vector<8x128xf32>
    %519 = arith.negf %518 : vector<8x128xf32>
    %520 = math.exp %519 : vector<8x128xf32>
    %cst_108 = arith.constant 1.000000e+00 : f32
    %521 = vector.broadcast %cst_108 : f32 to vector<8x128xf32>
    %522 = arith.addf %521, %520 : vector<8x128xf32>
    %523 = arith.divf %521, %522 : vector<8x128xf32>
    %524 = vector.extract_strided_slice %505 {offsets = [0, 256], sizes = [8, 128], strides = [1, 1]} : vector<8x384xf32> to vector<8x128xf32>
    %525 = vector.extract_strided_slice %507 {offsets = [0, 256], sizes = [8, 128], strides = [1, 1]} : vector<8x384xf32> to vector<8x128xf32>
    %526 = arith.addf %525, %24 : vector<8x128xf32>
    %527 = arith.mulf %515, %526 : vector<8x128xf32>
    %528 = arith.addf %524, %527 : vector<8x128xf32>
    %529 = math.tanh %528 : vector<8x128xf32>
    %cst_109 = arith.constant 1.000000e+00 : f32
    %530 = vector.broadcast %cst_109 : f32 to vector<8x128xf32>
    %531 = arith.subf %530, %523 : vector<8x128xf32>
    %532 = arith.mulf %531, %529 : vector<8x128xf32>
    %533 = arith.mulf %523, %470 : vector<8x128xf32>
    %534 = arith.addf %532, %533 : vector<8x128xf32>
    %535 = arith.truncf %504 : vector<8x128xf32> to vector<8x128xbf16>
    %c56_110 = arith.constant 56 : index
    %c0_111 = arith.constant 0 : index
    %536 = vector.load %arg11[%c56_110, %c0_111] : memref<64x128xbf16, #tpu.memory_space<vmem>>, vector<8x128xbf16>
    tpu.vector_store %arg11[%c56_110, %c0_111], %535 {strides = array<i32>} : memref<64x128xbf16, #tpu.memory_space<vmem>>, vector<8x128xbf16>,
    %537 = arith.truncf %534 : vector<8x128xf32> to vector<8x128xbf16>
    %c0_112 = arith.constant 0 : index
    %c0_113 = arith.constant 0 : index
    %538 = vector.load %arg12[%c0_112, %c0_113] : memref<64x128xbf16, #tpu.memory_space<vmem>>, vector<8x128xbf16>
    tpu.vector_store %arg12[%c0_112, %c0_113], %537 {strides = array<i32>} : memref<64x128xbf16, #tpu.memory_space<vmem>>, vector<8x128xbf16>,
    %c0_114 = arith.constant 0 : index
    %c0_115 = arith.constant 0 : index
    %539 = vector.load %arg13[%c0_114, %c0_115] : memref<8x128xf32, #tpu.memory_space<vmem>>, vector<8x128xf32>
    tpu.vector_store %arg13[%c0_114, %c0_115], %504 {strides = array<i32>} : memref<8x128xf32, #tpu.memory_space<vmem>>, vector<8x128xf32>,
    %c0_116 = arith.constant 0 : index
    %c0_117 = arith.constant 0 : index
    %540 = vector.load %arg14[%c0_116, %c0_117] : memref<8x128xf32, #tpu.memory_space<vmem>>, vector<8x128xf32>
    tpu.vector_store %arg14[%c0_116, %c0_117], %534 {strides = array<i32>} : memref<8x128xf32, #tpu.memory_space<vmem>>, vector<8x128xf32>,
    return
  }
  func.func @transform_0(%arg0: i32) -> (i32, i32) {
    %c0_i32 = arith.constant 0 : i32
    %c0_i32_0 = arith.constant 0 : i32
    return %arg0, %c0_i32 : i32, i32
  }
  func.func @transform_1(%arg0: i32) -> (i32, i32) {
    %c0_i32 = arith.constant 0 : i32
    %0 = arith.subi %c0_i32, %arg0 : i32
    %c0_i32_0 = arith.constant 0 : i32
    %c0_i32_1 = arith.constant 0 : i32
    return %0, %c0_i32_0 : i32, i32
  }
  func.func @transform_2(%arg0: i32) -> (i32, i32) {
    %c0_i32 = arith.constant 0 : i32
    %c0_i32_0 = arith.constant 0 : i32
    %c0_i32_1 = arith.constant 0 : i32
    return %c0_i32, %c0_i32_0 : i32, i32
  }
  func.func @transform_3(%arg0: i32) -> (i32, i32) {
    %c0_i32 = arith.constant 0 : i32
    %c0_i32_0 = arith.constant 0 : i32
    %c0_i32_1 = arith.constant 0 : i32
    return %c0_i32, %c0_i32_0 : i32, i32
  }
  func.func @transform_4(%arg0: i32) -> (i32, i32) {
    %c0_i32 = arith.constant 0 : i32
    %c0_i32_0 = arith.constant 0 : i32
    %c0_i32_1 = arith.constant 0 : i32
    return %c0_i32, %c0_i32_0 : i32, i32
  }
  func.func @transform_5(%arg0: i32) -> (i32, i32) {
    %c0_i32 = arith.constant 0 : i32
    %c0_i32_0 = arith.constant 0 : i32
    %c0_i32_1 = arith.constant 0 : i32
    return %c0_i32, %c0_i32_0 : i32, i32
  }
  func.func @transform_6(%arg0: i32) -> (i32, i32) {
    %c0_i32 = arith.constant 0 : i32
    %c0_i32_0 = arith.constant 0 : i32
    %c0_i32_1 = arith.constant 0 : i32
    return %c0_i32, %c0_i32_0 : i32, i32
  }
  func.func @transform_7(%arg0: i32) -> (i32, i32) {
    %c0_i32 = arith.constant 0 : i32
    %c0_i32_0 = arith.constant 0 : i32
    %c0_i32_1 = arith.constant 0 : i32
    return %c0_i32, %c0_i32_0 : i32, i32
  }
  func.func @transform_8(%arg0: i32) -> (i32, i32) {
    %c0_i32 = arith.constant 0 : i32
    %c0_i32_0 = arith.constant 0 : i32
    %c0_i32_1 = arith.constant 0 : i32
    return %c0_i32, %c0_i32_0 : i32, i32
  }
  func.func @transform_9(%arg0: i32) -> (i32, i32) {
    %c0_i32 = arith.constant 0 : i32
    %c0_i32_0 = arith.constant 0 : i32
    %c0_i32_1 = arith.constant 0 : i32
    return %c0_i32, %c0_i32_0 : i32, i32
  }
  func.func @transform_10(%arg0: i32) -> (i32, i32) {
    %c0_i32 = arith.constant 0 : i32
    %c0_i32_0 = arith.constant 0 : i32
    return %arg0, %c0_i32 : i32, i32
  }
  func.func @transform_11(%arg0: i32) -> (i32, i32) {
    %c0_i32 = arith.constant 0 : i32
    %0 = arith.subi %c0_i32, %arg0 : i32
    %c0_i32_0 = arith.constant 0 : i32
    %c0_i32_1 = arith.constant 0 : i32
    return %0, %c0_i32_0 : i32, i32
  }
}

</mosaic_0001>

<bundles_post_ra>
// kernel: tpu_custom_call.1
= control target key start
LH: loop header
LB: loop body
LE: loop exit
PB: predicated region body
PF: predicated region fallthrough
CT: control target
= control target key end

     0   :  { %17 = vsyncpa [#allocation5], 0  ;;  %s4791_s0 = inlined_call_operand.vmem [shape: f32[64,16], index: 0, kind: input, shape index: {}]   ;;  %s4792_s1 = inlined_call_operand.vmem [shape: f32[64,16], index: 1, kind: input, shape index: {}]   ;;  %s4793_s2 = inlined_call_operand.vmem [shape: bf16[16,384], index: 2, kind: input, shape index: {}]   ;;  %s4794_s3 = inlined_call_operand.vmem [shape: bf16[16,384], index: 3, kind: input, shape index: {}]   ;;  %s4795_s4 = inlined_call_operand.hbm [shape: bf16[128,384], index: 4, kind: input, shape index: {}]   ;;  %s4796_s5 = inlined_call_operand.hbm [shape: bf16[128,384], index: 5, kind: input, shape index: {}]   ;;  %s4797_s6 = inlined_call_operand.vmem [shape: f32[1,384], index: 6, kind: input, shape index: {}]   ;;  %s4798_s7 = inlined_call_operand.vmem [shape: f32[1,384], index: 7, kind: input, shape index: {}]   ;;  %s4799_s8 = inlined_call_operand.vmem [shape: f32[1,128], index: 8, kind: input, shape index: {}]   ;;  %s4800_s9 = inlined_call_operand.vmem [shape: f32[1,128], index: 9, kind: input, shape index: {}]   ;;  %s4801_s10 = inlined_call_operand.hbm [shape: bf16[64,128], index: 10, kind: output, shape index: {0}]   ;;  %s4802_s11 = inlined_call_operand.hbm [shape: bf16[64,128], index: 11, kind: output, shape index: {1}]  }
   0x1   :  { %18 = vsyncpa [#allocation8], 0 }
   0x2   :  { %19 = vsyncpa [#allocation6], 0 }
   0x3   :  { %20 = vsyncpa [#allocation11], 0  ;;  %s3581_s17 = smov [#allocation4]  }
   0x4   :  { %s42_s18 = sshll.u32 %s3581_s17, 4  ;;  %s43_s18 = int_to_ptr.vmem [resolvable:$true] %s42_s18 }
   0x5   :  { %s3501_s19 = scalar_lea.vmem %s43_s18, 3072  ;;  %p3506_p1 = scmp.lt.s32.totalorder %s43_s18, %s43_s18 }
   0x6   :  { %p3502_p0 = scmp.ne.s32.totalorder %s43_s18, %s3501_s19  ;;  %p3507_p2 = scmp.lt.s32.totalorder %s3501_s19, %s3501_s19 }
   0x8   :  { %p3508_p3 = por %p3507_p2, %p3506_p1 }
   0xa   :  { %p3509_p4 = pnand %p3508_p3, %p3502_p0 }
   0xc   :  { %3512 = shalt.err (!%p3509_p4)
}
   0xd   :  { %s3582_s20 = smov 192   ;;  %s3583_s21 = smov 12  }
   0xe   :  { %48 = dma.hbm_to_vmem [thread:$0]  %s4795_s4, 3072, %s43_s18, [#allocation5], %s3582_s20, %s3582_s20, %s3583_s21  }
   0xf   :  { %s3584_s24 = smov [#allocation7]  }
  0x10   :  { %s54_s25 = sshll.u32 %s3584_s24, 4  ;;  %s55_s25 = int_to_ptr.vmem [resolvable:$true] %s54_s25 }
  0x11   :  { %s3521_s26 = scalar_lea.vmem %s55_s25, 3072  ;;  %p3526_p6 = scmp.lt.s32.totalorder %s55_s25, %s55_s25 }
  0x12   :  { %p3522_p5 = scmp.ne.s32.totalorder %s55_s25, %s3521_s26  ;;  %p3527_p7 = scmp.lt.s32.totalorder %s3521_s26, %s3521_s26 }
  0x14   :  { %p3528_p8 = por %p3527_p7, %p3526_p6 }
  0x16   :  { %p3529_p9 = pnand %p3528_p8, %p3522_p5 }
  0x18   :  { %3532 = shalt.err (!%p3529_p9)
}
  0x19   :  { %60 = dma.hbm_to_vmem [thread:$0]  %s4796_s5, 3072, %s55_s25, [#allocation8], %s3582_s20, %s3582_s20, %s3583_s21  }
  0x1a   :  { %3573 = dma.done.wait [#allocation5], 3072  }
  0x1b   :  { %3574 = vsyncadd [#allocation5], 4294964224 }
  0x1c   :  { %3575 = dma.done.wait [#allocation8], 3072  }
  0x1d   :  { %3576 = vsyncadd [#allocation8], 4294964224  ;;  %v4803_v0 = vmov 0   ;;  %v3175_v1 = vld [vmem:[%s4793_s2 + $0x4] ss:$12 sps:$4 sm:$0xff]   ;;  %v105_v4 = vld [vmem:[%s4791_s0 + $0x38] sm:$0xff] }
  0x1e   :  { %222 = vmatprep.mubr.bf16.mxu1 %v4803_v0  ;;  %192 = vmatprep.mubr.bf16.mxu0 %v4803_v0  ;;  %v3177_v2 = vld [vmem:[%s4793_s2] ss:$12 sps:$4 sm:$0xff]   ;;  %v104_v3 = vld [vmem:[%s4791_s0 + $0x30] sm:$0xff]  ;;  %vm147_vm0 = vcmask 130048   ;;  %v101_v12 = vld [vmem:[%s4791_s0 + $0x18] sm:$0xff]  ;;  %v4805_v20 = vmov 0.0  }
  0x1f   :  { %3161 = vmatprep.subr.bf16.mxu1 %v3175_v1  ;;  %v109_v5 = vpack.c.bf16 %v105_v4, %v104_v3  ;;  %v3178_v6 = vld [vmem:[%s4793_s2 + $0x8] ss:$12 sps:$4 sm:$0xff]   ;;  %174 = vmatprep.subr.bf16.mxu0 %v3175_v1  ;;  %v98_v7 = vld [vmem:[%s4791_s0] sm:$0xff]  ;;  %v3704_v18 = vld [vmem:[#allocation4 + $0xac] ss:$12 sps:$4 sm:$0xff]   ;;  %vm3587_vm1 = vmmov 0  }
  0x20   :  { %3162 = vmatpush1.bf16.msra.mxu1 %v3177_v2  ;;  %v99_v8 = vld [vmem:[%s4791_s0 + $0x8] sm:$0xff]  ;;  %175 = vmatpush1.bf16.msra.mxu0 %v3177_v2  ;;  %v3181_v10 = vld [vmem:[%s4794_s3 + $0x4] ss:$12 sps:$4 sm:$0xff]   ;;  %v3726_v25 = vld [vmem:[#allocation4 + $0x94] ss:$12 sps:$4 sm:$0xff]   ;;  %v3588_v59 = vmov 0.0|0.0  }
  0x21   :  { %2821 = vmatprep.subr.bf16.mxu1 %v3178_v6  ;;  %v106_v9 = vpack.c.bf16 %v99_v8, %v98_v7  ;;  %v100_v11 = vld [vmem:[%s4791_s0 + $0x10] sm:$0xff]  ;;  %v102_v13 = vld [vmem:[%s4791_s0 + $0x20] sm:$0xff]  ;;  %v103_v14 = vld [vmem:[%s4791_s0 + $0x28] sm:$0xff] }
  0x22   :  { %v107_v15 = vpack.c.bf16 %v101_v12, %v100_v11  ;;  %v3179_v16 = vld [vmem:[%s4794_s3] ss:$12 sps:$4 sm:$0xff]   ;;  %v108_v17 = vpack.c.bf16 %v103_v14, %v102_v13  ;;  %v3190_v19 = vld [vmem:[%s4794_s3 + $0x8] ss:$12 sps:$4 sm:$0xff]   ;;  %v301_v27 = vld [vmem:[%s4792_s1 + $0x18] sm:$0xff] }
  0x23   :  { %2569 = vmatmul.mubr.msk.bf16.vlgmr.msra.gmra.mxu1 %vm147_vm0, %v109_v5  ;;  %2566 = vmatmul.mubr.msk.bf16.vlgmr.msra.gmra.mxu0 %vm147_vm0, %v106_v9  ;;  %v298_v21 = vld [vmem:[%s4792_s1] sm:$0xff]  ;;  %v299_v22 = vld [vmem:[%s4792_s1 + $0x8] sm:$0xff]  ;;  %v300_v26 = vld [vmem:[%s4792_s1 + $0x10] sm:$0xff] }
  0x24   :  { %2822 = vmatpush3.bf16.msra.mxu1 %v3178_v6  ;;  %2823 = vmatprep.mubr.msk.bf16.mxu1 %vm147_vm0, %v106_v9  ;;  %v306_v23 = vpack.c.bf16 %v299_v22, %v298_v21  ;;  %v3723_v24 = vld [vmem:[#allocation4 + $0xa8] ss:$12 sps:$4 sm:$0xff]   ;;  %v302_v28 = vld [vmem:[%s4792_s1 + $0x20] sm:$0xff]  ;;  %v3742_v30 = vld [vmem:[#allocation4 + $0xb0] ss:$12 sps:$4 sm:$0xff]   ;;  %v307_v32 = vpack.c.bf16 %v301_v27, %v300_v26 }
  0x25   :  { %373 = vmatprep.subr.bf16.mxu1 %v3181_v10  ;;  %202 = vmatprep.mubr.bf16.mxu0 %v4803_v0  ;;  %v303_v29 = vld [vmem:[%s4792_s1 + $0x28] sm:$0xff]  ;;  %v3745_v31 = vld [vmem:[#allocation4 + $0x90] ss:$12 sps:$4 sm:$0xff]   ;;  %v3751_v35 = vld [vmem:[#allocation4 + $0x78] ss:$12 sps:$4 sm:$0xff]  }
  0x26   :  { %2831 = vmatprep.subr.bf16.mxu0 %v3190_v19  ;;  %v3749_v33 = vld [vmem:[#allocation4 + $0x7c] ss:$12 sps:$4 sm:$0xff]   ;;  %v308_v34 = vpack.c.bf16 %v303_v29, %v302_v28  ;;  %v3755_v36 = vld [vmem:[#allocation4 + $0x98] ss:$12 sps:$4 sm:$0xff]   ;;  %v304_v38 = vld [vmem:[%s4792_s1 + $0x30] sm:$0xff] }
  0x27   :  { %2832 = vmatpush3.bf16.msra.mxu0 %v3190_v19  ;;  %v3759_v37 = vld [vmem:[#allocation4 + $0x64] ss:$12 sps:$4 sm:$0xff]   ;;  %v305_v39 = vld [vmem:[%s4792_s1 + $0x38] sm:$0xff]  ;;  %v3771_v40 = vld [vmem:[#allocation4 + $0x80] ss:$12 sps:$4 sm:$0xff]   ;;  %v116_v19 = vlaneseq }
  0x28   :  { %2841 = vmatprep.subr.bf16.mxu0 %v4805_v20  ;;  %v3774_v41 = vld [vmem:[#allocation4 + $0x60] ss:$12 sps:$4 sm:$0xff]   ;;  %v309_v42 = vpack.c.bf16 %v305_v39, %v304_v38  ;;  %v3783_v44 = vld [vmem:[#allocation4 + $0x68] ss:$12 sps:$4 sm:$0xff]   ;;  %v3796_v47 = vld [vmem:[#allocation4 + $0x50] ss:$12 sps:$4 sm:$0xff]  }
  0x29   :  { %v3778_v43 = vld [vmem:[#allocation4 + $0x4c] ss:$12 sps:$4 sm:$0xff]   ;;  %v3788_v45 = vld [vmem:[#allocation4 + $0x48] ss:$12 sps:$4 sm:$0xff]   ;;  %4857 = vst [vmem:[#allocation18_spill] sm:$0xff] %v3796_v47  ;;  %v117_v21 = vshrl.u32 %v116_v19, 7 }
  0x2a   :  { %4855 = vst [vmem:[#allocation16_spill] sm:$0xff] %v3788_v45  ;;  %v3792_v46 = vld [vmem:[#allocation4 + $0x34] ss:$12 sps:$4 sm:$0xff]   ;;  %v3799_v48 = vld [vmem:[#allocation4 + $0x30] ss:$12 sps:$4 sm:$0xff]  }
  0x2b   :  { %2824 = vmatmul.mubr.msk.bf16.vlgmr.msra.gmra.mxu1 %vm147_vm0, %v107_v15  ;;  %2567 = vmatmul.mubr.msk.bf16.gmra.mxu0 %vm147_vm0, %v107_v15  ;;  %4856 = vst [vmem:[#allocation17_spill] sm:$0xff] %v3792_v46  ;;  %4858 = vst [vmem:[#allocation19_spill] sm:$0xff] %v3799_v48  ;;  %v3803_v49 = vld [vmem:[#allocation4 + $0x1c] ss:$12 sps:$4 sm:$0xff]   ;;  %v3807_v50 = vld [vmem:[#allocation4 + $0x38] ss:$12 sps:$4 sm:$0xff]  }
  0x2c   :  { %374 = vmatpush1.bf16.msra.mxu1 %v3179_v16  ;;  %2827 = vmatprep.mubr.msk.bf16.mxu1 %vm147_vm0, %v108_v17  ;;  %4859 = vst [vmem:[#allocation20_spill] sm:$0xff] %v3803_v49  ;;  %4860 = vst [vmem:[#allocation21_spill] sm:$0xff] %v3807_v50  ;;  %v3810_v51 = vld [vmem:[#allocation4 + $0x18] ss:$12 sps:$4 sm:$0xff]   ;;  %v3818_v53 = vld [vmem:[#allocation4 + $0x20] ss:$12 sps:$4 sm:$0xff]  }
  0x2d   :  { %706 = vmatprep.subr.bf16.mxu1 %v3704_v18  ;;  %212 = vmatprep.mubr.bf16.mxu0 %v4803_v0  ;;  %4861 = vst [vmem:[#allocation22_spill] sm:$0xff] %v3810_v51  ;;  %v3814_v52 = vld [vmem:[#allocation4 + $0x4] ss:$12 sps:$4 sm:$0xff]   ;;  %4863 = vst [vmem:[#allocation24_spill] sm:$0xff] %v3818_v53  ;;  %v3821_v54 = vld [vmem:[#allocation4] ss:$12 sps:$4 sm:$0xff]  }
  0x2e   :  { %4862 = vst [vmem:[#allocation23_spill] sm:$0xff] %v3814_v52  ;;  %4864 = vst [vmem:[#allocation25_spill] sm:$0xff] %v3821_v54  ;;  %v3825_v55 = vld [vmem:[#allocation7 + $0xac] ss:$12 sps:$4 sm:$0xff]   ;;  %v3829_v56 = vld [vmem:[#allocation4 + $0x8] ss:$12 sps:$4 sm:$0xff]  }
  0x2f   :  { %4865 = vst [vmem:[#allocation26_spill] sm:$0xff] %v3825_v55  ;;  %4866 = vst [vmem:[#allocation27_spill] sm:$0xff] %v3829_v56  ;;  %v3832_v57 = vld [vmem:[#allocation7 + $0xa8] ss:$12 sps:$4 sm:$0xff]   ;;  %v3840_v60 = vld [vmem:[#allocation7 + $0xb0] ss:$12 sps:$4 sm:$0xff]  }
  0x30   :  { %v3836_v58 = vld [vmem:[#allocation7 + $0x94] ss:$12 sps:$4 sm:$0xff]   ;;  %v3843_v61 = vld [vmem:[#allocation7 + $0x90] ss:$12 sps:$4 sm:$0xff]   ;;  %v3852_v63 = vld [vmem:[#allocation7 + $0x98] ss:$12 sps:$4 sm:$0xff]  }
  0x31   :  { %v3847_v62 = vld [vmem:[#allocation7 + $0x7c] ss:$12 sps:$4 sm:$0xff]   ;;  %v3857_v1 = vld [vmem:[#allocation7 + $0x78] ss:$12 sps:$4 sm:$0xff]   ;;  %v3864_v3 = vld [vmem:[#allocation7 + $0x80] ss:$12 sps:$4 sm:$0xff]  }
  0x32   :  { %v3861_v2 = vld [vmem:[#allocation7 + $0x64] ss:$12 sps:$4 sm:$0xff]   ;;  %v3867_v4 = vld [vmem:[#allocation7 + $0x60] ss:$12 sps:$4 sm:$0xff]   ;;  %v3874_v6 = vld [vmem:[#allocation7 + $0x68] ss:$12 sps:$4 sm:$0xff]  }
  0x33   :  { %2828 = vmatmul.mubr.msk.bf16.gmra.mxu1 %vm147_vm0, %v109_v5  ;;  %2568 = vmatmul.mubr.msk.bf16.gmra.mxu0 %vm147_vm0, %v108_v17  ;;  %v3871_v5 = vld [vmem:[#allocation7 + $0x4c] ss:$12 sps:$4 sm:$0xff]   ;;  %v3877_v7 = vld [vmem:[#allocation7 + $0x48] ss:$12 sps:$4 sm:$0xff]   ;;  %v3884_v9 = vld [vmem:[#allocation7 + $0x50] ss:$12 sps:$4 sm:$0xff]  }
  0x34   :  { %391 = vmatprep.mubr.bf16.mxu1 %v4803_v0  ;;  %2833 = vmatprep.mubr.msk.bf16.mxu0 %vm147_vm0, %v306_v23  ;;  %v3881_v8 = vld [vmem:[#allocation7 + $0x34] ss:$12 sps:$4 sm:$0xff]   ;;  %v3887_v10 = vld [vmem:[#allocation7 + $0x30] ss:$12 sps:$4 sm:$0xff]   ;;  %v3894_v12 = vld [vmem:[#allocation7 + $0x38] ss:$12 sps:$4 sm:$0xff]  }
  0x35   :  { %v3891_v11 = vld [vmem:[#allocation7 + $0x1c] ss:$12 sps:$4 sm:$0xff]   ;;  %v3897_v13 = vld [vmem:[#allocation7 + $0x18] ss:$12 sps:$4 sm:$0xff]   ;;  %v3904_v15 = vld [vmem:[#allocation7 + $0x20] ss:$12 sps:$4 sm:$0xff]  }
  0x36   :  { %v3901_v14 = vld [vmem:[#allocation7 + $0x4] ss:$12 sps:$4 sm:$0xff]   ;;  %v3907_v16 = vld [vmem:[#allocation7] ss:$12 sps:$4 sm:$0xff]   ;;  %v3912_v17 = vld [vmem:[#allocation7 + $0x8] ss:$12 sps:$4 sm:$0xff]  }
  0x37   :  { %v118_v22 = vsub.s32 0, %v117_v21  ;;  %v122_v26 = vsub.s32 1, %v117_v21  ;;  %v126_v38 = vsub.s32 2, %v117_v21 }
  0x3b   :  { %2577 = vmatmul.mubr.msk.bf16.vlgmr.msra.gmra.mxu1 %vm147_vm0, %v306_v23  ;;  %2834 = vmatmul.mubr.msk.bf16.vlgmr.msra.gmra.mxu0 %vm147_vm0, %v307_v32  ;;  %v114_v23 = vld [vmem:[%s4797_s6] sm:$0x7] }
  0x3c   :  { %707 = vmatpush1.bf16.msra.mxu1 %v3723_v24  ;;  %401 = vmatprep.mubr.bf16.mxu1 %v4803_v0  ;;  %v3959_v27 = vrot.slane %v114_v23, %v118_v22  ;;  %v3961_v28 = vrot.slane %v114_v23, %v122_v26 }
  0x3d   :  { %708 = vmatprep.subr.bf16.mxu1 %v3726_v25  ;;  %2842 = vmatpush3.bf16.msra.mxu0 %v3742_v30 }
  0x3e   :  { %2837 = vmatprep.mubr.msk.bf16.mxu0 %vm147_vm0, %v308_v34  ;;  %2843 = vmatprep.subr.bf16.mxu0 %v4805_v20 }
  0x40   :  { %709 = vmatpush1.bf16.msra.mxu1 %v3745_v31 }
  0x41   :  { %710 = vmatprep.subr.bf16.mxu1 %v3749_v33  ;;  %2844 = vmatpush3.bf16.msra.mxu0 %v3755_v36 }
  0x42   :  { %2845 = vmatprep.subr.bf16.mxu0 %v4805_v20 }
  0x43   :  { %2578 = vmatmul.mubr.msk.bf16.gmra.mxu1 %vm147_vm0, %v307_v32  ;;  %2838 = vmatmul.mubr.msk.bf16.gmra.mxu0 %vm147_vm0, %v309_v42 }
  0x44   :  { %711 = vmatpush1.bf16.msra.mxu1 %v3751_v35  ;;  %411 = vmatprep.mubr.bf16.mxu1 %v4803_v0 }
  0x45   :  { %712 = vmatprep.subr.bf16.mxu1 %v3759_v37  ;;  %2846 = vmatpush3.bf16.msra.mxu0 %v3771_v40 }
  0x46   :  { %2857 = vmatprep.mubr.msk.bf16.mxu0 %vm3587_vm1, %v4805_v20  ;;  %2847 = vmatprep.subr.bf16.mxu0 %v4805_v20 }
  0x48   :  { %713 = vmatpush1.bf16.msra.mxu1 %v3774_v41 }
  0x49   :  { %714 = vmatprep.subr.bf16.mxu1 %v3778_v43  ;;  %2848 = vmatpush3.bf16.msra.mxu0 %v3783_v44 }
  0x4a   :  { %2849 = vmatprep.subr.bf16.mxu0 %v4805_v20 }
  0x4b   :  { %2579 = vmatmul.mubr.msk.bf16.gmra.mxu1 %vm147_vm0, %v308_v34 }
  0x4c   :  { %715 = vmatpush1.bf16.msra.mxu1 %v3788_v45  ;;  %421 = vmatprep.mubr.bf16.mxu1 %v4803_v0 }
  0x4d   :  { %716 = vmatprep.subr.bf16.mxu1 %v3792_v46  ;;  %2850 = vmatpush3.bf16.msra.mxu0 %v3796_v47 }
  0x4e   :  { %2851 = vmatprep.subr.bf16.mxu0 %v4805_v20 }
  0x50   :  { %717 = vmatpush1.bf16.msra.mxu1 %v3799_v48 }
  0x51   :  { %718 = vmatprep.subr.bf16.mxu1 %v3803_v49  ;;  %2852 = vmatpush3.bf16.msra.mxu0 %v3807_v50 }
  0x52   :  { %2853 = vmatprep.subr.bf16.mxu0 %v4805_v20 }
  0x53   :  { %2580 = vmatmul.mubr.msk.bf16.gmra.mxu1 %vm147_vm0, %v309_v42 }
  0x54   :  { %719 = vmatpush1.bf16.msra.mxu1 %v3810_v51  ;;  %738 = vmatprep.mubr.bf16.mxu1 %v4803_v0 }
  0x55   :  { %720 = vmatprep.subr.bf16.mxu1 %v3814_v52  ;;  %2854 = vmatpush3.bf16.msra.mxu0 %v3818_v53 }
  0x56   :  { %2855 = vmatprep.subr.bf16.mxu0 %v4805_v20 }
  0x58   :  { %721 = vmatpush1.bf16.msra.mxu1 %v3821_v54 }
  0x59   :  { %938 = vmatprep.subr.bf16.mxu1 %v3825_v55  ;;  %2856 = vmatpush3.bf16.msra.mxu0 %v3829_v56 }
  0x5a   :  { %2861 = vmatprep.subr.bf16.mxu0 %v4805_v20 }
  0x5b   :  { %739 = vmatmul.mubr.bf16.vlgmr.msra.gmra.mxu1 %v3588_v59 }
  0x5c   :  { %939 = vmatpush1.bf16.msra.mxu1 %v3832_v57  ;;  %970 = vmatprep.mubr.bf16.mxu1 %v4803_v0 }
  0x5d   :  { %940 = vmatprep.subr.bf16.mxu1 %v3836_v58  ;;  %2858 = vmatmul.mubr.bf16.vlgmr.msra.gmra.mxu0 %v3588_v59 }
  0x5e   :  { %2862 = vmatpush3.bf16.msra.mxu0 %v3840_v60  ;;  %2877 = vmatprep.mubr.msk.bf16.mxu0 %vm3587_vm1, %v4805_v20 }
  0x5f   :  { %2863 = vmatprep.subr.bf16.mxu0 %v4805_v20 }
  0x60   :  { %941 = vmatpush1.bf16.msra.mxu1 %v3843_v61 }
  0x61   :  { %942 = vmatprep.subr.bf16.mxu1 %v3847_v62 }
  0x62   :  { %2864 = vmatpush3.bf16.msra.mxu0 %v3852_v63 }
  0x63   :  { %2865 = vmatprep.subr.bf16.mxu0 %v4805_v20 }
  0x64   :  { %943 = vmatpush1.bf16.msra.mxu1 %v3857_v1 }
  0x65   :  { %944 = vmatprep.subr.bf16.mxu1 %v3861_v2 }
  0x66   :  { %2866 = vmatpush3.bf16.msra.mxu0 %v3864_v3 }
  0x67   :  { %2867 = vmatprep.subr.bf16.mxu0 %v4805_v20 }
  0x68   :  { %945 = vmatpush1.bf16.msra.mxu1 %v3867_v4 }
  0x69   :  { %946 = vmatprep.subr.bf16.mxu1 %v3871_v5 }
  0x6a   :  { %2868 = vmatpush3.bf16.msra.mxu0 %v3874_v6 }
  0x6b   :  { %2869 = vmatprep.subr.bf16.mxu0 %v4805_v20 }
  0x6c   :  { %947 = vmatpush1.bf16.msra.mxu1 %v3877_v7 }
  0x6d   :  { %948 = vmatprep.subr.bf16.mxu1 %v3881_v8 }
  0x6e   :  { %2870 = vmatpush3.bf16.msra.mxu0 %v3884_v9 }
  0x6f   :  { %2871 = vmatprep.subr.bf16.mxu0 %v4805_v20 }
  0x70   :  { %949 = vmatpush1.bf16.msra.mxu1 %v3887_v10 }
  0x71   :  { %950 = vmatprep.subr.bf16.mxu1 %v3891_v11 }
  0x72   :  { %2872 = vmatpush3.bf16.msra.mxu0 %v3894_v12 }
  0x73   :  { %2873 = vmatprep.subr.bf16.mxu0 %v4805_v20 }
  0x74   :  { %951 = vmatpush1.bf16.msra.mxu1 %v3897_v13 }
  0x75   :  { %952 = vmatprep.subr.bf16.mxu1 %v3901_v14 }
  0x76   :  { %2874 = vmatpush3.bf16.msra.mxu0 %v3904_v15 }
  0x77   :  { %2875 = vmatprep.subr.bf16.mxu0 %v4805_v20 }
  0x78   :  { %953 = vmatpush1.bf16.msra.mxu1 %v3907_v16 }
  0x79   :  { %1045 = vmatprep.subr.bf16.mxu1 %v3704_v18 }
  0x7a   :  { %2876 = vmatpush3.bf16.msra.mxu0 %v3912_v17 }
  0x7b   :  { %971 = vmatmul.mubr.bf16.vlgmr.msra.gmra.mxu1 %v3588_v59  ;;  %2881 = vmatprep.subr.bf16.mxu0 %v4805_v20 }
  0x7c   :  { %1046 = vmatpush1.bf16.msra.mxu1 %v3723_v24  ;;  %1077 = vmatprep.mubr.bf16.mxu1 %v4803_v0 }
  0x7d   :  { %1047 = vmatprep.subr.bf16.mxu1 %v3726_v25  ;;  %2878 = vmatmul.mubr.bf16.vlgmr.msra.gmra.mxu0 %v3588_v59 }
  0x7e   :  { %2882 = vmatpush3.bf16.msra.mxu0 %v3742_v30  ;;  %2897 = vmatprep.mubr.msk.bf16.mxu0 %vm3587_vm1, %v4805_v20 }
  0x7f   :  { %2883 = vmatprep.subr.bf16.mxu0 %v4805_v20 }
  0x80   :  { %1048 = vmatpush1.bf16.msra.mxu1 %v3745_v31 }
  0x81   :  { %1049 = vmatprep.subr.bf16.mxu1 %v3749_v33 }
  0x82   :  { %2884 = vmatpush3.bf16.msra.mxu0 %v3755_v36 }
  0x83   :  { %2885 = vmatprep.subr.bf16.mxu0 %v4805_v20 }
  0x84   :  { %1050 = vmatpush1.bf16.msra.mxu1 %v3751_v35 }
  0x85   :  { %1051 = vmatprep.subr.bf16.mxu1 %v3759_v37 }
  0x86   :  { %2886 = vmatpush3.bf16.msra.mxu0 %v3771_v40 }
  0x87   :  { %2887 = vmatprep.subr.bf16.mxu0 %v4805_v20 }
  0x88   :  { %1052 = vmatpush1.bf16.msra.mxu1 %v3774_v41 }
  0x89   :  { %1053 = vmatprep.subr.bf16.mxu1 %v3778_v43 }
  0x8a   :  { %2888 = vmatpush3.bf16.msra.mxu0 %v3783_v44 }
  0x8b   :  { %2889 = vmatprep.subr.bf16.mxu0 %v4805_v20 }
  0x8c   :  { %1054 = vmatpush1.bf16.msra.mxu1 %v3788_v45 }
  0x8d   :  { %1055 = vmatprep.subr.bf16.mxu1 %v3792_v46 }
  0x8e   :  { %2890 = vmatpush3.bf16.msra.mxu0 %v3796_v47 }
  0x8f   :  { %2891 = vmatprep.subr.bf16.mxu0 %v4805_v20 }
  0x90   :  { %1056 = vmatpush1.bf16.msra.mxu1 %v3799_v48 }
  0x91   :  { %1057 = vmatprep.subr.bf16.mxu1 %v3803_v49 }
  0x92   :  { %2892 = vmatpush3.bf16.msra.mxu0 %v3807_v50 }
  0x93   :  { %2893 = vmatprep.subr.bf16.mxu0 %v4805_v20 }
  0x94   :  { %1058 = vmatpush1.bf16.msra.mxu1 %v3810_v51 }
  0x95   :  { %1059 = vmatprep.subr.bf16.mxu1 %v3814_v52 }
  0x96   :  { %2894 = vmatpush3.bf16.msra.mxu0 %v3818_v53 }
  0x97   :  { %2895 = vmatprep.subr.bf16.mxu0 %v4805_v20 }
  0x98   :  { %1060 = vmatpush1.bf16.msra.mxu1 %v3821_v54 }
  0x99   :  { %1148 = vmatprep.subr.bf16.mxu1 %v3825_v55  ;;  %v3976_v55 = vrot.slane %v114_v23, %v126_v38 }
  0x9a   :  { %2896 = vmatpush3.bf16.msra.mxu0 %v3829_v56 }
  0x9b   :  { %2901 = vmatprep.subr.bf16.mxu0 %v4805_v20 }
  0xe3   :  { %v224_v29 = vpop.f32.mrf.mxu1  ;;  %v3963_v32 = vpop.f32.mrf.mxu0 }
  0xe4   :  { %v3966_v34 = vadd.f32 %v224_v29, %v3959_v27 }
  0xe5   :  { %v226_v39 = vpop.f32.mrf.mxu1  ;;  %v3968_v42 = vpop.f32.mrf.mxu0 }
  0xe6   :  { %4867 = vst [vmem:[#allocation28_spill] sm:$0xff] %v3966_v34  ;;  %v3971_v59 = vadd.f32 %v226_v39, %v3961_v28 }
  0xe7   :  { %v228_v19 = vpop.f32.mrf.mxu1  ;;  %v198_v0 = vpop.f32.mrf.mxu0 }
  0xe8   :  { %4868 = vst [vmem:[#allocation29_spill] sm:$0xff] %v3971_v59  ;;  %v3974_v20 = vadd.f32 %v228_v19, %v3959_v27  ;;  %v3979_v56 = vadd.f32 %v198_v0, %v3959_v27 }
  0xe9   :  { %v230_v54 = vpop.f32.mrf.mxu1  ;;  %v200_v29 = vpop.f32.mrf.mxu0 }
  0xea   :  { %4869 = vst [vmem:[#allocation30_spill] sm:$0xff] %v3974_v20  ;;  %4870 = vst [vmem:[#allocation31_spill] sm:$0xff] %v3979_v56  ;;  %v3982_v21 = vadd.f32 %v230_v54, %v3961_v28  ;;  %v3985_v34 = vadd.f32 %v200_v29, %v3961_v28 }
  0xeb   :  { %v2825_v39 = vpop.f32.mrf.mxu1  ;;  %v204_v19 = vpop.f32.mrf.mxu0 }
  0xec   :  { %4871 = vst [vmem:[#allocation32_spill] sm:$0xff] %v3982_v21  ;;  %4872 = vst [vmem:[#allocation33_spill] sm:$0xff] %v3985_v34  ;;  %v3988_v59 = vadd.f32 %v2825_v39, %v3976_v55  ;;  %v3993_v20 = vadd.f32 %v204_v19, %v3959_v27 }
  0xed   :  { %v3990_v52 = vpop.f32.mrf.mxu1  ;;  %v206_v56 = vpop.f32.mrf.mxu0 }
  0xee   :  { %4873 = vst [vmem:[#allocation34_spill] sm:$0xff] %v3988_v59  ;;  %4874 = vst [vmem:[#allocation35_spill] sm:$0xff] %v3993_v20  ;;  %v3999_v21 = vadd.f32 %v206_v56, %v3961_v28 }
  0xef   :  { %v2826_v23 = vpop.f32.mrf.mxu1  ;;  %v208_v39 = vpop.f32.mrf.mxu0 }
  0xf0   :  { %v3996_v0 = vadd.f32 %v2826_v23, %v3976_v55  ;;  %4876 = vst [vmem:[#allocation37_spill] sm:$0xff] %v3999_v21  ;;  %v4005_v34 = vadd.f32 %v208_v39, %v3959_v27  ;;  %v314_v23 = vld [vmem:[%s4798_s7] sm:$0x7] }
  0xf1   :  { %v270_v54 = vpop.f32.mrf.mxu1  ;;  %v210_v19 = vpop.f32.mrf.mxu0 }
  0xf2   :  { %4875 = vst [vmem:[#allocation36_spill] sm:$0xff] %v3996_v0  ;;  %v4002_v29 = vadd.f32 %v270_v54, %v3976_v55  ;;  %4878 = vst [vmem:[#allocation39_spill] sm:$0xff] %v4005_v34  ;;  %v4014_v56 = vadd.f32 %v210_v19, %v3961_v28 }
  0xf3   :  { %v2829_v59 = vpop.f32.mrf.mxu1  ;;  %v214_v0 = vpop.f32.mrf.mxu0 }
  0xf4   :  { %4877 = vst [vmem:[#allocation38_spill] sm:$0xff] %v4002_v29  ;;  %v4008_v53 = vadd.f32 %v2829_v59, %v3976_v55  ;;  %4880 = vst [vmem:[#allocation41_spill] sm:$0xff] %v4014_v56  ;;  %v4020_v39 = vadd.f32 %v214_v0, %v3959_v27 }
  0xf5   :  { %v283_v20 = vpop.f32.mrf.mxu1  ;;  %v216_v34 = vpop.f32.mrf.mxu0 }
  0xf6   :  { %4879 = vst [vmem:[#allocation40_spill] sm:$0xff] %v4008_v53  ;;  %v4017_v54 = vadd.f32 %v283_v20, %v3976_v55  ;;  %4882 = vst [vmem:[#allocation43_spill] sm:$0xff] %v4020_v39  ;;  %v4025_v53 = vrot.slane %v314_v23, %v118_v22  ;;  %v4028_v51 = vadd.f32 %v216_v34, %v3961_v28 }
  0xf7   :  { %v2830_v21 = vpop.f32.mrf.mxu1  ;;  %v4033_v20 = vrot.slane %v314_v23, %v122_v26  ;;  %v4038_v39 = vrot.slane %v314_v23, %v126_v38 }
  0xf8   :  { %4881 = vst [vmem:[#allocation42_spill] sm:$0xff] %v4017_v54  ;;  %v4023_v59 = vadd.f32 %v2830_v21, %v3976_v55  ;;  %4884 = vst [vmem:[#allocation45_spill] sm:$0xff] %v4028_v51  ;;  %v218_v54 = vpop.f32.mrf.mxu0 }
  0xf9   :  { %v286_v29 = vpop.f32.mrf.mxu1  ;;  %v4036_v0 = vadd.f32 %v218_v54, %v3959_v27 }
  0xfa   :  { %4883 = vst [vmem:[#allocation44_spill] sm:$0xff] %v4023_v59  ;;  %v4031_v19 = vadd.f32 %v286_v29, %v3976_v55  ;;  %v220_v21 = vpop.f32.mrf.mxu0 }
  0xfb   :  { %v393_v56 = vpop.f32.mrf.mxu1  ;;  %4886 = vst [vmem:[#allocation47_spill] sm:$0xff] %v4036_v0  ;;  %v4044_v34 = vadd.f32 %v220_v21, %v3961_v28 }
  0xfc   :  { %4885 = vst [vmem:[#allocation46_spill] sm:$0xff] %v4031_v19  ;;  %v4041_v22 = vadd.f32 %v393_v56, %v4025_v53  ;;  %v2835_v26 = vpop.f32.mrf.mxu0 }
  0xfd   :  { %v395_v59 = vpop.f32.mrf.mxu1  ;;  %4888 = vst [vmem:[#allocation49_spill] sm:$0xff] %v4044_v34  ;;  %v4050_v51 = vadd.f32 %v2835_v26, %v4038_v39 }
  0xfe   :  { %4887 = vst [vmem:[#allocation48_spill] sm:$0xff] %v4041_v22  ;;  %v4047_v29 = vadd.f32 %v395_v59, %v4033_v20  ;;  %v466_v38 = vpop.f32.mrf.mxu0 }
  0xff   :  { %v397_v19 = vpop.f32.mrf.mxu1  ;;  %4890 = vst [vmem:[#allocation51_spill] sm:$0xff] %v4050_v51  ;;  %v4056_v56 = vadd.f32 %v466_v38, %v4038_v39 }
 0x100   :  { %4889 = vst [vmem:[#allocation50_spill] sm:$0xff] %v4047_v29  ;;  %v4053_v54 = vadd.f32 %v397_v19, %v4025_v53  ;;  %v2836_v21 = vpop.f32.mrf.mxu0 }
 0x101   :  { %v399_v23 = vpop.f32.mrf.mxu1  ;;  %4892 = vst [vmem:[#allocation53_spill] sm:$0xff] %v4056_v56  ;;  %v4062_v59 = vadd.f32 %v2836_v21, %v4038_v39 }
 0x102   :  { %4891 = vst [vmem:[#allocation52_spill] sm:$0xff] %v4053_v54  ;;  %v4059_v22 = vadd.f32 %v399_v23, %v4033_v20  ;;  %v469_v26 = vpop.f32.mrf.mxu0 }
 0x103   :  { %v403_v34 = vpop.f32.mrf.mxu1  ;;  %4894 = vst [vmem:[#allocation55_spill] sm:$0xff] %v4062_v59  ;;  %v4068_v19 = vadd.f32 %v469_v26, %v4038_v39 }
 0x104   :  { %4893 = vst [vmem:[#allocation54_spill] sm:$0xff] %v4059_v22  ;;  %v4065_v29 = vadd.f32 %v403_v34, %v4025_v53  ;;  %v2839_v38 = vpop.f32.mrf.mxu0 }
 0x105   :  { %v405_v51 = vpop.f32.mrf.mxu1  ;;  %4896 = vst [vmem:[#allocation57_spill] sm:$0xff] %v4068_v19  ;;  %v4074_v23 = vadd.f32 %v2839_v38, %v4038_v39 }
 0x106   :  { %4895 = vst [vmem:[#allocation56_spill] sm:$0xff] %v4065_v29  ;;  %v4071_v54 = vadd.f32 %v405_v51, %v4033_v20  ;;  %v482_v21 = vpop.f32.mrf.mxu0 }
 0x107   :  { %v407_v56 = vpop.f32.mrf.mxu1  ;;  %4898 = vst [vmem:[#allocation59_spill] sm:$0xff] %v4074_v23  ;;  %v4080_v34 = vadd.f32 %v482_v21, %v4038_v39 }
 0x108   :  { %4897 = vst [vmem:[#allocation58_spill] sm:$0xff] %v4071_v54  ;;  %v4077_v22 = vadd.f32 %v407_v56, %v4025_v53  ;;  %v4085_v26 = vpop.f32.mrf.mxu0 }
 0x109   :  { %v409_v0 = vpop.f32.mrf.mxu1  ;;  %4900 = vst [vmem:[#allocation61_spill] sm:$0xff] %v4080_v34 }
 0x10a   :  { %4899 = vst [vmem:[#allocation60_spill] sm:$0xff] %v4077_v22  ;;  %v4083_v29 = vadd.f32 %v409_v0, %v4033_v20  ;;  %v485_v54 = vpop.f32.mrf.mxu0 }
 0x10b   :  { %v413_v51 = vpop.f32.mrf.mxu1  ;;  %v4091_v59 = vadd.f32 %v485_v54, %v4038_v39 }
 0x10c   :  { %4901 = vst [vmem:[#allocation62_spill] sm:$0xff] %v4083_v29  ;;  %v4088_v19 = vadd.f32 %v413_v51, %v4025_v53 }
 0x10d   :  { %v415_v38 = vpop.f32.mrf.mxu1  ;;  %4903 = vst [vmem:[#allocation64_spill] sm:$0xff] %v4091_v59 }
 0x10e   :  { %4902 = vst [vmem:[#allocation63_spill] sm:$0xff] %v4088_v19  ;;  %v4094_v56 = vadd.f32 %v415_v38, %v4033_v20  ;;  %v195_v38 = vadd.f32 %v3963_v32, %v3959_v27  ;;  %v4115_v32 = vld [vmem:[%s4799_s8] ss:$0 sm:$0xff] }
 0x10f   :  { %v417_v22 = vpop.f32.mrf.mxu1 }
 0x110   :  { %4904 = vst [vmem:[#allocation65_spill] sm:$0xff] %v4094_v56  ;;  %v4097_v21 = vadd.f32 %v417_v22, %v4025_v53 }
 0x111   :  { %v419_v0 = vpop.f32.mrf.mxu1 }
 0x112   :  { %4905 = vst [vmem:[#allocation66_spill] sm:$0xff] %v4097_v21  ;;  %v4100_v29 = vadd.f32 %v419_v0, %v4033_v20 }
 0x113   :  { %v423_v34 = vpop.f32.mrf.mxu1 }
 0x114   :  { %4906 = vst [vmem:[#allocation67_spill] sm:$0xff] %v4100_v29  ;;  %v4103_v51 = vadd.f32 %v423_v34, %v4025_v53  ;;  %v197_v29 = vadd.f32 %v3968_v42, %v3961_v28 }
 0x115   :  { %v425_v19 = vpop.f32.mrf.mxu1 }
 0x116   :  { %4907 = vst [vmem:[#allocation68_spill] sm:$0xff] %v4103_v51  ;;  %v4106_v23 = vadd.f32 %v425_v19, %v4033_v20 }
 0x117   :  { %v427_v54 = vpop.f32.mrf.mxu1 }
 0x118   :  { %4908 = vst [vmem:[#allocation69_spill] sm:$0xff] %v4106_v23 }
 0x119   :  { %v429_v59 = vpop.f32.mrf.mxu1 }
 0x11b   :  { %v740_v56 = vpop.f32.mrf.mxu1 }
 0x11c   :  { %v787_v22 = vadd.f32 %v740_v56, %v195_v38  ;;  %v428_v56 = vadd.f32 %v427_v54, %v4025_v53  ;;  %v430_v38 = vadd.f32 %v429_v59, %v4033_v20 }
 0x11d   :  { %v742_v21 = vpop.f32.mrf.mxu1  ;;  %v781_v50 = vpop.f32.mrf.mxu0 }
 0x11e   :  { %v2611_v49 = vmul.f32 -1.442695, %v787_v22  ;;  %v794_v48 = vadd.f32 %v742_v21, %v197_v29 }
 0x11f   :  { %v744_v0 = vpop.f32.mrf.mxu1  ;;  %v2859_v34 = vpop.f32.mrf.mxu0 }
 0x120   :  { %3247 = vpow2.f32 %v2611_v49  ;;  %v2612_v46 = vmul.f32 -1.442695, %v794_v48  ;;  %v801_v49 = vadd.f32 %v4115_v32, %v781_v50 }
 0x121   :  { %v745_v51 = vpop.f32.mrf.mxu1  ;;  %v784_v19 = vpop.f32.mrf.mxu0 }
 0x122   :  { %3249 = vpow2.f32 %v2612_v46  ;;  %v268_v46 = vadd.f32 %v3990_v52, %v3976_v55 }
 0x123   :  { %v2860_v23 = vpop.f32.mrf.mxu0 }
 0x12d   :  { %v3248_v47 = vpop.eup %3247 }
 0x12e   :  { %v791_v45 = vadd.f32 1.0, %v3248_v47 }
 0x12f   :  { %v3250_v27 = vpop.eup %3249 }
 0x130   :  { %3251 = vrcp.f32 %v791_v45  ;;  %v798_v28 = vadd.f32 1.0, %v3250_v27 }
 0x132   :  { %3253 = vrcp.f32 %v798_v28 }
 0x13b   :  { %v972_v42 = vpop.f32.mrf.mxu1 }
 0x13c   :  { %v1019_v29 = vadd.f32 %v972_v42, %v428_v56 }
 0x13d   :  { %v3252_v21 = vpop.eup %3251  ;;  %v974_v23 = vpop.f32.mrf.mxu1 }
 0x13e   :  { %v802_v45 = vmul.f32 %v3252_v21, %v801_v49  ;;  %v2637_v47 = vmul.f32 -1.442695, %v1019_v29  ;;  %v1013_v48 = vpop.f32.mrf.mxu0  ;;  %v1026_v50 = vadd.f32 %v974_v23, %v430_v38  ;;  %v4129_v21 = vld [vmem:[%s4800_s9] ss:$0 sm:$0xff]  ;;  %v4909_v23 = vmov 0.0  }
 0x13f   :  { %v976_v51 = vpop.f32.mrf.mxu1  ;;  %v3254_v27 = vpop.eup %3253  ;;  %v494_v38 = vadd.f32 %v4085_v26, %v4038_v39 }
 0x140   :  { %v803_v22 = vadd.f32 %v802_v45, %v268_v46  ;;  %3255 = vpow2.f32 %v2637_v47  ;;  %v2879_v53 = vpop.f32.mrf.mxu0  ;;  %v2638_v19 = vmul.f32 -1.442695, %v1026_v50  ;;  %v805_v55 = vsub.f32 1.0, %v3254_v27 }
 0x141   :  { %v977_v54 = vpop.f32.mrf.mxu1  ;;  %v807_v42 = vmul.f32 0.0, %v3254_v27  ;;  %v4910_v46 = vmov 0   ;;  %v1033_v47 = vadd.f32 %v4129_v21, %v1013_v48  ;;  %v4923_v27 = vld [vmem:[#allocation31_spill] sm:$0xff] }
 0x142   :  { %3257 = vtanh.f32 %v803_v22  ;;  %v1016_v0 = vpop.f32.mrf.mxu0 }
 0x143   :  { %3259 = vpow2.f32 %v2638_v19 }
 0x144   :  { %v2880_v34 = vpop.f32.mrf.mxu0 }
 0x14d   :  { %v3256_v56 = vpop.eup %3255 }
 0x14e   :  { %v1023_v52 = vadd.f32 1.0, %v3256_v56 }
 0x14f   :  { %v3258_v28 = vpop.eup %3257 }
 0x150   :  { %3261 = vrcp.f32 %v1023_v52  ;;  %v806_v49 = vmul.f32 %v3258_v28, %v805_v55  ;;  %v3260_v59 = vpop.eup %3259 }
 0x151   :  { %v1030_v45 = vadd.f32 1.0, %v3260_v59 }
 0x152   :  { %v4122_v29 = vadd.f32 %v807_v42, %v806_v49 }
 0x153   :  { %3263 = vrcp.f32 %v1030_v45  ;;  %v4924_v45 = vld [vmem:[#allocation33_spill] sm:$0xff] }
 0x154   :  { %v1041_v20 = vpack.c.bf16 %v4122_v29, %v4122_v29 }
 0x156   :  { %1042 = vst [vmem:[#allocation9] sm:$0xf] %v1041_v20  ;;  %1078 = vmatmul.mubr.bf16.vlgmr.msra.gmra.mxu1 %v1041_v20  ;;  %2898 = vmatmul.mubr.bf16.vlgmr.msra.gmra.mxu0 %v1041_v20 }
 0x157   :  { %1149 = vmatpush1.bf16.msra.mxu1 %v3832_v57  ;;  %2902 = vmatpush3.bf16.msra.mxu0 %v3840_v60 }
 0x158   :  { %1150 = vmatprep.subr.bf16.mxu1 %v3836_v58  ;;  %2903 = vmatprep.subr.bf16.mxu0 %v4909_v23 }
 0x159   :  { %1180 = vmatprep.mubr.bf16.mxu1 %v4910_v46  ;;  %2917 = vmatprep.mubr.msk.bf16.mxu0 %vm3587_vm1, %v4909_v23 }
 0x15b   :  { %1151 = vmatpush1.bf16.msra.mxu1 %v3843_v61  ;;  %2904 = vmatpush3.bf16.msra.mxu0 %v3852_v63 }
 0x15c   :  { %1152 = vmatprep.subr.bf16.mxu1 %v3847_v62  ;;  %2905 = vmatprep.subr.bf16.mxu0 %v4909_v23 }
 0x15d   :  { %v3262_v51 = vpop.eup %3261 }
 0x15e   :  { %v1034_v22 = vmul.f32 %v3262_v51, %v1033_v47 }
 0x15f   :  { %1153 = vmatpush1.bf16.msra.mxu1 %v3857_v1  ;;  %2906 = vmatpush3.bf16.msra.mxu0 %v3864_v3 }
 0x160   :  { %v1035_v53 = vadd.f32 %v1034_v22, %v494_v38  ;;  %1154 = vmatprep.subr.bf16.mxu1 %v3861_v2  ;;  %2907 = vmatprep.subr.bf16.mxu0 %v4909_v23  ;;  %v3264_v39 = vpop.eup %3263 }
 0x161   :  { %v1037_v26 = vsub.f32 1.0, %v3264_v39  ;;  %v1039_v50 = vmul.f32 0.0, %v3264_v39 }
 0x162   :  { %3265 = vtanh.f32 %v1035_v53 }
 0x163   :  { %1155 = vmatpush1.bf16.msra.mxu1 %v3867_v4  ;;  %2908 = vmatpush3.bf16.msra.mxu0 %v3874_v6 }
 0x164   :  { %1156 = vmatprep.subr.bf16.mxu1 %v3871_v5  ;;  %2909 = vmatprep.subr.bf16.mxu0 %v4909_v23 }
 0x167   :  { %1157 = vmatpush1.bf16.msra.mxu1 %v3877_v7  ;;  %2910 = vmatpush3.bf16.msra.mxu0 %v3884_v9 }
 0x168   :  { %1158 = vmatprep.subr.bf16.mxu1 %v3881_v8  ;;  %2911 = vmatprep.subr.bf16.mxu0 %v4909_v23 }
 0x16b   :  { %1159 = vmatpush1.bf16.msra.mxu1 %v3887_v10  ;;  %2912 = vmatpush3.bf16.msra.mxu0 %v3894_v12 }
 0x16c   :  { %1160 = vmatprep.subr.bf16.mxu1 %v3891_v11  ;;  %2913 = vmatprep.subr.bf16.mxu0 %v4909_v23 }
 0x16f   :  { %v3266_v48 = vpop.eup %3265  ;;  %1161 = vmatpush1.bf16.msra.mxu1 %v3897_v13  ;;  %2914 = vmatpush3.bf16.msra.mxu0 %v3904_v15 }
 0x170   :  { %1162 = vmatprep.subr.bf16.mxu1 %v3901_v14  ;;  %2915 = vmatprep.subr.bf16.mxu0 %v4909_v23  ;;  %v1038_v54 = vmul.f32 %v3266_v48, %v1037_v26 }
 0x172   :  { %v4165_v0 = vadd.f32 %v1039_v50, %v1038_v54  ;;  %v4925_v50 = vld [vmem:[#allocation68_spill] sm:$0xff] }
 0x173   :  { %1163 = vmatpush1.bf16.msra.mxu1 %v3907_v16  ;;  %2916 = vmatpush3.bf16.msra.mxu0 %v3912_v17 }
 0x174   :  { %v1043_v34 = vpack.c.bf16 %v4165_v0, %v4165_v0  ;;  %1255 = vmatprep.subr.bf16.mxu1 %v3704_v18  ;;  %2921 = vmatprep.subr.bf16.mxu0 %v4909_v23  ;;  %v4911_v18 = vld [vmem:[#allocation16_spill] sm:$0xff] }
 0x176   :  { %1044 = vst [vmem:[#allocation10 + $0x1c] sm:$0xf] %v1043_v34  ;;  %1181 = vmatmul.mubr.bf16.vlgmr.msra.gmra.mxu1 %v1043_v34  ;;  %2918 = vmatmul.mubr.bf16.vlgmr.msra.gmra.mxu0 %v1043_v34 }
 0x177   :  { %1256 = vmatpush1.bf16.msra.mxu1 %v3723_v24  ;;  %2922 = vmatpush3.bf16.msra.mxu0 %v3742_v30  ;;  %v4912_v24 = vld [vmem:[#allocation18_spill] sm:$0xff]  ;;  %v4914_v30 = vld [vmem:[#allocation19_spill] sm:$0xff] }
 0x178   :  { %1257 = vmatprep.subr.bf16.mxu1 %v3726_v25  ;;  %2923 = vmatprep.subr.bf16.mxu0 %v4909_v23  ;;  %v4913_v25 = vld [vmem:[#allocation17_spill] sm:$0xff] }
 0x179   :  { %1287 = vmatprep.mubr.bf16.mxu1 %v4910_v46  ;;  %2937 = vmatprep.mubr.msk.bf16.mxu0 %vm3587_vm1, %v4909_v23 }
 0x17b   :  { %1258 = vmatpush1.bf16.msra.mxu1 %v3745_v31  ;;  %2924 = vmatpush3.bf16.msra.mxu0 %v3755_v36  ;;  %v4915_v31 = vld [vmem:[#allocation21_spill] sm:$0xff]  ;;  %v4918_v36 = vld [vmem:[#allocation24_spill] sm:$0xff] }
 0x17c   :  { %1259 = vmatprep.subr.bf16.mxu1 %v3749_v33  ;;  %2925 = vmatprep.subr.bf16.mxu0 %v4909_v23  ;;  %v4916_v33 = vld [vmem:[#allocation20_spill] sm:$0xff] }
 0x17f   :  { %1260 = vmatpush1.bf16.msra.mxu1 %v3751_v35  ;;  %2926 = vmatpush3.bf16.msra.mxu0 %v3771_v40  ;;  %v4917_v35 = vld [vmem:[#allocation22_spill] sm:$0xff]  ;;  %v4920_v40 = vld [vmem:[#allocation25_spill] sm:$0xff] }
 0x180   :  { %1261 = vmatprep.subr.bf16.mxu1 %v3759_v37  ;;  %2927 = vmatprep.subr.bf16.mxu0 %v4909_v23  ;;  %v4919_v37 = vld [vmem:[#allocation23_spill] sm:$0xff] }
 0x183   :  { %1262 = vmatpush1.bf16.msra.mxu1 %v3774_v41  ;;  %2928 = vmatpush3.bf16.msra.mxu0 %v3783_v44  ;;  %v4921_v41 = vld [vmem:[#allocation27_spill] sm:$0xff] }
 0x184   :  { %1263 = vmatprep.subr.bf16.mxu1 %v3778_v43  ;;  %2929 = vmatprep.subr.bf16.mxu0 %v4909_v23  ;;  %v4922_v43 = vld [vmem:[#allocation26_spill] sm:$0xff] }
 0x187   :  { %1264 = vmatpush1.bf16.msra.mxu1 %v4911_v18  ;;  %2930 = vmatpush3.bf16.msra.mxu0 %v4912_v24 }
 0x188   :  { %1265 = vmatprep.subr.bf16.mxu1 %v4913_v25  ;;  %2931 = vmatprep.subr.bf16.mxu0 %v4909_v23 }
 0x18b   :  { %1266 = vmatpush1.bf16.msra.mxu1 %v4914_v30  ;;  %2932 = vmatpush3.bf16.msra.mxu0 %v4915_v31 }
 0x18c   :  { %1267 = vmatprep.subr.bf16.mxu1 %v4916_v33  ;;  %2933 = vmatprep.subr.bf16.mxu0 %v4909_v23 }
 0x18f   :  { %1268 = vmatpush1.bf16.msra.mxu1 %v4917_v35  ;;  %2934 = vmatpush3.bf16.msra.mxu0 %v4918_v36 }
 0x190   :  { %1269 = vmatprep.subr.bf16.mxu1 %v4919_v37  ;;  %2935 = vmatprep.subr.bf16.mxu0 %v4909_v23 }
 0x193   :  { %1270 = vmatpush1.bf16.msra.mxu1 %v4920_v40  ;;  %2936 = vmatpush3.bf16.msra.mxu0 %v4921_v41 }
 0x194   :  { %1358 = vmatprep.subr.bf16.mxu1 %v4922_v43  ;;  %2941 = vmatprep.subr.bf16.mxu0 %v4909_v23 }
 0x216   :  { %v1079_v44 = vpop.f32.mrf.mxu1  ;;  %v1120_v19 = vpop.f32.mrf.mxu0 }
 0x217   :  { %v1126_v56 = vadd.f32 %v1079_v44, %v4923_v27  ;;  %v1140_v54 = vadd.f32 %v4115_v32, %v1120_v19 }
 0x218   :  { %v1081_v52 = vpop.f32.mrf.mxu1  ;;  %v2899_v55 = vpop.f32.mrf.mxu0 }
 0x219   :  { %v2639_v28 = vmul.f32 -1.442695, %v1126_v56  ;;  %v1133_v47 = vadd.f32 %v1081_v52, %v4924_v45 }
 0x21a   :  { %v1083_v49 = vpop.f32.mrf.mxu1  ;;  %v1123_v42 = vpop.f32.mrf.mxu0 }
 0x21b   :  { %3267 = vpow2.f32 %v2639_v28  ;;  %v2640_v51 = vmul.f32 -1.442695, %v1133_v47  ;;  %v4926_v42 = vld [vmem:[#allocation38_spill] sm:$0xff]  ;;  %v4927_v47 = vld [vmem:[#allocation69_spill] sm:$0xff] }
 0x21c   :  { %v1084_v20 = vpop.f32.mrf.mxu1  ;;  %v2900_v59 = vpop.f32.mrf.mxu0 }
 0x21d   :  { %3269 = vpow2.f32 %v2640_v51 }
 0x228   :  { %v3268_v38 = vpop.eup %3267 }
 0x229   :  { %v1130_v22 = vadd.f32 1.0, %v3268_v38 }
 0x22a   :  { %v3270_v53 = vpop.eup %3269 }
 0x22b   :  { %3271 = vrcp.f32 %v1130_v22  ;;  %v1137_v39 = vadd.f32 1.0, %v3270_v53 }
 0x22d   :  { %3273 = vrcp.f32 %v1137_v39 }
 0x236   :  { %v1182_v26 = vpop.f32.mrf.mxu1  ;;  %v1223_v48 = vpop.f32.mrf.mxu0 }
 0x237   :  { %v1229_v34 = vadd.f32 %v1182_v26, %v4925_v50 }
 0x238   :  { %v3272_v44 = vpop.eup %3271  ;;  %v1184_v27 = vpop.f32.mrf.mxu1 }
 0x239   :  { %v2919_v56 = vpop.f32.mrf.mxu0  ;;  %v1141_v55 = vmul.f32 %v3272_v44, %v1140_v54  ;;  %v2641_v28 = vmul.f32 -1.442695, %v1229_v34  ;;  %v1236_v51 = vadd.f32 %v1184_v27, %v4927_v47  ;;  %v4931_v47 = vld [vmem:[#allocation66_spill] sm:$0xff] }
 0x23a   :  { %v1186_v52 = vpop.f32.mrf.mxu1  ;;  %v3274_v19 = vpop.eup %3273  ;;  %v1243_v56 = vadd.f32 %v4129_v21, %v1223_v48 }
 0x23b   :  { %v1226_v49 = vpop.f32.mrf.mxu0  ;;  %v1142_v20 = vadd.f32 %v1141_v55, %v4926_v42  ;;  %3275 = vpow2.f32 %v2641_v28  ;;  %v2642_v38 = vmul.f32 -1.442695, %v1236_v51  ;;  %v1144_v26 = vsub.f32 1.0, %v3274_v19  ;;  %v4930_v28 = vld [vmem:[#allocation37_spill] sm:$0xff] }
 0x23c   :  { %v1187_v59 = vpop.f32.mrf.mxu1  ;;  %v1146_v54 = vmul.f32 %v3274_v19, %v4122_v29 }
 0x23d   :  { %v2920_v45 = vpop.f32.mrf.mxu0  ;;  %3277 = vtanh.f32 %v1142_v20 }
 0x23e   :  { %3279 = vpow2.f32 %v2642_v38 }
 0x248   :  { %v3276_v22 = vpop.eup %3275 }
 0x249   :  { %v1233_v53 = vadd.f32 1.0, %v3276_v22 }
 0x24a   :  { %v3278_v50 = vpop.eup %3277 }
 0x24b   :  { %3281 = vrcp.f32 %v1233_v53  ;;  %v1145_v39 = vmul.f32 %v3278_v50, %v1144_v26  ;;  %v3280_v27 = vpop.eup %3279 }
 0x24c   :  { %v1240_v29 = vadd.f32 1.0, %v3280_v27 }
 0x24d   :  { %v4215_v34 = vadd.f32 %v1146_v54, %v1145_v39  ;;  %v4932_v54 = vld [vmem:[#allocation34_spill] sm:$0xff] }
 0x24e   :  { %3283 = vrcp.f32 %v1240_v29 }
 0x24f   :  { %v1251_v44 = vpack.c.bf16 %v4215_v34, %v4215_v34 }
 0x251   :  { %1252 = vst [vmem:[#allocation9 + $0x4] sm:$0xf] %v1251_v44  ;;  %1288 = vmatmul.mubr.bf16.vlgmr.msra.gmra.mxu1 %v1251_v44  ;;  %2938 = vmatmul.mubr.bf16.vlgmr.msra.gmra.mxu0 %v1251_v44 }
 0x252   :  { %1359 = vmatpush1.bf16.msra.mxu1 %v3832_v57  ;;  %2942 = vmatpush3.bf16.msra.mxu0 %v3840_v60  ;;  %v4928_v60 = vld [vmem:[#allocation59_spill] sm:$0xff] }
 0x253   :  { %1360 = vmatprep.subr.bf16.mxu1 %v3836_v58  ;;  %2943 = vmatprep.subr.bf16.mxu0 %v4909_v23 }
 0x254   :  { %1390 = vmatprep.mubr.bf16.mxu1 %v4910_v46  ;;  %2957 = vmatprep.mubr.msk.bf16.mxu0 %vm3587_vm1, %v4909_v23 }
 0x256   :  { %1361 = vmatpush1.bf16.msra.mxu1 %v3843_v61  ;;  %2944 = vmatpush3.bf16.msra.mxu0 %v3852_v63 }
 0x257   :  { %1362 = vmatprep.subr.bf16.mxu1 %v3847_v62  ;;  %2945 = vmatprep.subr.bf16.mxu0 %v4909_v23 }
 0x258   :  { %v3282_v57 = vpop.eup %3281 }
 0x259   :  { %v1244_v58 = vmul.f32 %v3282_v57, %v1243_v56  ;;  %v4933_v56 = vld [vmem:[#allocation67_spill] sm:$0xff] }
 0x25a   :  { %1363 = vmatpush1.bf16.msra.mxu1 %v3857_v1  ;;  %2946 = vmatpush3.bf16.msra.mxu0 %v3864_v3 }
 0x25b   :  { %v1245_v55 = vadd.f32 %v1244_v58, %v4928_v60  ;;  %1364 = vmatprep.subr.bf16.mxu1 %v3861_v2  ;;  %2947 = vmatprep.subr.bf16.mxu0 %v4909_v23  ;;  %v3284_v61 = vpop.eup %3283 }
 0x25c   :  { %v1247_v62 = vsub.f32 1.0, %v3284_v61  ;;  %v1249_v2 = vmul.f32 %v3284_v61, %v4165_v0 }
 0x25d   :  { %3285 = vtanh.f32 %v1245_v55 }
 0x25e   :  { %1365 = vmatpush1.bf16.msra.mxu1 %v3867_v4  ;;  %2948 = vmatpush3.bf16.msra.mxu0 %v3874_v6  ;;  %v4263_v6 = vld [vmem:[#allocation4 + $0xa8] ss:$12 sps:$4 sm:$0xff]  }
 0x25f   :  { %1366 = vmatprep.subr.bf16.mxu1 %v3871_v5  ;;  %2949 = vmatprep.subr.bf16.mxu0 %v4909_v23  ;;  %v4259_v5 = vld [vmem:[#allocation4 + $0xac] ss:$12 sps:$4 sm:$0xff]  }
 0x262   :  { %1367 = vmatpush1.bf16.msra.mxu1 %v3877_v7  ;;  %2950 = vmatpush3.bf16.msra.mxu0 %v3884_v9  ;;  %v4266_v7 = vld [vmem:[#allocation4 + $0xb0] ss:$12 sps:$4 sm:$0xff]  }
 0x263   :  { %1368 = vmatprep.subr.bf16.mxu1 %v3881_v8  ;;  %2951 = vmatprep.subr.bf16.mxu0 %v4909_v23  ;;  %v4269_v8 = vld [vmem:[#allocation4 + $0x94] ss:$12 sps:$4 sm:$0xff]   ;;  %v4276_v9 = vld [vmem:[#allocation4 + $0x90] ss:$12 sps:$4 sm:$0xff]  }
 0x266   :  { %1369 = vmatpush1.bf16.msra.mxu1 %v3887_v10  ;;  %2952 = vmatpush3.bf16.msra.mxu0 %v3894_v12  ;;  %v4279_v10 = vld [vmem:[#allocation4 + $0x98] ss:$12 sps:$4 sm:$0xff]  }
 0x267   :  { %1370 = vmatprep.subr.bf16.mxu1 %v3891_v11  ;;  %2953 = vmatprep.subr.bf16.mxu0 %v4909_v23  ;;  %v4282_v11 = vld [vmem:[#allocation4 + $0x7c] ss:$12 sps:$4 sm:$0xff]   ;;  %v4286_v12 = vld [vmem:[#allocation4 + $0x78] ss:$12 sps:$4 sm:$0xff]  }
 0x26a   :  { %v3286_v63 = vpop.eup %3285  ;;  %1371 = vmatpush1.bf16.msra.mxu1 %v3897_v13  ;;  %2954 = vmatpush3.bf16.msra.mxu0 %v3904_v15  ;;  %v4289_v13 = vld [vmem:[#allocation4 + $0x80] ss:$12 sps:$4 sm:$0xff]  }
 0x26b   :  { %1372 = vmatprep.subr.bf16.mxu1 %v3901_v14  ;;  %2955 = vmatprep.subr.bf16.mxu0 %v4909_v23  ;;  %v1248_v1 = vmul.f32 %v3286_v63, %v1247_v62  ;;  %v4292_v14 = vld [vmem:[#allocation4 + $0x64] ss:$12 sps:$4 sm:$0xff]   ;;  %v4296_v15 = vld [vmem:[#allocation4 + $0x60] ss:$12 sps:$4 sm:$0xff]  }
 0x26d   :  { %v4253_v3 = vadd.f32 %v1249_v2, %v1248_v1 }
 0x26e   :  { %1373 = vmatpush1.bf16.msra.mxu1 %v3907_v16  ;;  %2956 = vmatpush3.bf16.msra.mxu0 %v3912_v17  ;;  %v4299_v16 = vld [vmem:[#allocation4 + $0x68] ss:$12 sps:$4 sm:$0xff]   ;;  %v4302_v17 = vld [vmem:[#allocation4 + $0x4c] ss:$12 sps:$4 sm:$0xff]  }
 0x26f   :  { %v1253_v4 = vpack.c.bf16 %v4253_v3, %v4253_v3  ;;  %1465 = vmatprep.subr.bf16.mxu1 %v4259_v5  ;;  %2961 = vmatprep.subr.bf16.mxu0 %v4909_v23 }
 0x271   :  { %1254 = vst [vmem:[#allocation10 + $0x18] sm:$0xf] %v1253_v4  ;;  %1391 = vmatmul.mubr.bf16.vlgmr.msra.gmra.mxu1 %v1253_v4  ;;  %2958 = vmatmul.mubr.bf16.vlgmr.msra.gmra.mxu0 %v1253_v4 }
 0x272   :  { %1466 = vmatpush1.bf16.msra.mxu1 %v4263_v6  ;;  %2962 = vmatpush3.bf16.msra.mxu0 %v4266_v7 }
 0x273   :  { %1467 = vmatprep.subr.bf16.mxu1 %v4269_v8  ;;  %2963 = vmatprep.subr.bf16.mxu0 %v4909_v23 }
 0x274   :  { %1497 = vmatprep.mubr.bf16.mxu1 %v4910_v46  ;;  %2977 = vmatprep.mubr.msk.bf16.mxu0 %vm3587_vm1, %v4909_v23 }
 0x276   :  { %1468 = vmatpush1.bf16.msra.mxu1 %v4276_v9  ;;  %2964 = vmatpush3.bf16.msra.mxu0 %v4279_v10 }
 0x277   :  { %1469 = vmatprep.subr.bf16.mxu1 %v4282_v11  ;;  %2965 = vmatprep.subr.bf16.mxu0 %v4909_v23 }
 0x27a   :  { %1470 = vmatpush1.bf16.msra.mxu1 %v4286_v12  ;;  %2966 = vmatpush3.bf16.msra.mxu0 %v4289_v13 }
 0x27b   :  { %1471 = vmatprep.subr.bf16.mxu1 %v4292_v14  ;;  %2967 = vmatprep.subr.bf16.mxu0 %v4909_v23 }
 0x27e   :  { %1472 = vmatpush1.bf16.msra.mxu1 %v4296_v15  ;;  %2968 = vmatpush3.bf16.msra.mxu0 %v4299_v16 }
 0x27f   :  { %1473 = vmatprep.subr.bf16.mxu1 %v4302_v17  ;;  %2969 = vmatprep.subr.bf16.mxu0 %v4909_v23 }
 0x282   :  { %1474 = vmatpush1.bf16.msra.mxu1 %v4911_v18  ;;  %2970 = vmatpush3.bf16.msra.mxu0 %v4912_v24  ;;  %v4929_v24 = vld [vmem:[#allocation35_spill] sm:$0xff] }
 0x283   :  { %1475 = vmatprep.subr.bf16.mxu1 %v4913_v25  ;;  %2971 = vmatprep.subr.bf16.mxu0 %v4909_v23 }
 0x286   :  { %1476 = vmatpush1.bf16.msra.mxu1 %v4914_v30  ;;  %2972 = vmatpush3.bf16.msra.mxu0 %v4915_v31 }
 0x287   :  { %1477 = vmatprep.subr.bf16.mxu1 %v4916_v33  ;;  %2973 = vmatprep.subr.bf16.mxu0 %v4909_v23 }
 0x28a   :  { %1478 = vmatpush1.bf16.msra.mxu1 %v4917_v35  ;;  %2974 = vmatpush3.bf16.msra.mxu0 %v4918_v36 }
 0x28b   :  { %1479 = vmatprep.subr.bf16.mxu1 %v4919_v37  ;;  %2975 = vmatprep.subr.bf16.mxu0 %v4909_v23 }
 0x28e   :  { %1480 = vmatpush1.bf16.msra.mxu1 %v4920_v40  ;;  %2976 = vmatpush3.bf16.msra.mxu0 %v4921_v41 }
 0x28f   :  { %1568 = vmatprep.subr.bf16.mxu1 %v4922_v43  ;;  %2981 = vmatprep.subr.bf16.mxu0 %v4909_v23 }
 0x311   :  { %v1289_v0 = vpop.f32.mrf.mxu1  ;;  %v1330_v18 = vpop.f32.mrf.mxu0 }
 0x312   :  { %v1336_v25 = vadd.f32 %v1289_v0, %v4929_v24  ;;  %v1350_v45 = vadd.f32 %v4115_v32, %v1330_v18  ;;  %v4333_v24 = vld [vmem:[#allocation7 + $0xa8] ss:$12 sps:$4 sm:$0xff]  }
 0x313   :  { %v1291_v30 = vpop.f32.mrf.mxu1  ;;  %v2939_v31 = vpop.f32.mrf.mxu0 }
 0x314   :  { %v2643_v33 = vmul.f32 -1.442695, %v1336_v25  ;;  %v1343_v40 = vadd.f32 %v1291_v30, %v4930_v28  ;;  %v4336_v25 = vld [vmem:[#allocation7 + $0xb0] ss:$12 sps:$4 sm:$0xff]   ;;  %v4339_v30 = vld [vmem:[#allocation7 + $0x94] ss:$12 sps:$4 sm:$0xff]  }
 0x315   :  { %v1293_v35 = vpop.f32.mrf.mxu1  ;;  %v1333_v36 = vpop.f32.mrf.mxu0  ;;  %v4346_v31 = vld [vmem:[#allocation7 + $0x90] ss:$12 sps:$4 sm:$0xff]   ;;  %v4357_v28 = vld [vmem:[#allocation7 + $0x78] ss:$12 sps:$4 sm:$0xff]  }
 0x316   :  { %3287 = vpow2.f32 %v2643_v33  ;;  %v2644_v52 = vmul.f32 -1.442695, %v1343_v40  ;;  %v4349_v33 = vld [vmem:[#allocation7 + $0x98] ss:$12 sps:$4 sm:$0xff]   ;;  %v4353_v36 = vld [vmem:[#allocation7 + $0x7c] ss:$12 sps:$4 sm:$0xff]  }
 0x317   :  { %v1294_v37 = vpop.f32.mrf.mxu1  ;;  %v2940_v48 = vpop.f32.mrf.mxu0  ;;  %v4360_v40 = vld [vmem:[#allocation7 + $0x80] ss:$12 sps:$4 sm:$0xff]  }
 0x318   :  { %3289 = vpow2.f32 %v2644_v52  ;;  %v4934_v52 = vld [vmem:[#allocation64_spill] sm:$0xff] }
 0x323   :  { %v3288_v41 = vpop.eup %3287 }
 0x324   :  { %v1340_v43 = vadd.f32 1.0, %v3288_v41 }
 0x325   :  { %v3290_v49 = vpop.eup %3289 }
 0x326   :  { %3291 = vrcp.f32 %v1340_v43  ;;  %v1347_v42 = vadd.f32 1.0, %v3290_v49  ;;  %v4364_v43 = vld [vmem:[#allocation7 + $0x64] ss:$12 sps:$4 sm:$0xff]   ;;  %v4368_v49 = vld [vmem:[#allocation7 + $0x60] ss:$12 sps:$4 sm:$0xff]  }
 0x328   :  { %3293 = vrcp.f32 %v1347_v42  ;;  %v4371_v42 = vld [vmem:[#allocation7 + $0x68] ss:$12 sps:$4 sm:$0xff]  }
 0x331   :  { %v1392_v20 = vpop.f32.mrf.mxu1  ;;  %v1433_v59 = vpop.f32.mrf.mxu0 }
 0x332   :  { %v1439_v51 = vadd.f32 %v1392_v20, %v4931_v47  ;;  %v1453_v35 = vadd.f32 %v4129_v21, %v1433_v59  ;;  %v4374_v20 = vld [vmem:[#allocation7 + $0x4c] ss:$12 sps:$4 sm:$0xff]   ;;  %v4378_v59 = vld [vmem:[#allocation7 + $0x48] ss:$12 sps:$4 sm:$0xff]  }
 0x333   :  { %v3292_v38 = vpop.eup %3291  ;;  %v1394_v19 = vpop.f32.mrf.mxu1  ;;  %v4384_v47 = vld [vmem:[#allocation7 + $0x34] ss:$12 sps:$4 sm:$0xff]  }
 0x334   :  { %v2959_v22 = vpop.f32.mrf.mxu0  ;;  %v1351_v53 = vmul.f32 %v3292_v38, %v1350_v45  ;;  %v2645_v26 = vmul.f32 -1.442695, %v1439_v51  ;;  %v1446_v57 = vadd.f32 %v1394_v19, %v4933_v56  ;;  %v4381_v45 = vld [vmem:[#allocation7 + $0x50] ss:$12 sps:$4 sm:$0xff]   ;;  %v4391_v19 = vld [vmem:[#allocation7 + $0x38] ss:$12 sps:$4 sm:$0xff]  }
 0x335   :  { %v1396_v50 = vpop.f32.mrf.mxu1  ;;  %v3294_v60 = vpop.eup %3293  ;;  %v4388_v38 = vld [vmem:[#allocation7 + $0x30] ss:$12 sps:$4 sm:$0xff]   ;;  %v4411_v56 = vld [vmem:[#allocation7] ss:$12 sps:$4 sm:$0xff]  }
 0x336   :  { %v1436_v39 = vpop.f32.mrf.mxu0  ;;  %v1352_v44 = vadd.f32 %v1351_v53, %v4932_v54  ;;  %3295 = vpow2.f32 %v2645_v26  ;;  %v2646_v58 = vmul.f32 -1.442695, %v1446_v57  ;;  %v1354_v62 = vsub.f32 1.0, %v3294_v60  ;;  %v4394_v22 = vld [vmem:[#allocation7 + $0x1c] ss:$12 sps:$4 sm:$0xff]  }
 0x337   :  { %v1397_v27 = vpop.f32.mrf.mxu1  ;;  %v1356_v2 = vmul.f32 %v3294_v60, %v4215_v34  ;;  %v4398_v50 = vld [vmem:[#allocation7 + $0x18] ss:$12 sps:$4 sm:$0xff]   ;;  %v4401_v39 = vld [vmem:[#allocation7 + $0x20] ss:$12 sps:$4 sm:$0xff]   ;;  %v4414_v57 = vld [vmem:[#allocation7 + $0x8] ss:$12 sps:$4 sm:$0xff]  }
 0x338   :  { %v2960_v29 = vpop.f32.mrf.mxu0  ;;  %3297 = vtanh.f32 %v1352_v44  ;;  %v4404_v54 = vld [vmem:[#allocation7 + $0x4] ss:$12 sps:$4 sm:$0xff]  }
 0x339   :  { %3299 = vpow2.f32 %v2646_v58  ;;  %v4443_v60 = vld [vmem:[#allocation4 + $0x50] ss:$12 sps:$4 sm:$0xff]  }
 0x33a   :  { %4935 = vst [vmem:[#allocation16_spill] sm:$0xff] %v4443_v60 }
 0x343   :  { %v3296_v55 = vpop.eup %3295 }
 0x344   :  { %v1443_v61 = vadd.f32 1.0, %v3296_v55  ;;  %v4446_v55 = vld [vmem:[#allocation4 + $0x34] ss:$12 sps:$4 sm:$0xff]  }
 0x345   :  { %v3298_v63 = vpop.eup %3297  ;;  %4936 = vst [vmem:[#allocation18_spill] sm:$0xff] %v4446_v55 }
 0x346   :  { %3301 = vrcp.f32 %v1443_v61  ;;  %v1355_v1 = vmul.f32 %v3298_v63, %v1354_v62  ;;  %v3300_v18 = vpop.eup %3299  ;;  %v4450_v61 = vld [vmem:[#allocation4 + $0x30] ss:$12 sps:$4 sm:$0xff]   ;;  %v4453_v62 = vld [vmem:[#allocation4 + $0x38] ss:$12 sps:$4 sm:$0xff]  }
 0x347   :  { %v1450_v34 = vadd.f32 1.0, %v3300_v18  ;;  %4937 = vst [vmem:[#allocation17_spill] sm:$0xff] %v4450_v61  ;;  %4938 = vst [vmem:[#allocation19_spill] sm:$0xff] %v4453_v62  ;;  %v4456_v63 = vld [vmem:[#allocation4 + $0x1c] ss:$12 sps:$4 sm:$0xff]  }
 0x348   :  { %v4329_v4 = vadd.f32 %v1356_v2, %v1355_v1  ;;  %4939 = vst [vmem:[#allocation21_spill] sm:$0xff] %v4456_v63  ;;  %v4460_v1 = vld [vmem:[#allocation4 + $0x18] ss:$12 sps:$4 sm:$0xff]   ;;  %v4463_v2 = vld [vmem:[#allocation4 + $0x20] ss:$12 sps:$4 sm:$0xff]  }
 0x349   :  { %3303 = vrcp.f32 %v1450_v34  ;;  %4940 = vst [vmem:[#allocation20_spill] sm:$0xff] %v4460_v1  ;;  %4941 = vst [vmem:[#allocation22_spill] sm:$0xff] %v4463_v2  ;;  %v4470_v18 = vld [vmem:[#allocation4] ss:$12 sps:$4 sm:$0xff]   ;;  %v4473_v34 = vld [vmem:[#allocation4 + $0x8] ss:$12 sps:$4 sm:$0xff]  }
 0x34a   :  { %v1461_v0 = vpack.c.bf16 %v4329_v4, %v4329_v4  ;;  %4943 = vst [vmem:[#allocation23_spill] sm:$0xff] %v4470_v18  ;;  %4944 = vst [vmem:[#allocation25_spill] sm:$0xff] %v4473_v34 }
 0x34c   :  { %1462 = vst [vmem:[#allocation9 + $0x8] sm:$0xf] %v1461_v0  ;;  %1498 = vmatmul.mubr.bf16.vlgmr.msra.gmra.mxu1 %v1461_v0  ;;  %2978 = vmatmul.mubr.bf16.vlgmr.msra.gmra.mxu0 %v1461_v0  ;;  %v4466_v0 = vld [vmem:[#allocation4 + $0x4] ss:$12 sps:$4 sm:$0xff]  }
 0x34d   :  { %1569 = vmatpush1.bf16.msra.mxu1 %v4333_v24  ;;  %2982 = vmatpush3.bf16.msra.mxu0 %v4336_v25  ;;  %4942 = vst [vmem:[#allocation24_spill] sm:$0xff] %v4466_v0 }
 0x34e   :  { %1570 = vmatprep.subr.bf16.mxu1 %v4339_v30  ;;  %2983 = vmatprep.subr.bf16.mxu0 %v4909_v23 }
 0x34f   :  { %1600 = vmatprep.mubr.bf16.mxu1 %v4910_v46  ;;  %2997 = vmatprep.mubr.msk.bf16.mxu0 %vm3587_vm1, %v4909_v23 }
 0x351   :  { %1571 = vmatpush1.bf16.msra.mxu1 %v4346_v31  ;;  %2984 = vmatpush3.bf16.msra.mxu0 %v4349_v33 }
 0x352   :  { %1572 = vmatprep.subr.bf16.mxu1 %v4353_v36  ;;  %2985 = vmatprep.subr.bf16.mxu0 %v4909_v23 }
 0x353   :  { %v3302_v37 = vpop.eup %3301 }
 0x354   :  { %v1454_v48 = vmul.f32 %v3302_v37, %v1453_v35  ;;  %v4476_v35 = vld [vmem:[#allocation7 + $0xac] ss:$12 sps:$4 sm:$0xff]  }
 0x355   :  { %1573 = vmatpush1.bf16.msra.mxu1 %v4357_v28  ;;  %2986 = vmatpush3.bf16.msra.mxu0 %v4360_v40  ;;  %4945 = vst [vmem:[#allocation27_spill] sm:$0xff] %v4476_v35 }
 0x356   :  { %v1455_v41 = vadd.f32 %v1454_v48, %v4934_v52  ;;  %1574 = vmatprep.subr.bf16.mxu1 %v4364_v43  ;;  %2987 = vmatprep.subr.bf16.mxu0 %v4909_v23  ;;  %v3304_v51 = vpop.eup %3303  ;;  %v4946_v52 = vld [vmem:[#allocation39_spill] sm:$0xff] }
 0x357   :  { %v1457_v53 = vsub.f32 1.0, %v3304_v51  ;;  %v1459_v27 = vmul.f32 %v3304_v51, %v4253_v3  ;;  %v4440_v3 = vld [vmem:[#allocation4 + $0x48] ss:$12 sps:$4 sm:$0xff]  }
 0x358   :  { %3305 = vtanh.f32 %v1455_v41 }
 0x359   :  { %1575 = vmatpush1.bf16.msra.mxu1 %v4368_v49  ;;  %2988 = vmatpush3.bf16.msra.mxu0 %v4371_v42 }
 0x35a   :  { %1576 = vmatprep.subr.bf16.mxu1 %v4374_v20  ;;  %2989 = vmatprep.subr.bf16.mxu0 %v4909_v23 }
 0x35d   :  { %1577 = vmatpush1.bf16.msra.mxu1 %v4378_v59  ;;  %2990 = vmatpush3.bf16.msra.mxu0 %v4381_v45 }
 0x35e   :  { %1578 = vmatprep.subr.bf16.mxu1 %v4384_v47  ;;  %2991 = vmatprep.subr.bf16.mxu0 %v4909_v23 }
 0x361   :  { %1579 = vmatpush1.bf16.msra.mxu1 %v4388_v38  ;;  %2992 = vmatpush3.bf16.msra.mxu0 %v4391_v19 }
 0x362   :  { %1580 = vmatprep.subr.bf16.mxu1 %v4394_v22  ;;  %2993 = vmatprep.subr.bf16.mxu0 %v4909_v23 }
 0x365   :  { %v3306_v26 = vpop.eup %3305  ;;  %1581 = vmatpush1.bf16.msra.mxu1 %v4398_v50  ;;  %2994 = vmatpush3.bf16.msra.mxu0 %v4401_v39 }
 0x366   :  { %1582 = vmatprep.subr.bf16.mxu1 %v4404_v54  ;;  %2995 = vmatprep.subr.bf16.mxu0 %v4909_v23  ;;  %v1458_v44 = vmul.f32 %v3306_v26, %v1457_v53 }
 0x368   :  { %v4409_v29 = vadd.f32 %v1459_v27, %v1458_v44 }
 0x369   :  { %1583 = vmatpush1.bf16.msra.mxu1 %v4411_v56  ;;  %2996 = vmatpush3.bf16.msra.mxu0 %v4414_v57 }
 0x36a   :  { %v1463_v58 = vpack.c.bf16 %v4409_v29, %v4409_v29  ;;  %1675 = vmatprep.subr.bf16.mxu1 %v4259_v5  ;;  %3001 = vmatprep.subr.bf16.mxu0 %v4909_v23 }
 0x36c   :  { %1464 = vst [vmem:[#allocation10 + $0x14] sm:$0xf] %v1463_v58  ;;  %1601 = vmatmul.mubr.bf16.vlgmr.msra.gmra.mxu1 %v1463_v58  ;;  %2998 = vmatmul.mubr.bf16.vlgmr.msra.gmra.mxu0 %v1463_v58 }
 0x36d   :  { %1676 = vmatpush1.bf16.msra.mxu1 %v4263_v6  ;;  %3002 = vmatpush3.bf16.msra.mxu0 %v4266_v7 }
 0x36e   :  { %1677 = vmatprep.subr.bf16.mxu1 %v4269_v8  ;;  %3003 = vmatprep.subr.bf16.mxu0 %v4909_v23 }
 0x36f   :  { %1707 = vmatprep.mubr.bf16.mxu1 %v4910_v46  ;;  %3017 = vmatprep.mubr.msk.bf16.mxu0 %vm3587_vm1, %v4909_v23 }
 0x371   :  { %1678 = vmatpush1.bf16.msra.mxu1 %v4276_v9  ;;  %3004 = vmatpush3.bf16.msra.mxu0 %v4279_v10 }
 0x372   :  { %1679 = vmatprep.subr.bf16.mxu1 %v4282_v11  ;;  %3005 = vmatprep.subr.bf16.mxu0 %v4909_v23 }
 0x375   :  { %1680 = vmatpush1.bf16.msra.mxu1 %v4286_v12  ;;  %3006 = vmatpush3.bf16.msra.mxu0 %v4289_v13 }
 0x376   :  { %1681 = vmatprep.subr.bf16.mxu1 %v4292_v14  ;;  %3007 = vmatprep.subr.bf16.mxu0 %v4909_v23 }
 0x379   :  { %1682 = vmatpush1.bf16.msra.mxu1 %v4296_v15  ;;  %3008 = vmatpush3.bf16.msra.mxu0 %v4299_v16 }
 0x37a   :  { %1683 = vmatprep.subr.bf16.mxu1 %v4302_v17  ;;  %3009 = vmatprep.subr.bf16.mxu0 %v4909_v23 }
 0x37d   :  { %1684 = vmatpush1.bf16.msra.mxu1 %v4440_v3  ;;  %3010 = vmatpush3.bf16.msra.mxu0 %v4443_v60 }
 0x37e   :  { %1685 = vmatprep.subr.bf16.mxu1 %v4446_v55  ;;  %3011 = vmatprep.subr.bf16.mxu0 %v4909_v23 }
 0x381   :  { %1686 = vmatpush1.bf16.msra.mxu1 %v4450_v61  ;;  %3012 = vmatpush3.bf16.msra.mxu0 %v4453_v62 }
 0x382   :  { %1687 = vmatprep.subr.bf16.mxu1 %v4456_v63  ;;  %3013 = vmatprep.subr.bf16.mxu0 %v4909_v23 }
 0x385   :  { %1688 = vmatpush1.bf16.msra.mxu1 %v4460_v1  ;;  %3014 = vmatpush3.bf16.msra.mxu0 %v4463_v2 }
 0x386   :  { %1689 = vmatprep.subr.bf16.mxu1 %v4466_v0  ;;  %3015 = vmatprep.subr.bf16.mxu0 %v4909_v23  ;;  %v4947_v0 = vld [vmem:[#allocation41_spill] sm:$0xff] }
 0x389   :  { %1690 = vmatpush1.bf16.msra.mxu1 %v4470_v18  ;;  %3016 = vmatpush3.bf16.msra.mxu0 %v4473_v34 }
 0x38a   :  { %1778 = vmatprep.subr.bf16.mxu1 %v4476_v35  ;;  %3021 = vmatprep.subr.bf16.mxu0 %v4909_v23 }
 0x40c   :  { %v1499_v37 = vpop.f32.mrf.mxu1  ;;  %v1540_v48 = vpop.f32.mrf.mxu0 }
 0x40d   :  { %v1546_v41 = vadd.f32 %v1499_v37, %v4946_v52  ;;  %v1560_v37 = vadd.f32 %v4115_v32, %v1540_v48  ;;  %v4948_v52 = vld [vmem:[#allocation63_spill] sm:$0xff] }
 0x40e   :  { %v1501_v51 = vpop.f32.mrf.mxu1  ;;  %v2979_v53 = vpop.f32.mrf.mxu0 }
 0x40f   :  { %v2647_v26 = vmul.f32 -1.442695, %v1546_v41  ;;  %v1553_v34 = vadd.f32 %v1501_v51, %v4947_v0 }
 0x410   :  { %v1503_v44 = vpop.f32.mrf.mxu1  ;;  %v1543_v27 = vpop.f32.mrf.mxu0 }
 0x411   :  { %3307 = vpow2.f32 %v2647_v26  ;;  %v2648_v2 = vmul.f32 -1.442695, %v1553_v34 }
 0x412   :  { %v1504_v58 = vpop.f32.mrf.mxu1  ;;  %v2980_v18 = vpop.f32.mrf.mxu0 }
 0x413   :  { %3309 = vpow2.f32 %v2648_v2  ;;  %v4949_v2 = vld [vmem:[#allocation36_spill] sm:$0xff] }
 0x41e   :  { %v3308_v1 = vpop.eup %3307 }
 0x41f   :  { %v1550_v35 = vadd.f32 1.0, %v3308_v1 }
 0x420   :  { %v3310_v63 = vpop.eup %3309 }
 0x421   :  { %3311 = vrcp.f32 %v1550_v35  ;;  %v1557_v62 = vadd.f32 1.0, %v3310_v63  ;;  %v4950_v63 = vld [vmem:[#allocation65_spill] sm:$0xff] }
 0x423   :  { %3313 = vrcp.f32 %v1557_v62 }
 0x42c   :  { %v1602_v61 = vpop.f32.mrf.mxu1  ;;  %v1643_v55 = vpop.f32.mrf.mxu0 }
 0x42d   :  { %v1649_v41 = vadd.f32 %v1602_v61, %v4948_v52 }
 0x42e   :  { %v3312_v53 = vpop.eup %3311  ;;  %v1604_v44 = vpop.f32.mrf.mxu1 }
 0x42f   :  { %v2999_v26 = vpop.f32.mrf.mxu0  ;;  %v1561_v27 = vmul.f32 %v3312_v53, %v1560_v37  ;;  %v2649_v18 = vmul.f32 -1.442695, %v1649_v41  ;;  %v1656_v58 = vadd.f32 %v1604_v44, %v4950_v63 }
 0x430   :  { %v1606_v0 = vpop.f32.mrf.mxu1  ;;  %v3314_v32 = vpop.eup %3313 }
 0x431   :  { %v1646_v34 = vpop.f32.mrf.mxu0  ;;  %v1562_v51 = vadd.f32 %v1561_v27, %v4949_v2  ;;  %3315 = vpow2.f32 %v2649_v18  ;;  %v2650_v60 = vmul.f32 -1.442695, %v1656_v58  ;;  %v1564_v52 = vsub.f32 1.0, %v3314_v32  ;;  %v4951_v0 = vld [vmem:[#allocation61_spill] sm:$0xff]  ;;  %v4953_v58 = vld [vmem:[#allocation18_spill] sm:$0xff] }
 0x432   :  { %v1607_v1 = vpop.f32.mrf.mxu1  ;;  %v1566_v37 = vmul.f32 %v3314_v32, %v4329_v4  ;;  %v4954_v32 = vld [vmem:[#allocation17_spill] sm:$0xff] }
 0x433   :  { %v3000_v35 = vpop.f32.mrf.mxu0  ;;  %3317 = vtanh.f32 %v1562_v51 }
 0x434   :  { %3319 = vpow2.f32 %v2650_v60  ;;  %v1663_v60 = vadd.f32 %v4129_v21, %v1643_v55 }
 0x43e   :  { %v3316_v61 = vpop.eup %3315 }
 0x43f   :  { %v1653_v48 = vadd.f32 1.0, %v3316_v61  ;;  %v4955_v61 = vld [vmem:[#allocation19_spill] sm:$0xff] }
 0x440   :  { %v3318_v26 = vpop.eup %3317 }
 0x441   :  { %3321 = vrcp.f32 %v1653_v48  ;;  %v1565_v62 = vmul.f32 %v3318_v26, %v1564_v52  ;;  %v3320_v44 = vpop.eup %3319  ;;  %v4956_v48 = vld [vmem:[#allocation21_spill] sm:$0xff]  ;;  %v4957_v52 = vld [vmem:[#allocation20_spill] sm:$0xff]  ;;  %v4958_v26 = vld [vmem:[#allocation22_spill] sm:$0xff] }
 0x442   :  { %v1660_v4 = vadd.f32 1.0, %v3320_v44  ;;  %v4962_v44 = vld [vmem:[#allocation27_spill] sm:$0xff] }
 0x443   :  { %v4487_v41 = vadd.f32 %v1566_v37, %v1565_v62  ;;  %v4959_v62 = vld [vmem:[#allocation24_spill] sm:$0xff]  ;;  %v4960_v37 = vld [vmem:[#allocation23_spill] sm:$0xff] }
 0x444   :  { %3323 = vrcp.f32 %v1660_v4 }
 0x445   :  { %v1671_v53 = vpack.c.bf16 %v4487_v41, %v4487_v41 }
 0x447   :  { %1672 = vst [vmem:[#allocation9 + $0xc] sm:$0xf] %v1671_v53  ;;  %1708 = vmatmul.mubr.bf16.vlgmr.msra.gmra.mxu1 %v1671_v53  ;;  %3018 = vmatmul.mubr.bf16.vlgmr.msra.gmra.mxu0 %v1671_v53  ;;  %v4961_v53 = vld [vmem:[#allocation25_spill] sm:$0xff] }
 0x448   :  { %1779 = vmatpush1.bf16.msra.mxu1 %v4333_v24  ;;  %3022 = vmatpush3.bf16.msra.mxu0 %v4336_v25 }
 0x449   :  { %1780 = vmatprep.subr.bf16.mxu1 %v4339_v30  ;;  %3023 = vmatprep.subr.bf16.mxu0 %v4909_v23 }
 0x44a   :  { %1810 = vmatprep.mubr.bf16.mxu1 %v4910_v46  ;;  %3037 = vmatprep.mubr.msk.bf16.mxu0 %vm3587_vm1, %v4909_v23 }
 0x44c   :  { %1781 = vmatpush1.bf16.msra.mxu1 %v4346_v31  ;;  %3024 = vmatpush3.bf16.msra.mxu0 %v4349_v33 }
 0x44d   :  { %1782 = vmatprep.subr.bf16.mxu1 %v4353_v36  ;;  %3025 = vmatprep.subr.bf16.mxu0 %v4909_v23 }
 0x44e   :  { %v3322_v27 = vpop.eup %3321 }
 0x44f   :  { %v1664_v18 = vmul.f32 %v3322_v27, %v1663_v60  ;;  %v4963_v27 = vld [vmem:[#allocation43_spill] sm:$0xff] }
 0x450   :  { %1783 = vmatpush1.bf16.msra.mxu1 %v4357_v28  ;;  %3026 = vmatpush3.bf16.msra.mxu0 %v4360_v40 }
 0x451   :  { %v1665_v34 = vadd.f32 %v1664_v18, %v4951_v0  ;;  %1784 = vmatprep.subr.bf16.mxu1 %v4364_v43  ;;  %3027 = vmatprep.subr.bf16.mxu0 %v4909_v23  ;;  %v3324_v21 = vpop.eup %3323 }
 0x452   :  { %v1667_v55 = vsub.f32 1.0, %v3324_v21  ;;  %v1669_v1 = vmul.f32 %v3324_v21, %v4409_v29  ;;  %v4952_v29 = vld [vmem:[#allocation16_spill] sm:$0xff] }
 0x453   :  { %3325 = vtanh.f32 %v1665_v34 }
 0x454   :  { %1785 = vmatpush1.bf16.msra.mxu1 %v4368_v49  ;;  %3028 = vmatpush3.bf16.msra.mxu0 %v4371_v42 }
 0x455   :  { %1786 = vmatprep.subr.bf16.mxu1 %v4374_v20  ;;  %3029 = vmatprep.subr.bf16.mxu0 %v4909_v23 }
 0x458   :  { %1787 = vmatpush1.bf16.msra.mxu1 %v4378_v59  ;;  %3030 = vmatpush3.bf16.msra.mxu0 %v4381_v45 }
 0x459   :  { %1788 = vmatprep.subr.bf16.mxu1 %v4384_v47  ;;  %3031 = vmatprep.subr.bf16.mxu0 %v4909_v23 }
 0x45c   :  { %1789 = vmatpush1.bf16.msra.mxu1 %v4388_v38  ;;  %3032 = vmatpush3.bf16.msra.mxu0 %v4391_v19 }
 0x45d   :  { %1790 = vmatprep.subr.bf16.mxu1 %v4394_v22  ;;  %3033 = vmatprep.subr.bf16.mxu0 %v4909_v23 }
 0x460   :  { %v3326_v2 = vpop.eup %3325  ;;  %1791 = vmatpush1.bf16.msra.mxu1 %v4398_v50  ;;  %3034 = vmatpush3.bf16.msra.mxu0 %v4401_v39 }
 0x461   :  { %1792 = vmatprep.subr.bf16.mxu1 %v4404_v54  ;;  %3035 = vmatprep.subr.bf16.mxu0 %v4909_v23  ;;  %v1668_v51 = vmul.f32 %v3326_v2, %v1667_v55 }
 0x463   :  { %v4525_v35 = vadd.f32 %v1669_v1, %v1668_v51 }
 0x464   :  { %1793 = vmatpush1.bf16.msra.mxu1 %v4411_v56  ;;  %3036 = vmatpush3.bf16.msra.mxu0 %v4414_v57 }
 0x465   :  { %v1673_v63 = vpack.c.bf16 %v4525_v35, %v4525_v35  ;;  %1885 = vmatprep.subr.bf16.mxu1 %v4259_v5  ;;  %3041 = vmatprep.subr.bf16.mxu0 %v4909_v23 }
 0x467   :  { %1674 = vst [vmem:[#allocation10 + $0x10] sm:$0xf] %v1673_v63  ;;  %1811 = vmatmul.mubr.bf16.vlgmr.msra.gmra.mxu1 %v1673_v63  ;;  %3038 = vmatmul.mubr.bf16.vlgmr.msra.gmra.mxu0 %v1673_v63  ;;  %v4964_v63 = vld [vmem:[#allocation45_spill] sm:$0xff] }
 0x468   :  { %1886 = vmatpush1.bf16.msra.mxu1 %v4263_v6  ;;  %3042 = vmatpush3.bf16.msra.mxu0 %v4266_v7 }
 0x469   :  { %1887 = vmatprep.subr.bf16.mxu1 %v4269_v8  ;;  %3043 = vmatprep.subr.bf16.mxu0 %v4909_v23 }
 0x46a   :  { %1917 = vmatprep.mubr.bf16.mxu1 %v4910_v46  ;;  %3057 = vmatprep.mubr.msk.bf16.mxu0 %vm3587_vm1, %v4909_v23 }
 0x46c   :  { %1888 = vmatpush1.bf16.msra.mxu1 %v4276_v9  ;;  %3044 = vmatpush3.bf16.msra.mxu0 %v4279_v10 }
 0x46d   :  { %1889 = vmatprep.subr.bf16.mxu1 %v4282_v11  ;;  %3045 = vmatprep.subr.bf16.mxu0 %v4909_v23 }
 0x470   :  { %1890 = vmatpush1.bf16.msra.mxu1 %v4286_v12  ;;  %3046 = vmatpush3.bf16.msra.mxu0 %v4289_v13 }
 0x471   :  { %1891 = vmatprep.subr.bf16.mxu1 %v4292_v14  ;;  %3047 = vmatprep.subr.bf16.mxu0 %v4909_v23 }
 0x474   :  { %1892 = vmatpush1.bf16.msra.mxu1 %v4296_v15  ;;  %3048 = vmatpush3.bf16.msra.mxu0 %v4299_v16 }
 0x475   :  { %1893 = vmatprep.subr.bf16.mxu1 %v4302_v17  ;;  %3049 = vmatprep.subr.bf16.mxu0 %v4909_v23 }
 0x478   :  { %1894 = vmatpush1.bf16.msra.mxu1 %v4440_v3  ;;  %3050 = vmatpush3.bf16.msra.mxu0 %v4952_v29 }
 0x479   :  { %1895 = vmatprep.subr.bf16.mxu1 %v4953_v58  ;;  %3051 = vmatprep.subr.bf16.mxu0 %v4909_v23 }
 0x47c   :  { %1896 = vmatpush1.bf16.msra.mxu1 %v4954_v32  ;;  %3052 = vmatpush3.bf16.msra.mxu0 %v4955_v61 }
 0x47d   :  { %1897 = vmatprep.subr.bf16.mxu1 %v4956_v48  ;;  %3053 = vmatprep.subr.bf16.mxu0 %v4909_v23 }
 0x480   :  { %1898 = vmatpush1.bf16.msra.mxu1 %v4957_v52  ;;  %3054 = vmatpush3.bf16.msra.mxu0 %v4958_v26 }
 0x481   :  { %1899 = vmatprep.subr.bf16.mxu1 %v4959_v62  ;;  %3055 = vmatprep.subr.bf16.mxu0 %v4909_v23 }
 0x484   :  { %1900 = vmatpush1.bf16.msra.mxu1 %v4960_v37  ;;  %3056 = vmatpush3.bf16.msra.mxu0 %v4961_v53 }
 0x485   :  { %1988 = vmatprep.subr.bf16.mxu1 %v4962_v44  ;;  %3061 = vmatprep.subr.bf16.mxu0 %v4909_v23 }
 0x507   :  { %v1709_v4 = vpop.f32.mrf.mxu1  ;;  %v1750_v60 = vpop.f32.mrf.mxu0 }
 0x508   :  { %v1756_v18 = vadd.f32 %v1709_v4, %v4963_v27  ;;  %v4573_v4 = vld [vmem:[%s4799_s8] ss:$0 sm:$0xff] }
 0x509   :  { %v1711_v0 = vpop.f32.mrf.mxu1  ;;  %v3019_v34 = vpop.f32.mrf.mxu0  ;;  %4965 = vst [vmem:[#allocation26_spill] sm:$0xff] %v4573_v4  ;;  %v1770_v27 = vadd.f32 %v4573_v4, %v1750_v60 }
 0x50a   :  { %v2651_v21 = vmul.f32 -1.442695, %v1756_v18  ;;  %v1763_v37 = vadd.f32 %v1711_v0, %v4964_v63  ;;  %v4966_v18 = vld [vmem:[#allocation60_spill] sm:$0xff]  ;;  %v4968_v63 = vld [vmem:[#allocation62_spill] sm:$0xff] }
 0x50b   :  { %v1713_v55 = vpop.f32.mrf.mxu1  ;;  %v1753_v2 = vpop.f32.mrf.mxu0 }
 0x50c   :  { %3327 = vpow2.f32 %v2651_v21  ;;  %v2652_v62 = vmul.f32 -1.442695, %v1763_v37 }
 0x50d   :  { %v1714_v51 = vpop.f32.mrf.mxu1  ;;  %v3020_v1 = vpop.f32.mrf.mxu0 }
 0x50e   :  { %3329 = vpow2.f32 %v2652_v62 }
 0x519   :  { %v3328_v53 = vpop.eup %3327 }
 0x51a   :  { %v1760_v44 = vadd.f32 1.0, %v3328_v53 }
 0x51b   :  { %v3330_v26 = vpop.eup %3329 }
 0x51c   :  { %3331 = vrcp.f32 %v1760_v44  ;;  %v1767_v52 = vadd.f32 1.0, %v3330_v26  ;;  %v4967_v26 = vld [vmem:[#allocation42_spill] sm:$0xff] }
 0x51e   :  { %3333 = vrcp.f32 %v1767_v52 }
 0x527   :  { %v1812_v48 = vpop.f32.mrf.mxu1  ;;  %v1853_v61 = vpop.f32.mrf.mxu0 }
 0x528   :  { %v1859_v34 = vadd.f32 %v1812_v48, %v4966_v18 }
 0x529   :  { %v3332_v21 = vpop.eup %3331  ;;  %v1814_v0 = vpop.f32.mrf.mxu1 }
 0x52a   :  { %v3039_v37 = vpop.f32.mrf.mxu0  ;;  %v1771_v62 = vmul.f32 %v3332_v21, %v1770_v27  ;;  %v2653_v53 = vmul.f32 -1.442695, %v1859_v34  ;;  %v1866_v32 = vadd.f32 %v1814_v0, %v4968_v63 }
 0x52b   :  { %v1816_v44 = vpop.f32.mrf.mxu1  ;;  %v3334_v60 = vpop.eup %3333 }
 0x52c   :  { %v1856_v55 = vpop.f32.mrf.mxu0  ;;  %v1772_v2 = vadd.f32 %v1771_v62, %v4967_v26  ;;  %3335 = vpow2.f32 %v2653_v53  ;;  %v2654_v58 = vmul.f32 -1.442695, %v1866_v32  ;;  %v1774_v4 = vsub.f32 1.0, %v3334_v60  ;;  %v4969_v53 = vld [vmem:[#allocation55_spill] sm:$0xff] }
 0x52d   :  { %v1817_v51 = vpop.f32.mrf.mxu1  ;;  %v1776_v27 = vmul.f32 %v3334_v60, %v4487_v41 }
 0x52e   :  { %v3040_v1 = vpop.f32.mrf.mxu0  ;;  %3337 = vtanh.f32 %v1772_v2 }
 0x52f   :  { %3339 = vpow2.f32 %v2654_v58  ;;  %v4596_v58 = vld [vmem:[%s4800_s9] ss:$0 sm:$0xff]  ;;  %s3589_s9 = smov [#allocation9]  }
 0x530   :  { %v1873_v32 = vadd.f32 %v4596_v58, %v1853_v61  ;;  %s2522_s0 = sshll.u32 %s3589_s9, 4  ;;  %s2523_s0 = int_to_ptr.vmem [resolvable:$true] %s2522_s0 }
 0x531   :  { %s3533_s5 = scalar_lea.vmem %s2523_s0, 512  ;;  %p3538_p11 = scmp.lt.s32.totalorder %s2523_s0, %s2523_s0 }
 0x532   :  { %p3534_p10 = scmp.ne.s32.totalorder %s2523_s0, %s3533_s5  ;;  %p3539_p12 = scmp.lt.s32.totalorder %s3533_s5, %s3533_s5 }
 0x534   :  { %p3540_p13 = por %p3539_p12, %p3538_p11 }
 0x536   :  { %p3541_p0 = pnand %p3540_p13, %p3534_p10 }
 0x539   :  { %v3336_v48 = vpop.eup %3335 }
 0x53a   :  { %v1863_v18 = vadd.f32 1.0, %v3336_v48 }
 0x53b   :  { %v3338_v37 = vpop.eup %3337 }
 0x53c   :  { %3341 = vrcp.f32 %v1863_v18  ;;  %v1775_v52 = vmul.f32 %v3338_v37, %v1774_v4  ;;  %v3340_v0 = vpop.eup %3339 }
 0x53d   :  { %v1870_v41 = vadd.f32 1.0, %v3340_v0  ;;  %v4981_v0 = vld [vmem:[#allocation49_spill] sm:$0xff] }
 0x53e   :  { %v4580_v34 = vadd.f32 %v1776_v27, %v1775_v52 }
 0x53f   :  { %3343 = vrcp.f32 %v1870_v41 }
 0x540   :  { %v1881_v21 = vpack.c.bf16 %v4580_v34, %v4580_v34 }
 0x542   :  { %1882 = vst [vmem:[#allocation9 + $0x10] sm:$0xf] %v1881_v21  ;;  %1918 = vmatmul.mubr.bf16.vlgmr.msra.gmra.mxu1 %v1881_v21  ;;  %3058 = vmatmul.mubr.bf16.vlgmr.msra.gmra.mxu0 %v1881_v21 }
 0x543   :  { %1989 = vmatpush1.bf16.msra.mxu1 %v4333_v24  ;;  %3062 = vmatpush3.bf16.msra.mxu0 %v4336_v25 }
 0x544   :  { %1990 = vmatprep.subr.bf16.mxu1 %v4339_v30  ;;  %3063 = vmatprep.subr.bf16.mxu0 %v4909_v23 }
 0x545   :  { %2020 = vmatprep.mubr.bf16.mxu1 %v4910_v46  ;;  %3077 = vmatprep.mubr.msk.bf16.mxu0 %vm3587_vm1, %v4909_v23 }
 0x547   :  { %1991 = vmatpush1.bf16.msra.mxu1 %v4346_v31  ;;  %3064 = vmatpush3.bf16.msra.mxu0 %v4349_v33 }
 0x548   :  { %1992 = vmatprep.subr.bf16.mxu1 %v4353_v36  ;;  %3065 = vmatprep.subr.bf16.mxu0 %v4909_v23 }
 0x549   :  { %v3342_v4 = vpop.eup %3341 }
 0x54a   :  { %v1874_v62 = vmul.f32 %v3342_v4, %v1873_v32 }
 0x54b   :  { %1993 = vmatpush1.bf16.msra.mxu1 %v4357_v28  ;;  %3066 = vmatpush3.bf16.msra.mxu0 %v4360_v40 }
 0x54c   :  { %v1875_v44 = vadd.f32 %v1874_v62, %v4969_v53  ;;  %1994 = vmatprep.subr.bf16.mxu1 %v4364_v43  ;;  %3067 = vmatprep.subr.bf16.mxu0 %v4909_v23  ;;  %v3344_v61 = vpop.eup %3343 }
 0x54d   :  { %v1877_v55 = vsub.f32 1.0, %v3344_v61  ;;  %v1879_v51 = vmul.f32 %v3344_v61, %v4525_v35 }
 0x54e   :  { %3345 = vtanh.f32 %v1875_v44 }
 0x54f   :  { %1995 = vmatpush1.bf16.msra.mxu1 %v4368_v49  ;;  %3068 = vmatpush3.bf16.msra.mxu0 %v4371_v42 }
 0x550   :  { %1996 = vmatprep.subr.bf16.mxu1 %v4374_v20  ;;  %3069 = vmatprep.subr.bf16.mxu0 %v4909_v23 }
 0x553   :  { %1997 = vmatpush1.bf16.msra.mxu1 %v4378_v59  ;;  %3070 = vmatpush3.bf16.msra.mxu0 %v4381_v45 }
 0x554   :  { %1998 = vmatprep.subr.bf16.mxu1 %v4384_v47  ;;  %3071 = vmatprep.subr.bf16.mxu0 %v4909_v23 }
 0x557   :  { %1999 = vmatpush1.bf16.msra.mxu1 %v4388_v38  ;;  %3072 = vmatpush3.bf16.msra.mxu0 %v4391_v19 }
 0x558   :  { %2000 = vmatprep.subr.bf16.mxu1 %v4394_v22  ;;  %3073 = vmatprep.subr.bf16.mxu0 %v4909_v23 }
 0x55b   :  { %v3346_v26 = vpop.eup %3345  ;;  %2001 = vmatpush1.bf16.msra.mxu1 %v4398_v50  ;;  %3074 = vmatpush3.bf16.msra.mxu0 %v4401_v39 }
 0x55c   :  { %2002 = vmatprep.subr.bf16.mxu1 %v4404_v54  ;;  %3075 = vmatprep.subr.bf16.mxu0 %v4909_v23  ;;  %v1878_v2 = vmul.f32 %v3346_v26, %v1877_v55  ;;  %v4982_v26 = vld [vmem:[#allocation26_spill] sm:$0xff] }
 0x55e   :  { %v4623_v1 = vadd.f32 %v1879_v51, %v1878_v2  ;;  %v4983_v51 = vld [vmem:[#allocation56_spill] sm:$0xff] }
 0x55f   :  { %2003 = vmatpush1.bf16.msra.mxu1 %v4411_v56  ;;  %3076 = vmatpush3.bf16.msra.mxu0 %v4414_v57 }
 0x560   :  { %v1883_v63 = vpack.c.bf16 %v4623_v1, %v4623_v1  ;;  %2095 = vmatprep.subr.bf16.mxu1 %v4259_v5  ;;  %3081 = vmatprep.subr.bf16.mxu0 %v4909_v23  ;;  %v4970_v5 = vld [vmem:[#allocation18_spill] sm:$0xff] }
 0x562   :  { %1884 = vst [vmem:[#allocation10 + $0xc] sm:$0xf] %v1883_v63  ;;  %2021 = vmatmul.mubr.bf16.vlgmr.msra.gmra.mxu1 %v1883_v63  ;;  %3078 = vmatmul.mubr.bf16.vlgmr.msra.gmra.mxu0 %v1883_v63 }
 0x563   :  { %2096 = vmatpush1.bf16.msra.mxu1 %v4263_v6  ;;  %3082 = vmatpush3.bf16.msra.mxu0 %v4266_v7  ;;  %v4971_v6 = vld [vmem:[#allocation17_spill] sm:$0xff]  ;;  %v4972_v7 = vld [vmem:[#allocation19_spill] sm:$0xff] }
 0x564   :  { %2097 = vmatprep.subr.bf16.mxu1 %v4269_v8  ;;  %3083 = vmatprep.subr.bf16.mxu0 %v4909_v23  ;;  %v4973_v8 = vld [vmem:[#allocation21_spill] sm:$0xff] }
 0x565   :  { %2127 = vmatprep.mubr.bf16.mxu1 %v4910_v46  ;;  %3097 = vmatprep.mubr.msk.bf16.mxu0 %vm3587_vm1, %v4909_v23 }
 0x567   :  { %2098 = vmatpush1.bf16.msra.mxu1 %v4276_v9  ;;  %3084 = vmatpush3.bf16.msra.mxu0 %v4279_v10  ;;  %v4974_v9 = vld [vmem:[#allocation20_spill] sm:$0xff]  ;;  %v4975_v10 = vld [vmem:[#allocation22_spill] sm:$0xff] }
 0x568   :  { %2099 = vmatprep.subr.bf16.mxu1 %v4282_v11  ;;  %3085 = vmatprep.subr.bf16.mxu0 %v4909_v23  ;;  %v4976_v11 = vld [vmem:[#allocation24_spill] sm:$0xff] }
 0x56b   :  { %2100 = vmatpush1.bf16.msra.mxu1 %v4286_v12  ;;  %3086 = vmatpush3.bf16.msra.mxu0 %v4289_v13  ;;  %v4977_v12 = vld [vmem:[#allocation23_spill] sm:$0xff]  ;;  %v4978_v13 = vld [vmem:[#allocation25_spill] sm:$0xff] }
 0x56c   :  { %2101 = vmatprep.subr.bf16.mxu1 %v4292_v14  ;;  %3087 = vmatprep.subr.bf16.mxu0 %v4909_v23  ;;  %v4979_v14 = vld [vmem:[#allocation27_spill] sm:$0xff] }
 0x56f   :  { %2102 = vmatpush1.bf16.msra.mxu1 %v4296_v15  ;;  %3088 = vmatpush3.bf16.msra.mxu0 %v4299_v16 }
 0x570   :  { %2103 = vmatprep.subr.bf16.mxu1 %v4302_v17  ;;  %3089 = vmatprep.subr.bf16.mxu0 %v4909_v23  ;;  %v4980_v17 = vld [vmem:[#allocation47_spill] sm:$0xff] }
 0x573   :  { %2104 = vmatpush1.bf16.msra.mxu1 %v4440_v3  ;;  %3090 = vmatpush3.bf16.msra.mxu0 %v4952_v29 }
 0x574   :  { %2105 = vmatprep.subr.bf16.mxu1 %v4970_v5  ;;  %3091 = vmatprep.subr.bf16.mxu0 %v4909_v23 }
 0x577   :  { %2106 = vmatpush1.bf16.msra.mxu1 %v4971_v6  ;;  %3092 = vmatpush3.bf16.msra.mxu0 %v4972_v7 }
 0x578   :  { %2107 = vmatprep.subr.bf16.mxu1 %v4973_v8  ;;  %3093 = vmatprep.subr.bf16.mxu0 %v4909_v23 }
 0x57b   :  { %2108 = vmatpush1.bf16.msra.mxu1 %v4974_v9  ;;  %3094 = vmatpush3.bf16.msra.mxu0 %v4975_v10 }
 0x57c   :  { %2109 = vmatprep.subr.bf16.mxu1 %v4976_v11  ;;  %3095 = vmatprep.subr.bf16.mxu0 %v4909_v23 }
 0x57f   :  { %2110 = vmatpush1.bf16.msra.mxu1 %v4977_v12  ;;  %3096 = vmatpush3.bf16.msra.mxu0 %v4978_v13 }
 0x580   :  { %2198 = vmatprep.subr.bf16.mxu1 %v4979_v14  ;;  %3101 = vmatprep.subr.bf16.mxu0 %v4909_v23 }
 0x602   :  { %v1919_v15 = vpop.f32.mrf.mxu1  ;;  %v1960_v16 = vpop.f32.mrf.mxu0 }
 0x603   :  { %v1966_v35 = vadd.f32 %v1919_v15, %v4980_v17  ;;  %v1980_v2 = vadd.f32 %v4982_v26, %v1960_v16 }
 0x604   :  { %v1921_v60 = vpop.f32.mrf.mxu1  ;;  %v3059_v48 = vpop.f32.mrf.mxu0 }
 0x605   :  { %v2655_v18 = vmul.f32 -1.442695, %v1966_v35  ;;  %v1973_v41 = vadd.f32 %v1921_v60, %v4981_v0 }
 0x606   :  { %v1923_v37 = vpop.f32.mrf.mxu1  ;;  %v1963_v52 = vpop.f32.mrf.mxu0 }
 0x607   :  { %3347 = vpow2.f32 %v2655_v18  ;;  %v2656_v32 = vmul.f32 -1.442695, %v1973_v41  ;;  %v4984_v52 = vld [vmem:[#allocation46_spill] sm:$0xff] }
 0x608   :  { %v1924_v27 = vpop.f32.mrf.mxu1  ;;  %v3060_v21 = vpop.f32.mrf.mxu0  ;;  %v4985_v41 = vld [vmem:[#allocation58_spill] sm:$0xff] }
 0x609   :  { %3349 = vpow2.f32 %v2656_v32 }
 0x614   :  { %v3348_v4 = vpop.eup %3347 }
 0x615   :  { %v1970_v62 = vadd.f32 1.0, %v3348_v4 }
 0x616   :  { %v3350_v53 = vpop.eup %3349 }
 0x617   :  { %3351 = vrcp.f32 %v1970_v62  ;;  %v1977_v44 = vadd.f32 1.0, %v3350_v53 }
 0x619   :  { %3353 = vrcp.f32 %v1977_v44 }
 0x622   :  { %v2022_v61 = vpop.f32.mrf.mxu1  ;;  %v2063_v55 = vpop.f32.mrf.mxu0 }
 0x623   :  { %v2069_v63 = vadd.f32 %v2022_v61, %v4983_v51 }
 0x624   :  { %v3352_v15 = vpop.eup %3351  ;;  %v2024_v17 = vpop.f32.mrf.mxu1 }
 0x625   :  { %v3079_v35 = vpop.f32.mrf.mxu0  ;;  %v1981_v48 = vmul.f32 %v3352_v15, %v1980_v2  ;;  %v2657_v18 = vmul.f32 -1.442695, %v2069_v63  ;;  %v2076_v32 = vadd.f32 %v2024_v17, %v4985_v41  ;;  %v4989_v41 = vld [vmem:[#allocation52_spill] sm:$0xff] }
 0x626   :  { %v2026_v60 = vpop.f32.mrf.mxu1  ;;  %v3354_v16 = vpop.eup %3353  ;;  %v2083_v35 = vadd.f32 %v4596_v58, %v2063_v55 }
 0x627   :  { %v2066_v37 = vpop.f32.mrf.mxu0  ;;  %v1982_v27 = vadd.f32 %v1981_v48, %v4984_v52  ;;  %3355 = vpow2.f32 %v2657_v18  ;;  %v2658_v4 = vmul.f32 -1.442695, %v2076_v32  ;;  %v1984_v61 = vsub.f32 1.0, %v3354_v16  ;;  %v4988_v18 = vld [vmem:[#allocation29_spill] sm:$0xff] }
 0x628   :  { %v2027_v21 = vpop.f32.mrf.mxu1  ;;  %v1986_v2 = vmul.f32 %v3354_v16, %v4580_v34 }
 0x629   :  { %v3080_v0 = vpop.f32.mrf.mxu0  ;;  %3357 = vtanh.f32 %v1982_v27 }
 0x62a   :  { %3359 = vpow2.f32 %v2658_v4 }
 0x634   :  { %v3356_v62 = vpop.eup %3355 }
 0x635   :  { %v2073_v53 = vadd.f32 1.0, %v3356_v62 }
 0x636   :  { %v3358_v51 = vpop.eup %3357 }
 0x637   :  { %3361 = vrcp.f32 %v2073_v53  ;;  %v1985_v44 = vmul.f32 %v3358_v51, %v1984_v61  ;;  %v3360_v17 = vpop.eup %3359 }
 0x638   :  { %v2080_v34 = vadd.f32 1.0, %v3360_v17 }
 0x639   :  { %v4673_v63 = vadd.f32 %v1986_v2, %v1985_v44  ;;  %v4990_v2 = vld [vmem:[#allocation40_spill] sm:$0xff] }
 0x63a   :  { %3363 = vrcp.f32 %v2080_v34 }
 0x63b   :  { %v2091_v15 = vpack.c.bf16 %v4673_v63, %v4673_v63 }
 0x63d   :  { %2092 = vst [vmem:[#allocation9 + $0x14] sm:$0xf] %v2091_v15  ;;  %2128 = vmatmul.mubr.bf16.vlgmr.msra.gmra.mxu1 %v2091_v15  ;;  %3098 = vmatmul.mubr.bf16.vlgmr.msra.gmra.mxu0 %v2091_v15 }
 0x63e   :  { %2199 = vmatpush1.bf16.msra.mxu1 %v4333_v24  ;;  %3102 = vmatpush3.bf16.msra.mxu0 %v4336_v25 }
 0x63f   :  { %2200 = vmatprep.subr.bf16.mxu1 %v4339_v30  ;;  %3103 = vmatprep.subr.bf16.mxu0 %v4909_v23  ;;  %v4986_v30 = vld [vmem:[#allocation51_spill] sm:$0xff] }
 0x640   :  { %2230 = vmatprep.mubr.bf16.mxu1 %v4910_v46  ;;  %3117 = vmatprep.mubr.msk.bf16.mxu0 %vm3587_vm1, %v4909_v23 }
 0x642   :  { %2201 = vmatpush1.bf16.msra.mxu1 %v4346_v31  ;;  %3104 = vmatpush3.bf16.msra.mxu0 %v4349_v33 }
 0x643   :  { %2202 = vmatprep.subr.bf16.mxu1 %v4353_v36  ;;  %3105 = vmatprep.subr.bf16.mxu0 %v4909_v23 }
 0x644   :  { %v3362_v24 = vpop.eup %3361 }
 0x645   :  { %v2084_v25 = vmul.f32 %v3362_v24, %v2083_v35  ;;  %v4991_v35 = vld [vmem:[#allocation54_spill] sm:$0xff] }
 0x646   :  { %2203 = vmatpush1.bf16.msra.mxu1 %v4357_v28  ;;  %3106 = vmatpush3.bf16.msra.mxu0 %v4360_v40 }
 0x647   :  { %v2085_v48 = vadd.f32 %v2084_v25, %v4986_v30  ;;  %2204 = vmatprep.subr.bf16.mxu1 %v4364_v43  ;;  %3107 = vmatprep.subr.bf16.mxu0 %v4909_v23  ;;  %v3364_v31 = vpop.eup %3363 }
 0x648   :  { %v2087_v33 = vsub.f32 1.0, %v3364_v31  ;;  %v2089_v40 = vmul.f32 %v3364_v31, %v4623_v1  ;;  %v4987_v1 = vld [vmem:[#allocation28_spill] sm:$0xff] }
 0x649   :  { %3365 = vtanh.f32 %v2085_v48 }
 0x64a   :  { %2205 = vmatpush1.bf16.msra.mxu1 %v4368_v49  ;;  %3108 = vmatpush3.bf16.msra.mxu0 %v4371_v42  ;;  %v3457_v42 = vld [vmem:[#allocation4 + $0xac] ss:$12 sps:$4 sm:$0xff]  }
 0x64b   :  { %2206 = vmatprep.subr.bf16.mxu1 %v4374_v20  ;;  %3109 = vmatprep.subr.bf16.mxu0 %v4909_v23  ;;  %v3458_v20 = vld [vmem:[#allocation4 + $0xa8] ss:$12 sps:$4 sm:$0xff]  }
 0x64e   :  { %2207 = vmatpush1.bf16.msra.mxu1 %v4378_v59  ;;  %3110 = vmatpush3.bf16.msra.mxu0 %v4381_v45  ;;  %v3459_v59 = vld [vmem:[#allocation4 + $0xb0] ss:$12 sps:$4 sm:$0xff]   ;;  %v3460_v45 = vld [vmem:[#allocation4 + $0x94] ss:$12 sps:$4 sm:$0xff]  }
 0x64f   :  { %2208 = vmatprep.subr.bf16.mxu1 %v4384_v47  ;;  %3111 = vmatprep.subr.bf16.mxu0 %v4909_v23  ;;  %v3461_v47 = vld [vmem:[#allocation4 + $0x90] ss:$12 sps:$4 sm:$0xff]  }
 0x652   :  { %2209 = vmatpush1.bf16.msra.mxu1 %v4388_v38  ;;  %3112 = vmatpush3.bf16.msra.mxu0 %v4391_v19  ;;  %v3462_v38 = vld [vmem:[#allocation4 + $0x98] ss:$12 sps:$4 sm:$0xff]   ;;  %v3463_v19 = vld [vmem:[#allocation4 + $0x7c] ss:$12 sps:$4 sm:$0xff]  }
 0x653   :  { %2210 = vmatprep.subr.bf16.mxu1 %v4394_v22  ;;  %3113 = vmatprep.subr.bf16.mxu0 %v4909_v23  ;;  %v3464_v22 = vld [vmem:[#allocation4 + $0x78] ss:$12 sps:$4 sm:$0xff]  }
 0x656   :  { %v3366_v36 = vpop.eup %3365  ;;  %2211 = vmatpush1.bf16.msra.mxu1 %v4398_v50  ;;  %3114 = vmatpush3.bf16.msra.mxu0 %v4401_v39  ;;  %v3465_v50 = vld [vmem:[#allocation4 + $0x80] ss:$12 sps:$4 sm:$0xff]   ;;  %v3466_v39 = vld [vmem:[#allocation4 + $0x64] ss:$12 sps:$4 sm:$0xff]  }
 0x657   :  { %2212 = vmatprep.subr.bf16.mxu1 %v4404_v54  ;;  %3115 = vmatprep.subr.bf16.mxu0 %v4909_v23  ;;  %v2088_v28 = vmul.f32 %v3366_v36, %v2087_v33  ;;  %v3467_v54 = vld [vmem:[#allocation4 + $0x60] ss:$12 sps:$4 sm:$0xff]  }
 0x659   :  { %v4711_v43 = vadd.f32 %v2089_v40, %v2088_v28 }
 0x65a   :  { %2213 = vmatpush1.bf16.msra.mxu1 %v4411_v56  ;;  %3116 = vmatpush3.bf16.msra.mxu0 %v4414_v57  ;;  %v3468_v56 = vld [vmem:[#allocation4 + $0x68] ss:$12 sps:$4 sm:$0xff]   ;;  %v3469_v57 = vld [vmem:[#allocation4 + $0x4c] ss:$12 sps:$4 sm:$0xff]  }
 0x65b   :  { %v2093_v49 = vpack.c.bf16 %v4711_v43, %v4711_v43  ;;  %2305 = vmatprep.subr.bf16.mxu1 %v3457_v42  ;;  %3121 = vmatprep.subr.bf16.mxu0 %v4909_v23 }
 0x65d   :  { %2094 = vst [vmem:[#allocation10 + $0x8] sm:$0xf] %v2093_v49  ;;  %2231 = vmatmul.mubr.bf16.vlgmr.msra.gmra.mxu1 %v2093_v49  ;;  %3118 = vmatmul.mubr.bf16.vlgmr.msra.gmra.mxu0 %v2093_v49 }
 0x65e   :  { %2306 = vmatpush1.bf16.msra.mxu1 %v3458_v20  ;;  %3122 = vmatpush3.bf16.msra.mxu0 %v3459_v59  ;;  %v3470_v59 = vld [vmem:[#allocation7 + $0xa8] ss:$12 sps:$4 sm:$0xff]  }
 0x65f   :  { %2307 = vmatprep.subr.bf16.mxu1 %v3460_v45  ;;  %3123 = vmatprep.subr.bf16.mxu0 %v4909_v23  ;;  %v3471_v45 = vld [vmem:[#allocation7 + $0xb0] ss:$12 sps:$4 sm:$0xff]  }
 0x660   :  { %2337 = vmatprep.mubr.bf16.mxu1 %v4910_v46  ;;  %3137 = vmatprep.mubr.msk.bf16.mxu0 %vm3587_vm1, %v4909_v23 }
 0x662   :  { %2308 = vmatpush1.bf16.msra.mxu1 %v3461_v47  ;;  %3124 = vmatpush3.bf16.msra.mxu0 %v3462_v38  ;;  %v3472_v47 = vld [vmem:[#allocation7 + $0x94] ss:$12 sps:$4 sm:$0xff]   ;;  %v3473_v38 = vld [vmem:[#allocation7 + $0x90] ss:$12 sps:$4 sm:$0xff]  }
 0x663   :  { %2309 = vmatprep.subr.bf16.mxu1 %v3463_v19  ;;  %3125 = vmatprep.subr.bf16.mxu0 %v4909_v23  ;;  %v3474_v19 = vld [vmem:[#allocation7 + $0x98] ss:$12 sps:$4 sm:$0xff]  }
 0x666   :  { %2310 = vmatpush1.bf16.msra.mxu1 %v3464_v22  ;;  %3126 = vmatpush3.bf16.msra.mxu0 %v3465_v50  ;;  %v3475_v50 = vld [vmem:[#allocation7 + $0x7c] ss:$12 sps:$4 sm:$0xff]  }
 0x667   :  { %2311 = vmatprep.subr.bf16.mxu1 %v3466_v39  ;;  %3127 = vmatprep.subr.bf16.mxu0 %v4909_v23 }
 0x66a   :  { %2312 = vmatpush1.bf16.msra.mxu1 %v3467_v54  ;;  %3128 = vmatpush3.bf16.msra.mxu0 %v3468_v56  ;;  %v3476_v56 = vld [vmem:[#allocation7 + $0x78] ss:$12 sps:$4 sm:$0xff]  }
 0x66b   :  { %2313 = vmatprep.subr.bf16.mxu1 %v3469_v57  ;;  %3129 = vmatprep.subr.bf16.mxu0 %v4909_v23  ;;  %v4992_v57 = vld [vmem:[#allocation57_spill] sm:$0xff] }
 0x66e   :  { %2314 = vmatpush1.bf16.msra.mxu1 %v4440_v3  ;;  %3130 = vmatpush3.bf16.msra.mxu0 %v4952_v29 }
 0x66f   :  { %2315 = vmatprep.subr.bf16.mxu1 %v4970_v5  ;;  %3131 = vmatprep.subr.bf16.mxu0 %v4909_v23 }
 0x672   :  { %2316 = vmatpush1.bf16.msra.mxu1 %v4971_v6  ;;  %3132 = vmatpush3.bf16.msra.mxu0 %v4972_v7 }
 0x673   :  { %2317 = vmatprep.subr.bf16.mxu1 %v4973_v8  ;;  %3133 = vmatprep.subr.bf16.mxu0 %v4909_v23 }
 0x676   :  { %2318 = vmatpush1.bf16.msra.mxu1 %v4974_v9  ;;  %3134 = vmatpush3.bf16.msra.mxu0 %v4975_v10 }
 0x677   :  { %2319 = vmatprep.subr.bf16.mxu1 %v4976_v11  ;;  %3135 = vmatprep.subr.bf16.mxu0 %v4909_v23 }
 0x67a   :  { %2320 = vmatpush1.bf16.msra.mxu1 %v4977_v12  ;;  %3136 = vmatpush3.bf16.msra.mxu0 %v4978_v13 }
 0x67b   :  { %2408 = vmatprep.subr.bf16.mxu1 %v4979_v14  ;;  %3141 = vmatprep.subr.bf16.mxu0 %v4909_v23 }
 0x6fd   :  { %v2129_v3 = vpop.f32.mrf.mxu1  ;;  %v2170_v29 = vpop.f32.mrf.mxu0 }
 0x6fe   :  { %v2176_v5 = vadd.f32 %v2129_v3, %v4987_v1  ;;  %v2190_v0 = vadd.f32 %v4982_v26, %v2170_v29  ;;  %v3478_v29 = vld [vmem:[#allocation7 + $0x64] ss:$12 sps:$4 sm:$0xff]   ;;  %v3479_v1 = vld [vmem:[#allocation7 + $0x60] ss:$12 sps:$4 sm:$0xff]  }
 0x6ff   :  { %v2131_v6 = vpop.f32.mrf.mxu1  ;;  %v3099_v7 = vpop.f32.mrf.mxu0 }
 0x700   :  { %v2659_v8 = vmul.f32 -1.442695, %v2176_v5  ;;  %v2183_v12 = vadd.f32 %v2131_v6, %v4988_v18  ;;  %v3480_v5 = vld [vmem:[#allocation7 + $0x68] ss:$12 sps:$4 sm:$0xff]   ;;  %v3481_v6 = vld [vmem:[#allocation7 + $0x4c] ss:$12 sps:$4 sm:$0xff]  }
 0x701   :  { %v2133_v9 = vpop.f32.mrf.mxu1  ;;  %v2173_v10 = vpop.f32.mrf.mxu0  ;;  %v3482_v7 = vld [vmem:[#allocation7 + $0x48] ss:$12 sps:$4 sm:$0xff]  }
 0x702   :  { %3367 = vpow2.f32 %v2659_v8  ;;  %v2660_v60 = vmul.f32 -1.442695, %v2183_v12  ;;  %v3483_v8 = vld [vmem:[#allocation7 + $0x50] ss:$12 sps:$4 sm:$0xff]   ;;  %v3484_v9 = vld [vmem:[#allocation7 + $0x34] ss:$12 sps:$4 sm:$0xff]  }
 0x703   :  { %v2134_v11 = vpop.f32.mrf.mxu1  ;;  %v3100_v55 = vpop.f32.mrf.mxu0  ;;  %v3487_v18 = vld [vmem:[#allocation7 + $0x1c] ss:$12 sps:$4 sm:$0xff]  }
 0x704   :  { %3369 = vpow2.f32 %v2660_v60  ;;  %v3485_v11 = vld [vmem:[#allocation7 + $0x30] ss:$12 sps:$4 sm:$0xff]   ;;  %v3486_v55 = vld [vmem:[#allocation7 + $0x38] ss:$12 sps:$4 sm:$0xff]  }
 0x70f   :  { %v3368_v13 = vpop.eup %3367 }
 0x710   :  { %v2180_v14 = vadd.f32 1.0, %v3368_v13  ;;  %v3488_v13 = vld [vmem:[#allocation7 + $0x18] ss:$12 sps:$4 sm:$0xff]  }
 0x711   :  { %v3370_v37 = vpop.eup %3369 }
 0x712   :  { %3371 = vrcp.f32 %v2180_v14  ;;  %v2187_v52 = vadd.f32 1.0, %v3370_v37  ;;  %v3489_v14 = vld [vmem:[#allocation7 + $0x20] ss:$12 sps:$4 sm:$0xff]   ;;  %v3490_v37 = vld [vmem:[#allocation7 + $0x4] ss:$12 sps:$4 sm:$0xff]  }
 0x714   :  { %3373 = vrcp.f32 %v2187_v52 }
 0x71d   :  { %v2232_v27 = vpop.f32.mrf.mxu1  ;;  %v2273_v21 = vpop.f32.mrf.mxu0 }
 0x71e   :  { %v2279_v32 = vadd.f32 %v2232_v27, %v4989_v41  ;;  %v2293_v22 = vadd.f32 %v4596_v58, %v2273_v21  ;;  %v3492_v41 = vld [vmem:[#allocation7 + $0x8] ss:$12 sps:$4 sm:$0xff]  }
 0x71f   :  { %v3372_v4 = vpop.eup %3371  ;;  %v2234_v16 = vpop.f32.mrf.mxu1 }
 0x720   :  { %v3119_v62 = vpop.f32.mrf.mxu0  ;;  %v2191_v53 = vmul.f32 %v3372_v4, %v2190_v0  ;;  %v2661_v61 = vmul.f32 -1.442695, %v2279_v32  ;;  %v2286_v24 = vadd.f32 %v2234_v16, %v4991_v35  ;;  %v3491_v0 = vld [vmem:[#allocation7] ss:$12 sps:$4 sm:$0xff]  }
 0x721   :  { %v2236_v51 = vpop.f32.mrf.mxu1  ;;  %v3374_v30 = vpop.eup %3373  ;;  %v4993_v62 = vld [vmem:[#allocation30_spill] sm:$0xff] }
 0x722   :  { %v2276_v44 = vpop.f32.mrf.mxu0  ;;  %v2192_v15 = vadd.f32 %v2191_v53, %v4990_v2  ;;  %3375 = vpow2.f32 %v2661_v61  ;;  %v2662_v25 = vmul.f32 -1.442695, %v2286_v24  ;;  %v2194_v33 = vsub.f32 1.0, %v3374_v30 }
 0x723   :  { %v2237_v17 = vpop.f32.mrf.mxu1  ;;  %v2196_v40 = vmul.f32 %v3374_v30, %v4673_v63 }
 0x724   :  { %v3120_v34 = vpop.f32.mrf.mxu0  ;;  %3377 = vtanh.f32 %v2192_v15  ;;  %v4994_v17 = vld [vmem:[#allocation32_spill] sm:$0xff] }
 0x725   :  { %3379 = vpow2.f32 %v2662_v25 }
 0x72f   :  { %v3376_v48 = vpop.eup %3375 }
 0x730   :  { %v2283_v31 = vadd.f32 1.0, %v3376_v48 }
 0x731   :  { %v3378_v36 = vpop.eup %3377 }
 0x732   :  { %3381 = vrcp.f32 %v2283_v31  ;;  %v2195_v28 = vmul.f32 %v3378_v36, %v2194_v33  ;;  %v3380_v20 = vpop.eup %3379 }
 0x733   :  { %v2290_v63 = vadd.f32 1.0, %v3380_v20 }
 0x734   :  { %v4748_v49 = vadd.f32 %v2196_v40, %v2195_v28  ;;  %v4995_v28 = vld [vmem:[#allocation48_spill] sm:$0xff] }
 0x735   :  { %3383 = vrcp.f32 %v2290_v63 }
 0x736   :  { %v2301_v42 = vpack.c.bf16 %v4748_v49, %v4748_v49 }
 0x738   :  { %2302 = vst [vmem:[#allocation9 + $0x18] sm:$0xf] %v2301_v42  ;;  %2338 = vmatmul.mubr.bf16.vlgmr.msra.gmra.mxu1 %v2301_v42  ;;  %3138 = vmatmul.mubr.bf16.vlgmr.msra.gmra.mxu0 %v2301_v42 }
 0x739   :  { %2409 = vmatpush1.bf16.msra.mxu1 %v3470_v59  ;;  %3142 = vmatpush3.bf16.msra.mxu0 %v3471_v45 }
 0x73a   :  { %2410 = vmatprep.subr.bf16.mxu1 %v3472_v47  ;;  %3143 = vmatprep.subr.bf16.mxu0 %v4909_v23 }
 0x73b   :  { %2440 = vmatprep.mubr.bf16.mxu1 %v4910_v46  ;;  %3157 = vmatprep.mubr.msk.bf16.mxu0 %vm3587_vm1, %v4909_v23  ;;  %v3477_v46 = vld [vmem:[#allocation7 + $0x80] ss:$12 sps:$4 sm:$0xff]  }
 0x73d   :  { %2411 = vmatpush1.bf16.msra.mxu1 %v3473_v38  ;;  %3144 = vmatpush3.bf16.msra.mxu0 %v3474_v19  ;;  %v4996_v19 = vld [vmem:[#allocation44_spill] sm:$0xff] }
 0x73e   :  { %2412 = vmatprep.subr.bf16.mxu1 %v3475_v50  ;;  %3145 = vmatprep.subr.bf16.mxu0 %v4909_v23 }
 0x73f   :  { %v3382_v39 = vpop.eup %3381 }
 0x740   :  { %v2294_v54 = vmul.f32 %v3382_v39, %v2293_v22 }
 0x741   :  { %2413 = vmatpush1.bf16.msra.mxu1 %v3476_v56  ;;  %3146 = vmatpush3.bf16.msra.mxu0 %v3477_v46 }
 0x742   :  { %v2295_v3 = vadd.f32 %v2294_v54, %v4992_v57  ;;  %2414 = vmatprep.subr.bf16.mxu1 %v3478_v29  ;;  %3147 = vmatprep.subr.bf16.mxu0 %v4909_v23  ;;  %v3384_v10 = vpop.eup %3383  ;;  %v4997_v54 = vld [vmem:[#allocation50_spill] sm:$0xff] }
 0x743   :  { %v2297_v12 = vsub.f32 1.0, %v3384_v10  ;;  %v2299_v27 = vmul.f32 %v3384_v10, %v4711_v43 }
 0x744   :  { %3385 = vtanh.f32 %v2295_v3 }
 0x745   :  { %2415 = vmatpush1.bf16.msra.mxu1 %v3479_v1  ;;  %3148 = vmatpush3.bf16.msra.mxu0 %v3480_v5 }
 0x746   :  { %2416 = vmatprep.subr.bf16.mxu1 %v3481_v6  ;;  %3149 = vmatprep.subr.bf16.mxu0 %v4909_v23 }
 0x749   :  { %2417 = vmatpush1.bf16.msra.mxu1 %v3482_v7  ;;  %3150 = vmatpush3.bf16.msra.mxu0 %v3483_v8 }
 0x74a   :  { %2418 = vmatprep.subr.bf16.mxu1 %v3484_v9  ;;  %3151 = vmatprep.subr.bf16.mxu0 %v4909_v23 }
 0x74d   :  { %2419 = vmatpush1.bf16.msra.mxu1 %v3485_v11  ;;  %3152 = vmatpush3.bf16.msra.mxu0 %v3486_v55 }
 0x74e   :  { %2420 = vmatprep.subr.bf16.mxu1 %v3487_v18  ;;  %3153 = vmatprep.subr.bf16.mxu0 %v4909_v23 }
 0x751   :  { %v3386_v60 = vpop.eup %3385  ;;  %2421 = vmatpush1.bf16.msra.mxu1 %v3488_v13  ;;  %3154 = vmatpush3.bf16.msra.mxu0 %v3489_v14 }
 0x752   :  { %2422 = vmatprep.subr.bf16.mxu1 %v3490_v37  ;;  %3155 = vmatprep.subr.bf16.mxu0 %v4909_v23  ;;  %v2298_v52 = vmul.f32 %v3386_v60, %v2297_v12 }
 0x754   :  { %v4765_v21 = vadd.f32 %v2299_v27, %v2298_v52 }
 0x755   :  { %2423 = vmatpush1.bf16.msra.mxu1 %v3491_v0  ;;  %3156 = vmatpush3.bf16.msra.mxu0 %v3492_v41 }
 0x756   :  { %v2303_v32 = vpack.c.bf16 %v4765_v21, %v4765_v21 }
 0x758   :  { %2304 = vst [vmem:[#allocation10 + $0x4] sm:$0xf] %v2303_v32  ;;  %2441 = vmatmul.mubr.bf16.vlgmr.msra.gmra.mxu1 %v2303_v32  ;;  %3158 = vmatmul.mubr.bf16.vlgmr.msra.gmra.mxu0 %v2303_v32 }
 0x7f8   :  { %v2339_v4 = vpop.f32.mrf.mxu1  ;;  %v2380_v16 = vpop.f32.mrf.mxu0 }
 0x7f9   :  { %v2386_v53 = vadd.f32 %v2339_v4, %v4993_v62  ;;  %v2400_v36 = vadd.f32 %v4982_v26, %v2380_v16 }
 0x7fa   :  { %v2341_v23 = vpop.f32.mrf.mxu1  ;;  %v3139_v61 = vpop.f32.mrf.mxu0 }
 0x7fb   :  { %v2663_v51 = vmul.f32 -1.442695, %v2386_v53  ;;  %v2393_v34 = vadd.f32 %v2341_v23, %v4994_v17 }
 0x7fc   :  { %v2343_v43 = vpop.f32.mrf.mxu1  ;;  %v2383_v44 = vpop.f32.mrf.mxu0 }
 0x7fd   :  { %3387 = vpow2.f32 %v2663_v51  ;;  %v2664_v35 = vmul.f32 -1.442695, %v2393_v34 }
 0x7fe   :  { %v2344_v2 = vpop.f32.mrf.mxu1  ;;  %v3140_v15 = vpop.f32.mrf.mxu0 }
 0x7ff   :  { %3389 = vpow2.f32 %v2664_v35 }
 0x80a   :  { %v3388_v24 = vpop.eup %3387 }
 0x80b   :  { %v2390_v25 = vadd.f32 1.0, %v3388_v24 }
 0x80c   :  { %v3390_v30 = vpop.eup %3389 }
 0x80d   :  { %3391 = vrcp.f32 %v2390_v25  ;;  %v2397_v48 = vadd.f32 1.0, %v3390_v30 }
 0x80f   :  { %3393 = vrcp.f32 %v2397_v48 }
 0x818   :  { %v2442_v31 = vpop.f32.mrf.mxu1  ;;  %v2483_v33 = vpop.f32.mrf.mxu0 }
 0x819   :  { %v2489_v40 = vadd.f32 %v2442_v31, %v4995_v28 }
 0x81a   :  { %v3392_v42 = vpop.eup %3391  ;;  %v2444_v20 = vpop.f32.mrf.mxu1 }
 0x81b   :  { %v3159_v59 = vpop.f32.mrf.mxu0  ;;  %v2401_v45 = vmul.f32 %v3392_v42, %v2400_v36  ;;  %v2665_v47 = vmul.f32 -1.442695, %v2489_v40  ;;  %v2496_v56 = vadd.f32 %v2444_v20, %v4997_v54 }
 0x81c   :  { %v2446_v63 = vpop.f32.mrf.mxu1  ;;  %v3394_v26 = vpop.eup %3393 }
 0x81d   :  { %v2486_v38 = vpop.f32.mrf.mxu0  ;;  %v2402_v22 = vadd.f32 %v2401_v45, %v4996_v19  ;;  %3395 = vpow2.f32 %v2665_v47  ;;  %v2666_v46 = vmul.f32 -1.442695, %v2496_v56  ;;  %v2404_v3 = vsub.f32 1.0, %v3394_v26 }
 0x81e   :  { %v2447_v50 = vpop.f32.mrf.mxu1  ;;  %v2406_v6 = vmul.f32 %v3394_v26, %v4748_v49 }
 0x81f   :  { %v3160_v39 = vpop.f32.mrf.mxu0  ;;  %3397 = vtanh.f32 %v2402_v22 }
 0x820   :  { %3399 = vpow2.f32 %v2666_v46 }
 0x82a   :  { %v3396_v57 = vpop.eup %3395 }
 0x82b   :  { %v2493_v29 = vadd.f32 1.0, %v3396_v57 }
 0x82c   :  { %v3398_v1 = vpop.eup %3397 }
 0x82d   :  { %v2405_v5 = vmul.f32 %v3398_v1, %v2404_v3  ;;  %3401 = vrcp.f32 %v2493_v29  ;;  %v3400_v9 = vpop.eup %3399 }
 0x82f   :  { %v2407_v7 = vadd.f32 %v2406_v6, %v2405_v5 }
 0x831   :  { %v2511_v8 = vpack.c.bf16 %v2407_v7, %v2407_v7 }
 0x833   :  { %2512 = vst [vmem:[#allocation9 + $0x1c] sm:$0xf] %v2511_v8 }
 0x834   :  { %3544 = shalt.err (!%p3541_p0)
}
 0x835   :  { %s3590_s3 = smov 64   ;;  %s3591_s15 = smov 4   ;;  %v2500_v49 = vadd.f32 1.0, %v3400_v9  ;;  %v2503_v10 = vadd.f32 %v4596_v58, %v2483_v33  ;;  %v4998_v18 = vld [vmem:[#allocation53_spill] sm:$0xff] }
 0x836   :  { %2528 = dma.vmem_to_hbm [thread:$0]  %s2523_s0, 512, %s4801_s10, [#allocation6], %s3590_s3, %s3590_s3, %s3591_s15  }
 0x837   :  { %3403 = vrcp.f32 %v2500_v49  ;;  %s3592_s18 = smov [#allocation10]  }
 0x838   :  { %s2538_s19 = sshll.u32 %s3592_s18, 4  ;;  %s2539_s19 = int_to_ptr.vmem [resolvable:$true] %s2538_s19 }
 0x839   :  { %s3553_s10 = scalar_lea.vmem %s2539_s19, 512  ;;  %p3558_p2 = scmp.lt.s32.totalorder %s2539_s19, %s2539_s19 }
 0x83a   :  { %v3402_v11 = vpop.eup %3401  ;;  %p3554_p1 = scmp.ne.s32.totalorder %s2539_s19, %s3553_s10  ;;  %p3559_p3 = scmp.lt.s32.totalorder %s3553_s10, %s3553_s10 }
 0x83b   :  { %v2504_v55 = vmul.f32 %v3402_v11, %v2503_v10 }
 0x83c   :  { %p3560_p4 = por %p3559_p3, %p3558_p2 }
 0x83d   :  { %v2505_v12 = vadd.f32 %v2504_v55, %v4998_v18 }
 0x83e   :  { %p3561_p5 = pnand %p3560_p4, %p3554_p1 }
 0x83f   :  { %3405 = vtanh.f32 %v2505_v12 }
 0x844   :  { %v3404_v60 = vpop.eup %3403 }
 0x845   :  { %v2507_v13 = vsub.f32 1.0, %v3404_v60  ;;  %v2509_v52 = vmul.f32 %v3404_v60, %v4765_v21 }
 0x84c   :  { %v3406_v14 = vpop.eup %3405 }
 0x84d   :  { %v2508_v37 = vmul.f32 %v3406_v14, %v2507_v13 }
 0x84f   :  { %v2510_v27 = vadd.f32 %v2509_v52, %v2508_v37 }
 0x851   :  { %v2513_v0 = vpack.c.bf16 %v2510_v27, %v2510_v27 }
 0x853   :  { %2514 = vst [vmem:[#allocation10] sm:$0xf] %v2513_v0 }
 0x854   :  { %3564 = shalt.err (!%p3561_p5)
}
 0x855   :  { %2544 = dma.vmem_to_hbm [thread:$0]  %s2539_s19, 512, %s4802_s11, [#allocation11], %s3590_s3, %s3590_s3, %s3591_s15  }
 0x856   :  { %3577 = dma.done.wait [#allocation6], 512  }
 0x857   :  { %3578 = vsyncadd [#allocation6], 4294966784 }
 0x858   :  { %3579 = dma.done.wait [#allocation11], 512  }
 0x859   :  { %3580 = vsyncadd [#allocation11], 4294966784 }
 0x85a   :  { %2551 = vsyncpa [#allocation5], 1 }
 0x85b   :  { %2552 = vsyncpa [#allocation8], 1 }
 0x85c   :  { %2553 = vsyncpa [#allocation6], 1 }
 0x85d   :  { %2554 = vsyncpa [#allocation11], 1 }

</bundles_post_ra>
